<compile_context>
chip_gen: v6e
topology: v6e:2x2x1
jax: 0.10.0
libtpu: 0.0.40
codegen_flags: <defaults>
</compile_context>

<pallas_src>
import functools

import jax
import jax.numpy as jnp
import numpy as np
from jax import lax
from jax.experimental import pallas as pl
from jax.experimental.pallas import tpu as pltpu


def _round_up(x, m):
    return ((x + m - 1) // m) * m


def _cdiv(a, b):
    return (a + b - 1) // b


def _pick_tile(m_rows, tile_m):
    """8-aligned M tile <= tile_m that minimizes tail padding."""
    m8 = _round_up(max(m_rows, 8), 8)
    nt = max(1, _cdiv(m8, tile_m))
    tm = _round_up(_cdiv(m8, nt), 8)
    return tm, nt * tm


# ----------------------------- Pallas kernels ------------------------------

def _down_kernel(p_ref, w_ref, o_ref):
    """LeakyReLU(0.2) + one M-tile of the stride-2 Conv2d im2col matmul, with
    the *up* path's ReLU fused into the epilogue.  bf16 MXU operands, f32
    accumulation, bf16 output (it is the up matmul's operand anyway)."""
    p = p_ref[...].astype(jnp.float32)
    p = jnp.where(p >= 0, p, 0.2 * p)                      # pad zeros stay 0
    y = jnp.dot(p.astype(jnp.bfloat16), w_ref[...],
                preferred_element_type=jnp.float32)
    o_ref[...] = jnp.maximum(y, 0.0).astype(o_ref.dtype)   # fused ReLU


def _up_kernel(cinner, cout, wp, m_img, yf_ref, w_ref, mask_ref, o_ref, st_ref):
    """Phase-decomposed ConvTranspose2d for one image.

    yf_ref  : (1, R*Wp, cinner) bf16 -- zero-padded down output, rows flattened
              so every tap of every phase is a *contiguous* row window at a
              static offset (no phase-patch materialization in HBM).
    w_ref   : (4, 4*cinner, cout) bf16 -- per phase, the 4 taps stacked along K.
    mask_ref: (m_img, 1) f32 -- zeroes the junk columns (u > wo) introduced by
              the flattened-row trick so BN sums stay exact.
    o_ref   : (1, 4, m_img, cout) bf16 -- per-phase output slabs.
    st_ref  : (1, 4, 2, cout) f32 -- per-phase sum / sum-of-squares.
    """
    mask = mask_ref[...]
    for p in range(4):                                     # phase = (ph, pw)
        ph, pw = p // 2, p % 2
        acc = jnp.zeros((m_img, cout), jnp.float32)
        for dy in range(2):
            for dx in range(2):
                off = (ph + dy) * wp + (pw + dx)           # static row offset
                tap = yf_ref[0, off:off + m_img, :]        # [m_img, cinner] bf16
                k0 = (dy * 2 + dx) * cinner
                wt = w_ref[p, k0:k0 + cinner, :]           # [cinner, cout] bf16
                acc = acc + jnp.dot(tap, wt, preferred_element_type=jnp.float32)
        acc = acc * mask
        o_ref[0, p] = acc.astype(o_ref.dtype)
        st_ref[0, p, 0:1, :] = jnp.sum(acc, axis=0, keepdims=True)
        st_ref[0, p, 1:2, :] = jnp.sum(acc * acc, axis=0, keepdims=True)


def _bn_concat_kernel(cin, cout, ho, wo, x_ref, up_ref, sb_ref, o_ref):
    """Finalize: crop the phase slabs (static slices), apply the folded BN
    scale/shift in f32, and fuse the channel concat with the f32 skip input
    into one wide store per (image, row-phase)."""
    sb = sb_ref[...]
    scale = sb[0:1, :].reshape(1, 1, cout)
    shift = sb[1:2, :].reshape(1, 1, cout)
    xv = x_ref[0, :, 0, :, :]                              # [ho, wo, 2*cin] f32
    for pw in range(2):
        ua = up_ref[0, pw]                                 # [ho+1, Wp, cout] bf16
        u = ua[:ho, :wo, :].astype(jnp.float32) * scale + shift
        xs = xv[:, :, pw * cin:(pw + 1) * cin]
        o_ref[0, pw] = jnp.concatenate([xs, u], axis=-1)


# ------------------------------- JAX glue -----------------------------------

def _im2col(xp, k, stride, ho, wo):
    """xp: [N, Hp, Wp, C] (already padded, bf16). Returns [N*ho*wo, k*k*C]."""
    n, _, _, c = xp.shape
    cols = []
    for i in range(k):
        for j in range(k):
            cols.append(
                lax.slice(
                    xp,
                    (0, i, j, 0),
                    (n, i + stride * (ho - 1) + 1, j + stride * (wo - 1) + 1, c),
                    (1, stride, stride, 1),
                )
            )
    patches = jnp.stack(cols, axis=3)                      # [N, ho, wo, k*k, C]
    return patches.reshape(n * ho * wo, k * k * c)


def unet_block_forward(x_nchw, params, *, tile_m=512, vmem_limit_bytes=None):
    """Innermost UnetBlock forward.
    x_nchw: [N, input_nc, H, W] -> [N, input_nc + outer_nc, H, W].
    tile_m: down-matmul M tile. Production sizing: 1024-2048 on v5e/v6e
    (raise vmem_limit_bytes), 256-384 on v7x (64 MiB VMEM, keep >=2 steps)."""
    assert tile_m % 8 == 0
    w_down = params["w_down"]      # [inner_nc, input_nc, 4, 4]  (Conv2d, OIHW)
    w_up = params["w_up"]          # [inner_nc, outer_nc, 4, 4]  (ConvTranspose2d, IOHW)
    gamma = params["gamma"].astype(jnp.float32)
    beta = params["beta"].astype(jnp.float32)

    n, cin, h, w = x_nchw.shape
    cinner = w_down.shape[0]
    cout = w_up.shape[1]
    k, s, p = 4, 2, 1
    # TODO(synk): odd H/W center_crop offsets not implemented (even dims only).
    assert h % 2 == 0 and w % 2 == 0

    cp = {}
    if vmem_limit_bytes is not None:
        cp["vmem_limit_bytes"] = vmem_limit_bytes

    # TODO(synk): if neighboring blocks exchange NHWC, drop this transpose and
    # the final one (they are the only full passes XLA does over x / output).
    x = jnp.transpose(x_nchw, (0, 2, 3, 1)).astype(jnp.float32)   # NHWC f32 (skip)

    # ---- down: LeakyReLU(0.2) -> Conv2d(4,2,1, no bias) -> fused ReLU ----
    ho = (h + 2 * p - k) // s + 1
    wo = (w + 2 * p - k) // s + 1
    kd = k * k * cin
    md = n * ho * wo
    xb = x.astype(jnp.bfloat16)                      # bf16 BEFORE the 4x im2col blowup
    xp = jnp.pad(xb, ((0, 0), (p, p), (p, p), (0, 0)))
    patches_d = _im2col(xp, k, s, ho, wo)            # [md, kd] bf16
    tm_d, md_pad = _pick_tile(md, tile_m)
    patches_d = jnp.pad(patches_d, ((0, md_pad - md), (0, 0)))
    w2d_d = jnp.transpose(w_down, (2, 3, 1, 0)).reshape(kd, cinner).astype(jnp.bfloat16)
    y = pl.pallas_call(
        _down_kernel,
        out_shape=jax.ShapeDtypeStruct((md_pad, cinner), jnp.bfloat16),
        grid=(md_pad // tm_d,),
        in_specs=[
            pl.BlockSpec((tm_d, kd), lambda i: (i, 0)),
            pl.BlockSpec((kd, cinner), lambda i: (0, 0)),   # weight stays resident
        ],
        out_specs=pl.BlockSpec((tm_d, cinner), lambda i: (i, 0)),
        compiler_params=pltpu.CompilerParams(dimension_semantics=("parallel",), **cp),
    )(patches_d, w2d_d)
    y = y[:md].reshape(n, ho, wo, cinner)            # post-ReLU, bf16

    # ---- up: ConvTranspose2d(4,2,1,op=1, no bias), phase-decomposed ----
    # Phase (ph,pw) output (t,u) -> true output position (2t+ph, 2u+pw).
    # Flattened-tap trick: with y padded (top 1 / bottom 3 / left 1 / right
    # Wp-wo-1 >= 2) and rows flattened, every tap of every phase is the
    # contiguous row window  [ (ph+dy)*Wp + (pw+dx) : ... + (ho+1)*Wp ).
    # Columns u in (wo, Wp) of each row group are junk (one of them can read
    # wrapped data) and are zeroed with `umask`; positions with 2t+ph >= hu or
    # 2u+pw >= wu read only zero padding and compute exactly 0, so BN sums over
    # the stored slabs equal sums over the true hu x wu output (count below).
    hu = s * ho + 1
    wu = s * wo + 1
    wp_ = _round_up(wo + 3, 8)                       # sublane-friendly phase width
    r_ = ho + 4
    m_img = (ho + 1) * wp_
    ypad = jnp.pad(y, ((0, 0), (1, r_ - ho - 1), (1, wp_ - wo - 1), (0, 0)))
    yf = ypad.reshape(n, r_ * wp_, cinner)           # free reshape, bf16
    wl = []
    for ph in range(2):
        for pw in range(2):
            taps = [w_up[:, :, 3 - ph - 2 * dy, 3 - pw - 2 * dx]
                    for dy in range(2) for dx in range(2)]
            wl.append(jnp.concatenate(taps, axis=0))         # [4*cinner, cout]
    w_up_ph = jnp.stack(wl, axis=0).astype(jnp.bfloat16)     # [4, 4*cinner, cout]
    umask = jnp.asarray(
        np.tile((np.arange(wp_) <= wo).astype(np.float32), ho + 1).reshape(m_img, 1))

    up_flat, stats = pl.pallas_call(
        functools.partial(_up_kernel, cinner, cout, wp_, m_img),
        out_shape=(jax.ShapeDtypeStruct((n, 4, m_img, cout), jnp.bfloat16),
                   jax.ShapeDtypeStruct((n, 4, 2, cout), jnp.float32)),
        grid=(n,),
        in_specs=[
            pl.BlockSpec((1, r_ * wp_, cinner), lambda b: (b, 0, 0)),
            pl.BlockSpec((4, 4 * cinner, cout), lambda b: (0, 0, 0)),
            pl.BlockSpec((m_img, 1), lambda b: (0, 0)),
        ],
        out_specs=(
            pl.BlockSpec((1, 4, m_img, cout), lambda b: (b, 0, 0, 0)),
            pl.BlockSpec((1, 4, 2, cout), lambda b: (b, 0, 0, 0)),
        ),
        compiler_params=pltpu.CompilerParams(dimension_semantics=("parallel",), **cp),
    )(yf, w_up_ph, umask)

    # ---- BatchNorm2d statistics (training-mode batch stats) ----
    # TODO(synk): E[x^2]-E[x]^2 in f32 can cancel at very large N*H*W; switch
    # to per-tile-mean (Welford) combination in this tiny reduction if needed.
    count = float(n * hu * wu)
    tot = jnp.sum(stats[:, :, 0, :], axis=(0, 1))
    tot_sq = jnp.sum(stats[:, :, 1, :], axis=(0, 1))
    mean = tot / count
    var = jnp.maximum(tot_sq / count - mean * mean, 0.0)
    scale = gamma * lax.rsqrt(var + 1e-5)
    shift = beta - mean * scale
    sb = jnp.stack([scale, shift], axis=0)                   # [2, cout] f32

    # ---- finalize: crop + BN apply + skip concat (crop offsets are 0 for even
    # H/W: keep phase rows t<ho, cols u<wo).  Phase interleave is absorbed into
    # the single mandatory NCHW output transpose below (no extra pass). ----
    x_v = x.reshape(n, ho, 2, wo, 2 * cin)                   # free reshape
    up5 = up_flat.reshape(n, 4, ho + 1, wp_, cout)           # free reshape, bf16
    cc = cin + cout
    out5 = pl.pallas_call(
        functools.partial(_bn_concat_kernel, cin, cout, ho, wo),
        out_shape=jax.ShapeDtypeStruct((n, 4, ho, wo, cc), jnp.float32),
        grid=(n, 2),
        in_specs=[
            pl.BlockSpec((1, ho, 1, wo, 2 * cin), lambda b, ph: (b, 0, ph, 0, 0)),
            pl.BlockSpec((1, 2, ho + 1, wp_, cout), lambda b, ph: (b, ph, 0, 0, 0)),
            pl.BlockSpec((2, cout), lambda b, ph: (0, 0)),
        ],
        out_specs=pl.BlockSpec((1, 2, ho, wo, cc), lambda b, ph: (b, ph, 0, 0, 0)),
        compiler_params=pltpu.CompilerParams(
            dimension_semantics=("parallel", "parallel"), **cp),
    )(x_v, up5, sb)

    out6 = out5.reshape(n, 2, 2, ho, wo, cc)
    out = jnp.transpose(out6, (0, 5, 3, 1, 4, 2)).reshape(n, cc, h, w)   # NCHW
    return out


# --------------------------- numpy reference --------------------------------

def reference_forward(x_nchw, params):
    x = np.asarray(x_nchw, np.float64)
    w_down = np.asarray(params["w_down"], np.float64)
    w_up = np.asarray(params["w_up"], np.float64)
    g = np.asarray(params["gamma"], np.float64)
    b = np.asarray(params["beta"], np.float64)

    n, cin, h, w = x.shape
    cinner = w_down.shape[0]
    cout = w_up.shape[1]

    # LeakyReLU(0.2)
    a = np.where(x >= 0, x, 0.2 * x)
    # Conv2d(k=4, s=2, p=1, bias=False)
    ap = np.pad(a, ((0, 0), (0, 0), (1, 1), (1, 1)))
    ho, wo = (h + 2 - 4) // 2 + 1, (w + 2 - 4) // 2 + 1
    y = np.zeros((n, cinner, ho, wo))
    for i in range(4):
        for j in range(4):
            patch = ap[:, :, i:i + 2 * ho:2, j:j + 2 * wo:2]
            y += np.einsum("nchw,dc->ndhw", patch, w_down[:, :, i, j])
    # ReLU
    yr = np.maximum(y, 0.0)
    # ConvTranspose2d(k=4, s=2, p=1, output_padding=1, bias=False)
    hi, wi = ho, wo
    buf = np.zeros((n, cout, 2 * hi + 2, 2 * wi + 2))
    for i in range(4):
        for j in range(4):
            contrib = np.einsum("nchw,cd->ndhw", yr, w_up[:, :, i, j])
            buf[:, :, i:i + 2 * hi:2, j:j + 2 * wi:2] += contrib
    up = buf[:, :, 1:2 * hi + 2, 1:2 * wi + 2]       # [N, cout, 2hi+1, 2wi+1]
    # BatchNorm2d (training-mode batch statistics)
    mean = up.mean(axis=(0, 2, 3), keepdims=True)
    var = up.var(axis=(0, 2, 3), keepdims=True)
    upn = (up - mean) / np.sqrt(var + 1e-5)
    upn = upn * g.reshape(1, -1, 1, 1) + b.reshape(1, -1, 1, 1)
    # center_crop + cat
    ch = (up.shape[2] - h) // 2
    cw = (up.shape[3] - w) // 2
    upc = upn[:, :, ch:ch + h, cw:cw + w]
    return np.concatenate([x, upc], axis=1)


# --------------------------------- main --------------------------------------

if __name__ == "__main__":
    # UnetBlock(outer_nc=4, inner_nc=8, innermost=True, norm_layer=BatchNorm2d)
    # -> input_nc = outer_nc = 4, conv bias disabled (BatchNorm), conv_type='sconv'.
    N, input_nc, H, W = 2, 4, 16, 16
    outer_nc, inner_nc = 4, 8

    key = jax.random.PRNGKey(0)
    k1, k2, k3, k4, k5 = jax.random.split(key, 5)
    x = jax.random.normal(k1, (N, input_nc, H, W), jnp.float32)
    params = {
        "w_down": jax.random.normal(k2, (inner_nc, input_nc, 4, 4), jnp.float32) * 0.1,
        "w_up": jax.random.normal(k3, (inner_nc, outer_nc, 4, 4), jnp.float32) * 0.1,
        # TODO(synk): BatchNorm2d uses batch statistics (PyTorch training-mode
        # default); running-stat tracking is not modeled.
        "gamma": 1.0 + 0.1 * jax.random.normal(k4, (outer_nc,), jnp.float32),
        "beta": 0.1 * jax.random.normal(k5, (outer_nc,), jnp.float32),
    }

    # Small tile so the toy shapes exercise the tiled, pipelined down path
    # (production sizes: see tile_m / vmem_limit_bytes notes above).
    fwd = jax.jit(functools.partial(unet_block_forward, tile_m=64))
    out = jax.block_until_ready(fwd(x, params))

    ref = reference_forward(x, params)
    # Tolerance reflects bf16 MXU operands / bf16 up storage (f32 accumulation
    # and f32 BN stats) vs the f64 reference, amplified by the 1/std scaling.
    np.testing.assert_allclose(np.asarray(out), ref, rtol=5e-2, atol=5e-2)
    assert out.shape == (N, input_nc + outer_nc, H, W)

    print("KERNEL_OK")
</pallas_src>

<mosaic_0001>
module attributes {stable_mosaic.version = 11 : i64} {
  func.func @_down_kernel(%arg0: i32, %arg1: memref<64x64xbf16, #tpu.memory_space<vmem>>, %arg2: memref<64x8xbf16, #tpu.memory_space<vmem>>, %arg3: memref<64x8xbf16, #tpu.memory_space<vmem>>) attributes {dimension_semantics = [#tpu.dimension_semantics<parallel>], iteration_bounds = array<i64: 2>, scalar_prefetch = 0 : i64, scratch_operands = 0 : i64, tpu.core_type = #tpu.core_type<tc>, window_params = [{transform_indices = @transform_0, window_bounds = array<i64: 64, 64>}, {pipeline_mode = #tpu.pipeline_mode<synchronous>, transform_indices = @transform_1, window_bounds = array<i64: 64, 8>}, {transform_indices = @transform_2, window_bounds = array<i64: 64, 8>}]} {
    %c0 = arith.constant 0 : index
    %c0_0 = arith.constant 0 : index
    %0 = vector.load %arg1[%c0, %c0_0] : memref<64x64xbf16, #tpu.memory_space<vmem>>, vector<64x64xbf16>
    %1 = arith.extf %0 : vector<64x64xbf16> to vector<64x64xf32>
    %cst = arith.constant 0.000000e+00 : f32
    %2 = vector.broadcast %cst : f32 to vector<64x64xf32>
    %3 = arith.cmpf oge, %1, %2 : vector<64x64xf32>
    %cst_1 = arith.constant 2.000000e-01 : f32
    %4 = vector.broadcast %cst_1 : f32 to vector<64x64xf32>
    %5 = arith.mulf %4, %1 : vector<64x64xf32>
    %6 = arith.select %3, %1, %5 : vector<64x64xi1>, vector<64x64xf32>
    %7 = arith.truncf %6 : vector<64x64xf32> to vector<64x64xbf16>
    %c0_2 = arith.constant 0 : index
    %c0_3 = arith.constant 0 : index
    %8 = vector.load %arg2[%c0_2, %c0_3] : memref<64x8xbf16, #tpu.memory_space<vmem>>, vector<64x8xbf16>
    %cst_4 = arith.constant dense<0.000000e+00> : vector<64x8xf32>
    %9 = tpu.matmul %7, %8, %cst_4 {dimension_numbers = #tpu.dot_dimension_numbers<[1], [0], [0], [1], [0, 0, 1, 1], [], []>} : vector<64x64xbf16>, vector<64x8xbf16>, vector<64x8xf32> -> vector<64x8xf32>
    %cst_5 = arith.constant 0.000000e+00 : f32
    %10 = vector.broadcast %cst_5 : f32 to vector<64x8xf32>
    %11 = arith.maximumf %9, %10 : vector<64x8xf32>
    %12 = arith.truncf %11 : vector<64x8xf32> to vector<64x8xbf16>
    %c0_6 = arith.constant 0 : index
    %c0_7 = arith.constant 0 : index
    %13 = vector.load %arg3[%c0_6, %c0_7] : memref<64x8xbf16, #tpu.memory_space<vmem>>, vector<64x8xbf16>
    tpu.vector_store %arg3[%c0_6, %c0_7], %12 {strides = array<i32>} : memref<64x8xbf16, #tpu.memory_space<vmem>>, vector<64x8xbf16>,
    return
  }
  func.func @transform_0(%arg0: i32) -> (i32, i32) {
    %c0_i32 = arith.constant 0 : i32
    %c0_i32_0 = arith.constant 0 : i32
    return %arg0, %c0_i32 : i32, i32
  }
  func.func @transform_1(%arg0: i32) -> (i32, i32) {
    %c0_i32 = arith.constant 0 : i32
    %c0_i32_0 = arith.constant 0 : i32
    %c0_i32_1 = arith.constant 0 : i32
    return %c0_i32, %c0_i32_0 : i32, i32
  }
  func.func @transform_2(%arg0: i32) -> (i32, i32) {
    %c0_i32 = arith.constant 0 : i32
    %c0_i32_0 = arith.constant 0 : i32
    return %arg0, %c0_i32 : i32, i32
  }
}

module attributes {stable_mosaic.version = 11 : i64} {
  func.func @_up_kernel(%arg0: i32, %arg1: memref<1x192x8xbf16, #tpu.memory_space<vmem>>, %arg2: memref<4x32x4xbf16, #tpu.memory_space<vmem>>, %arg3: memref<144x1xf32, #tpu.memory_space<vmem>>, %arg4: memref<1x4x144x4xbf16, #tpu.memory_space<vmem>>, %arg5: memref<1x4x2x4xf32, #tpu.memory_space<vmem>>) attributes {dimension_semantics = [#tpu.dimension_semantics<parallel>], iteration_bounds = array<i64: 2>, scalar_prefetch = 0 : i64, scratch_operands = 0 : i64, tpu.core_type = #tpu.core_type<tc>, window_params = [{transform_indices = @transform_0, window_bounds = array<i64: 1, 192, 8>}, {pipeline_mode = #tpu.pipeline_mode<synchronous>, transform_indices = @transform_1, window_bounds = array<i64: 4, 32, 4>}, {pipeline_mode = #tpu.pipeline_mode<synchronous>, transform_indices = @transform_2, window_bounds = array<i64: 144, 1>}, {transform_indices = @transform_3, window_bounds = array<i64: 1, 4, 144, 4>}, {transform_indices = @transform_4, window_bounds = array<i64: 1, 4, 2, 4>}]} {
    %c0 = arith.constant 0 : index
    %c0_0 = arith.constant 0 : index
    %0 = vector.load %arg3[%c0, %c0_0] : memref<144x1xf32, #tpu.memory_space<vmem>>, vector<144x1xf32>
    %cst = arith.constant 0.000000e+00 : f32
    %1 = vector.broadcast %cst : f32 to vector<144x4xf32>
    %c0_1 = arith.constant 0 : index
    %c0_2 = arith.constant 0 : index
    %c0_3 = arith.constant 0 : index
    %2 = vector.load %arg1[%c0_1, %c0_2, %c0_3] : memref<1x192x8xbf16, #tpu.memory_space<vmem>>, vector<1x144x8xbf16>
    %3 = vector.shape_cast %2 : vector<1x144x8xbf16> to vector<144x8xbf16>
    %c0_4 = arith.constant 0 : index
    %c0_5 = arith.constant 0 : index
    %c0_6 = arith.constant 0 : index
    %4 = vector.load %arg2[%c0_4, %c0_5, %c0_6] : memref<4x32x4xbf16, #tpu.memory_space<vmem>>, vector<1x8x4xbf16>
    %5 = vector.shape_cast %4 : vector<1x8x4xbf16> to vector<8x4xbf16>
    %cst_7 = arith.constant dense<0.000000e+00> : vector<144x4xf32>
    %6 = tpu.matmul %3, %5, %cst_7 {dimension_numbers = #tpu.dot_dimension_numbers<[1], [0], [0], [1], [0, 0, 1, 1], [], []>} : vector<144x8xbf16>, vector<8x4xbf16>, vector<144x4xf32> -> vector<144x4xf32>
    %7 = arith.addf %1, %6 : vector<144x4xf32>
    %c0_8 = arith.constant 0 : index
    %c1 = arith.constant 1 : index
    %c0_9 = arith.constant 0 : index
    %8 = vector.load %arg1[%c0_8, %c1, %c0_9] : memref<1x192x8xbf16, #tpu.memory_space<vmem>>, vector<1x144x8xbf16>
    %9 = vector.shape_cast %8 : vector<1x144x8xbf16> to vector<144x8xbf16>
    %c0_10 = arith.constant 0 : index
    %c8 = arith.constant 8 : index
    %c0_11 = arith.constant 0 : index
    %10 = vector.load %arg2[%c0_10, %c8, %c0_11] : memref<4x32x4xbf16, #tpu.memory_space<vmem>>, vector<1x8x4xbf16>
    %11 = vector.shape_cast %10 : vector<1x8x4xbf16> to vector<8x4xbf16>
    %cst_12 = arith.constant dense<0.000000e+00> : vector<144x4xf32>
    %12 = tpu.matmul %9, %11, %cst_12 {dimension_numbers = #tpu.dot_dimension_numbers<[1], [0], [0], [1], [0, 0, 1, 1], [], []>} : vector<144x8xbf16>, vector<8x4xbf16>, vector<144x4xf32> -> vector<144x4xf32>
    %13 = arith.addf %7, %12 : vector<144x4xf32>
    %c0_13 = arith.constant 0 : index
    %c16 = arith.constant 16 : index
    %c0_14 = arith.constant 0 : index
    %14 = vector.load %arg1[%c0_13, %c16, %c0_14] : memref<1x192x8xbf16, #tpu.memory_space<vmem>>, vector<1x144x8xbf16>
    %15 = vector.shape_cast %14 : vector<1x144x8xbf16> to vector<144x8xbf16>
    %c0_15 = arith.constant 0 : index
    %c16_16 = arith.constant 16 : index
    %c0_17 = arith.constant 0 : index
    %16 = vector.load %arg2[%c0_15, %c16_16, %c0_17] : memref<4x32x4xbf16, #tpu.memory_space<vmem>>, vector<1x8x4xbf16>
    %17 = vector.shape_cast %16 : vector<1x8x4xbf16> to vector<8x4xbf16>
    %cst_18 = arith.constant dense<0.000000e+00> : vector<144x4xf32>
    %18 = tpu.matmul %15, %17, %cst_18 {dimension_numbers = #tpu.dot_dimension_numbers<[1], [0], [0], [1], [0, 0, 1, 1], [], []>} : vector<144x8xbf16>, vector<8x4xbf16>, vector<144x4xf32> -> vector<144x4xf32>
    %19 = arith.addf %13, %18 : vector<144x4xf32>
    %c0_19 = arith.constant 0 : index
    %c17 = arith.constant 17 : index
    %c0_20 = arith.constant 0 : index
    %20 = vector.load %arg1[%c0_19, %c17, %c0_20] : memref<1x192x8xbf16, #tpu.memory_space<vmem>>, vector<1x144x8xbf16>
    %21 = vector.shape_cast %20 : vector<1x144x8xbf16> to vector<144x8xbf16>
    %c0_21 = arith.constant 0 : index
    %c24 = arith.constant 24 : index
    %c0_22 = arith.constant 0 : index
    %22 = vector.load %arg2[%c0_21, %c24, %c0_22] : memref<4x32x4xbf16, #tpu.memory_space<vmem>>, vector<1x8x4xbf16>
    %23 = vector.shape_cast %22 : vector<1x8x4xbf16> to vector<8x4xbf16>
    %cst_23 = arith.constant dense<0.000000e+00> : vector<144x4xf32>
    %24 = tpu.matmul %21, %23, %cst_23 {dimension_numbers = #tpu.dot_dimension_numbers<[1], [0], [0], [1], [0, 0, 1, 1], [], []>} : vector<144x8xbf16>, vector<8x4xbf16>, vector<144x4xf32> -> vector<144x4xf32>
    %25 = arith.addf %19, %24 : vector<144x4xf32>
    %26 = vector.broadcast %0 : vector<144x1xf32> to vector<144x4xf32>
    %27 = arith.mulf %25, %26 : vector<144x4xf32>
    %28 = arith.truncf %27 : vector<144x4xf32> to vector<144x4xbf16>
    %c0_24 = arith.constant 0 : index
    %c0_25 = arith.constant 0 : index
    %c0_26 = arith.constant 0 : index
    %c0_27 = arith.constant 0 : index
    %29 = vector.load %arg4[%c0_24, %c0_25, %c0_26, %c0_27] : memref<1x4x144x4xbf16, #tpu.memory_space<vmem>>, vector<1x1x144x4xbf16>
    %30 = vector.shape_cast %29 : vector<1x1x144x4xbf16> to vector<144x4xbf16>
    %31 = vector.shape_cast %28 : vector<144x4xbf16> to vector<1x1x144x4xbf16>
    tpu.vector_store %arg4[%c0_24, %c0_25, %c0_26, %c0_27], %31 {strides = array<i32>} : memref<1x4x144x4xbf16, #tpu.memory_space<vmem>>, vector<1x1x144x4xbf16>,
    %cst_28 = arith.constant dense<0.000000e+00> : vector<4xf32>
    %32 = vector.multi_reduction <add>, %27, %cst_28 [0] : vector<144x4xf32> to vector<4xf32>
    %33 = vector.shape_cast %32 : vector<4xf32> to vector<1x4xf32>
    %c0_29 = arith.constant 0 : index
    %c0_30 = arith.constant 0 : index
    %c0_31 = arith.constant 0 : index
    %c0_32 = arith.constant 0 : index
    %34 = vector.load %arg5[%c0_29, %c0_30, %c0_31, %c0_32] : memref<1x4x2x4xf32, #tpu.memory_space<vmem>>, vector<1x1x1x4xf32>
    %35 = vector.shape_cast %34 : vector<1x1x1x4xf32> to vector<1x4xf32>
    %36 = vector.shape_cast %33 : vector<1x4xf32> to vector<1x1x1x4xf32>
    tpu.vector_store %arg5[%c0_29, %c0_30, %c0_31, %c0_32], %36 {strides = array<i32>} : memref<1x4x2x4xf32, #tpu.memory_space<vmem>>, vector<1x1x1x4xf32>,
    %37 = arith.mulf %27, %27 : vector<144x4xf32>
    %cst_33 = arith.constant dense<0.000000e+00> : vector<4xf32>
    %38 = vector.multi_reduction <add>, %37, %cst_33 [0] : vector<144x4xf32> to vector<4xf32>
    %39 = vector.shape_cast %38 : vector<4xf32> to vector<1x4xf32>
    %c0_34 = arith.constant 0 : index
    %c0_35 = arith.constant 0 : index
    %c1_36 = arith.constant 1 : index
    %c0_37 = arith.constant 0 : index
    %40 = vector.load %arg5[%c0_34, %c0_35, %c1_36, %c0_37] : memref<1x4x2x4xf32, #tpu.memory_space<vmem>>, vector<1x1x1x4xf32>
    %41 = vector.shape_cast %40 : vector<1x1x1x4xf32> to vector<1x4xf32>
    %42 = vector.shape_cast %39 : vector<1x4xf32> to vector<1x1x1x4xf32>
    tpu.vector_store %arg5[%c0_34, %c0_35, %c1_36, %c0_37], %42 {strides = array<i32>} : memref<1x4x2x4xf32, #tpu.memory_space<vmem>>, vector<1x1x1x4xf32>,
    %cst_38 = arith.constant 0.000000e+00 : f32
    %43 = vector.broadcast %cst_38 : f32 to vector<144x4xf32>
    %c0_39 = arith.constant 0 : index
    %c1_40 = arith.constant 1 : index
    %c0_41 = arith.constant 0 : index
    %44 = vector.load %arg1[%c0_39, %c1_40, %c0_41] : memref<1x192x8xbf16, #tpu.memory_space<vmem>>, vector<1x144x8xbf16>
    %45 = vector.shape_cast %44 : vector<1x144x8xbf16> to vector<144x8xbf16>
    %c1_42 = arith.constant 1 : index
    %c0_43 = arith.constant 0 : index
    %c0_44 = arith.constant 0 : index
    %46 = vector.load %arg2[%c1_42, %c0_43, %c0_44] : memref<4x32x4xbf16, #tpu.memory_space<vmem>>, vector<1x8x4xbf16>
    %47 = vector.shape_cast %46 : vector<1x8x4xbf16> to vector<8x4xbf16>
    %cst_45 = arith.constant dense<0.000000e+00> : vector<144x4xf32>
    %48 = tpu.matmul %45, %47, %cst_45 {dimension_numbers = #tpu.dot_dimension_numbers<[1], [0], [0], [1], [0, 0, 1, 1], [], []>} : vector<144x8xbf16>, vector<8x4xbf16>, vector<144x4xf32> -> vector<144x4xf32>
    %49 = arith.addf %43, %48 : vector<144x4xf32>
    %c0_46 = arith.constant 0 : index
    %c2 = arith.constant 2 : index
    %c0_47 = arith.constant 0 : index
    %50 = vector.load %arg1[%c0_46, %c2, %c0_47] : memref<1x192x8xbf16, #tpu.memory_space<vmem>>, vector<1x144x8xbf16>
    %51 = vector.shape_cast %50 : vector<1x144x8xbf16> to vector<144x8xbf16>
    %c1_48 = arith.constant 1 : index
    %c8_49 = arith.constant 8 : index
    %c0_50 = arith.constant 0 : index
    %52 = vector.load %arg2[%c1_48, %c8_49, %c0_50] : memref<4x32x4xbf16, #tpu.memory_space<vmem>>, vector<1x8x4xbf16>
    %53 = vector.shape_cast %52 : vector<1x8x4xbf16> to vector<8x4xbf16>
    %cst_51 = arith.constant dense<0.000000e+00> : vector<144x4xf32>
    %54 = tpu.matmul %51, %53, %cst_51 {dimension_numbers = #tpu.dot_dimension_numbers<[1], [0], [0], [1], [0, 0, 1, 1], [], []>} : vector<144x8xbf16>, vector<8x4xbf16>, vector<144x4xf32> -> vector<144x4xf32>
    %55 = arith.addf %49, %54 : vector<144x4xf32>
    %c0_52 = arith.constant 0 : index
    %c17_53 = arith.constant 17 : index
    %c0_54 = arith.constant 0 : index
    %56 = vector.load %arg1[%c0_52, %c17_53, %c0_54] : memref<1x192x8xbf16, #tpu.memory_space<vmem>>, vector<1x144x8xbf16>
    %57 = vector.shape_cast %56 : vector<1x144x8xbf16> to vector<144x8xbf16>
    %c1_55 = arith.constant 1 : index
    %c16_56 = arith.constant 16 : index
    %c0_57 = arith.constant 0 : index
    %58 = vector.load %arg2[%c1_55, %c16_56, %c0_57] : memref<4x32x4xbf16, #tpu.memory_space<vmem>>, vector<1x8x4xbf16>
    %59 = vector.shape_cast %58 : vector<1x8x4xbf16> to vector<8x4xbf16>
    %cst_58 = arith.constant dense<0.000000e+00> : vector<144x4xf32>
    %60 = tpu.matmul %57, %59, %cst_58 {dimension_numbers = #tpu.dot_dimension_numbers<[1], [0], [0], [1], [0, 0, 1, 1], [], []>} : vector<144x8xbf16>, vector<8x4xbf16>, vector<144x4xf32> -> vector<144x4xf32>
    %61 = arith.addf %55, %60 : vector<144x4xf32>
    %c0_59 = arith.constant 0 : index
    %c18 = arith.constant 18 : index
    %c0_60 = arith.constant 0 : index
    %62 = vector.load %arg1[%c0_59, %c18, %c0_60] : memref<1x192x8xbf16, #tpu.memory_space<vmem>>, vector<1x144x8xbf16>
    %63 = vector.shape_cast %62 : vector<1x144x8xbf16> to vector<144x8xbf16>
    %c1_61 = arith.constant 1 : index
    %c24_62 = arith.constant 24 : index
    %c0_63 = arith.constant 0 : index
    %64 = vector.load %arg2[%c1_61, %c24_62, %c0_63] : memref<4x32x4xbf16, #tpu.memory_space<vmem>>, vector<1x8x4xbf16>
    %65 = vector.shape_cast %64 : vector<1x8x4xbf16> to vector<8x4xbf16>
    %cst_64 = arith.constant dense<0.000000e+00> : vector<144x4xf32>
    %66 = tpu.matmul %63, %65, %cst_64 {dimension_numbers = #tpu.dot_dimension_numbers<[1], [0], [0], [1], [0, 0, 1, 1], [], []>} : vector<144x8xbf16>, vector<8x4xbf16>, vector<144x4xf32> -> vector<144x4xf32>
    %67 = arith.addf %61, %66 : vector<144x4xf32>
    %68 = vector.broadcast %0 : vector<144x1xf32> to vector<144x4xf32>
    %69 = arith.mulf %67, %68 : vector<144x4xf32>
    %70 = arith.truncf %69 : vector<144x4xf32> to vector<144x4xbf16>
    %c0_65 = arith.constant 0 : index
    %c1_66 = arith.constant 1 : index
    %c0_67 = arith.constant 0 : index
    %c0_68 = arith.constant 0 : index
    %71 = vector.load %arg4[%c0_65, %c1_66, %c0_67, %c0_68] : memref<1x4x144x4xbf16, #tpu.memory_space<vmem>>, vector<1x1x144x4xbf16>
    %72 = vector.shape_cast %71 : vector<1x1x144x4xbf16> to vector<144x4xbf16>
    %73 = vector.shape_cast %70 : vector<144x4xbf16> to vector<1x1x144x4xbf16>
    tpu.vector_store %arg4[%c0_65, %c1_66, %c0_67, %c0_68], %73 {strides = array<i32>} : memref<1x4x144x4xbf16, #tpu.memory_space<vmem>>, vector<1x1x144x4xbf16>,
    %cst_69 = arith.constant dense<0.000000e+00> : vector<4xf32>
    %74 = vector.multi_reduction <add>, %69, %cst_69 [0] : vector<144x4xf32> to vector<4xf32>
    %75 = vector.shape_cast %74 : vector<4xf32> to vector<1x4xf32>
    %c0_70 = arith.constant 0 : index
    %c1_71 = arith.constant 1 : index
    %c0_72 = arith.constant 0 : index
    %c0_73 = arith.constant 0 : index
    %76 = vector.load %arg5[%c0_70, %c1_71, %c0_72, %c0_73] : memref<1x4x2x4xf32, #tpu.memory_space<vmem>>, vector<1x1x1x4xf32>
    %77 = vector.shape_cast %76 : vector<1x1x1x4xf32> to vector<1x4xf32>
    %78 = vector.shape_cast %75 : vector<1x4xf32> to vector<1x1x1x4xf32>
    tpu.vector_store %arg5[%c0_70, %c1_71, %c0_72, %c0_73], %78 {strides = array<i32>} : memref<1x4x2x4xf32, #tpu.memory_space<vmem>>, vector<1x1x1x4xf32>,
    %79 = arith.mulf %69, %69 : vector<144x4xf32>
    %cst_74 = arith.constant dense<0.000000e+00> : vector<4xf32>
    %80 = vector.multi_reduction <add>, %79, %cst_74 [0] : vector<144x4xf32> to vector<4xf32>
    %81 = vector.shape_cast %80 : vector<4xf32> to vector<1x4xf32>
    %c0_75 = arith.constant 0 : index
    %c1_76 = arith.constant 1 : index
    %c1_77 = arith.constant 1 : index
    %c0_78 = arith.constant 0 : index
    %82 = vector.load %arg5[%c0_75, %c1_76, %c1_77, %c0_78] : memref<1x4x2x4xf32, #tpu.memory_space<vmem>>, vector<1x1x1x4xf32>
    %83 = vector.shape_cast %82 : vector<1x1x1x4xf32> to vector<1x4xf32>
    %84 = vector.shape_cast %81 : vector<1x4xf32> to vector<1x1x1x4xf32>
    tpu.vector_store %arg5[%c0_75, %c1_76, %c1_77, %c0_78], %84 {strides = array<i32>} : memref<1x4x2x4xf32, #tpu.memory_space<vmem>>, vector<1x1x1x4xf32>,
    %cst_79 = arith.constant 0.000000e+00 : f32
    %85 = vector.broadcast %cst_79 : f32 to vector<144x4xf32>
    %c0_80 = arith.constant 0 : index
    %c16_81 = arith.constant 16 : index
    %c0_82 = arith.constant 0 : index
    %86 = vector.load %arg1[%c0_80, %c16_81, %c0_82] : memref<1x192x8xbf16, #tpu.memory_space<vmem>>, vector<1x144x8xbf16>
    %87 = vector.shape_cast %86 : vector<1x144x8xbf16> to vector<144x8xbf16>
    %c2_83 = arith.constant 2 : index
    %c0_84 = arith.constant 0 : index
    %c0_85 = arith.constant 0 : index
    %88 = vector.load %arg2[%c2_83, %c0_84, %c0_85] : memref<4x32x4xbf16, #tpu.memory_space<vmem>>, vector<1x8x4xbf16>
    %89 = vector.shape_cast %88 : vector<1x8x4xbf16> to vector<8x4xbf16>
    %cst_86 = arith.constant dense<0.000000e+00> : vector<144x4xf32>
    %90 = tpu.matmul %87, %89, %cst_86 {dimension_numbers = #tpu.dot_dimension_numbers<[1], [0], [0], [1], [0, 0, 1, 1], [], []>} : vector<144x8xbf16>, vector<8x4xbf16>, vector<144x4xf32> -> vector<144x4xf32>
    %91 = arith.addf %85, %90 : vector<144x4xf32>
    %c0_87 = arith.constant 0 : index
    %c17_88 = arith.constant 17 : index
    %c0_89 = arith.constant 0 : index
    %92 = vector.load %arg1[%c0_87, %c17_88, %c0_89] : memref<1x192x8xbf16, #tpu.memory_space<vmem>>, vector<1x144x8xbf16>
    %93 = vector.shape_cast %92 : vector<1x144x8xbf16> to vector<144x8xbf16>
    %c2_90 = arith.constant 2 : index
    %c8_91 = arith.constant 8 : index
    %c0_92 = arith.constant 0 : index
    %94 = vector.load %arg2[%c2_90, %c8_91, %c0_92] : memref<4x32x4xbf16, #tpu.memory_space<vmem>>, vector<1x8x4xbf16>
    %95 = vector.shape_cast %94 : vector<1x8x4xbf16> to vector<8x4xbf16>
    %cst_93 = arith.constant dense<0.000000e+00> : vector<144x4xf32>
    %96 = tpu.matmul %93, %95, %cst_93 {dimension_numbers = #tpu.dot_dimension_numbers<[1], [0], [0], [1], [0, 0, 1, 1], [], []>} : vector<144x8xbf16>, vector<8x4xbf16>, vector<144x4xf32> -> vector<144x4xf32>
    %97 = arith.addf %91, %96 : vector<144x4xf32>
    %c0_94 = arith.constant 0 : index
    %c32 = arith.constant 32 : index
    %c0_95 = arith.constant 0 : index
    %98 = vector.load %arg1[%c0_94, %c32, %c0_95] : memref<1x192x8xbf16, #tpu.memory_space<vmem>>, vector<1x144x8xbf16>
    %99 = vector.shape_cast %98 : vector<1x144x8xbf16> to vector<144x8xbf16>
    %c2_96 = arith.constant 2 : index
    %c16_97 = arith.constant 16 : index
    %c0_98 = arith.constant 0 : index
    %100 = vector.load %arg2[%c2_96, %c16_97, %c0_98] : memref<4x32x4xbf16, #tpu.memory_space<vmem>>, vector<1x8x4xbf16>
    %101 = vector.shape_cast %100 : vector<1x8x4xbf16> to vector<8x4xbf16>
    %cst_99 = arith.constant dense<0.000000e+00> : vector<144x4xf32>
    %102 = tpu.matmul %99, %101, %cst_99 {dimension_numbers = #tpu.dot_dimension_numbers<[1], [0], [0], [1], [0, 0, 1, 1], [], []>} : vector<144x8xbf16>, vector<8x4xbf16>, vector<144x4xf32> -> vector<144x4xf32>
    %103 = arith.addf %97, %102 : vector<144x4xf32>
    %c0_100 = arith.constant 0 : index
    %c33 = arith.constant 33 : index
    %c0_101 = arith.constant 0 : index
    %104 = vector.load %arg1[%c0_100, %c33, %c0_101] : memref<1x192x8xbf16, #tpu.memory_space<vmem>>, vector<1x144x8xbf16>
    %105 = vector.shape_cast %104 : vector<1x144x8xbf16> to vector<144x8xbf16>
    %c2_102 = arith.constant 2 : index
    %c24_103 = arith.constant 24 : index
    %c0_104 = arith.constant 0 : index
    %106 = vector.load %arg2[%c2_102, %c24_103, %c0_104] : memref<4x32x4xbf16, #tpu.memory_space<vmem>>, vector<1x8x4xbf16>
    %107 = vector.shape_cast %106 : vector<1x8x4xbf16> to vector<8x4xbf16>
    %cst_105 = arith.constant dense<0.000000e+00> : vector<144x4xf32>
    %108 = tpu.matmul %105, %107, %cst_105 {dimension_numbers = #tpu.dot_dimension_numbers<[1], [0], [0], [1], [0, 0, 1, 1], [], []>} : vector<144x8xbf16>, vector<8x4xbf16>, vector<144x4xf32> -> vector<144x4xf32>
    %109 = arith.addf %103, %108 : vector<144x4xf32>
    %110 = vector.broadcast %0 : vector<144x1xf32> to vector<144x4xf32>
    %111 = arith.mulf %109, %110 : vector<144x4xf32>
    %112 = arith.truncf %111 : vector<144x4xf32> to vector<144x4xbf16>
    %c0_106 = arith.constant 0 : index
    %c2_107 = arith.constant 2 : index
    %c0_108 = arith.constant 0 : index
    %c0_109 = arith.constant 0 : index
    %113 = vector.load %arg4[%c0_106, %c2_107, %c0_108, %c0_109] : memref<1x4x144x4xbf16, #tpu.memory_space<vmem>>, vector<1x1x144x4xbf16>
    %114 = vector.shape_cast %113 : vector<1x1x144x4xbf16> to vector<144x4xbf16>
    %115 = vector.shape_cast %112 : vector<144x4xbf16> to vector<1x1x144x4xbf16>
    tpu.vector_store %arg4[%c0_106, %c2_107, %c0_108, %c0_109], %115 {strides = array<i32>} : memref<1x4x144x4xbf16, #tpu.memory_space<vmem>>, vector<1x1x144x4xbf16>,
    %cst_110 = arith.constant dense<0.000000e+00> : vector<4xf32>
    %116 = vector.multi_reduction <add>, %111, %cst_110 [0] : vector<144x4xf32> to vector<4xf32>
    %117 = vector.shape_cast %116 : vector<4xf32> to vector<1x4xf32>
    %c0_111 = arith.constant 0 : index
    %c2_112 = arith.constant 2 : index
    %c0_113 = arith.constant 0 : index
    %c0_114 = arith.constant 0 : index
    %118 = vector.load %arg5[%c0_111, %c2_112, %c0_113, %c0_114] : memref<1x4x2x4xf32, #tpu.memory_space<vmem>>, vector<1x1x1x4xf32>
    %119 = vector.shape_cast %118 : vector<1x1x1x4xf32> to vector<1x4xf32>
    %120 = vector.shape_cast %117 : vector<1x4xf32> to vector<1x1x1x4xf32>
    tpu.vector_store %arg5[%c0_111, %c2_112, %c0_113, %c0_114], %120 {strides = array<i32>} : memref<1x4x2x4xf32, #tpu.memory_space<vmem>>, vector<1x1x1x4xf32>,
    %121 = arith.mulf %111, %111 : vector<144x4xf32>
    %cst_115 = arith.constant dense<0.000000e+00> : vector<4xf32>
    %122 = vector.multi_reduction <add>, %121, %cst_115 [0] : vector<144x4xf32> to vector<4xf32>
    %123 = vector.shape_cast %122 : vector<4xf32> to vector<1x4xf32>
    %c0_116 = arith.constant 0 : index
    %c2_117 = arith.constant 2 : index
    %c1_118 = arith.constant 1 : index
    %c0_119 = arith.constant 0 : index
    %124 = vector.load %arg5[%c0_116, %c2_117, %c1_118, %c0_119] : memref<1x4x2x4xf32, #tpu.memory_space<vmem>>, vector<1x1x1x4xf32>
    %125 = vector.shape_cast %124 : vector<1x1x1x4xf32> to vector<1x4xf32>
    %126 = vector.shape_cast %123 : vector<1x4xf32> to vector<1x1x1x4xf32>
    tpu.vector_store %arg5[%c0_116, %c2_117, %c1_118, %c0_119], %126 {strides = array<i32>} : memref<1x4x2x4xf32, #tpu.memory_space<vmem>>, vector<1x1x1x4xf32>,
    %cst_120 = arith.constant 0.000000e+00 : f32
    %127 = vector.broadcast %cst_120 : f32 to vector<144x4xf32>
    %c0_121 = arith.constant 0 : index
    %c17_122 = arith.constant 17 : index
    %c0_123 = arith.constant 0 : index
    %128 = vector.load %arg1[%c0_121, %c17_122, %c0_123] : memref<1x192x8xbf16, #tpu.memory_space<vmem>>, vector<1x144x8xbf16>
    %129 = vector.shape_cast %128 : vector<1x144x8xbf16> to vector<144x8xbf16>
    %c3 = arith.constant 3 : index
    %c0_124 = arith.constant 0 : index
    %c0_125 = arith.constant 0 : index
    %130 = vector.load %arg2[%c3, %c0_124, %c0_125] : memref<4x32x4xbf16, #tpu.memory_space<vmem>>, vector<1x8x4xbf16>
    %131 = vector.shape_cast %130 : vector<1x8x4xbf16> to vector<8x4xbf16>
    %cst_126 = arith.constant dense<0.000000e+00> : vector<144x4xf32>
    %132 = tpu.matmul %129, %131, %cst_126 {dimension_numbers = #tpu.dot_dimension_numbers<[1], [0], [0], [1], [0, 0, 1, 1], [], []>} : vector<144x8xbf16>, vector<8x4xbf16>, vector<144x4xf32> -> vector<144x4xf32>
    %133 = arith.addf %127, %132 : vector<144x4xf32>
    %c0_127 = arith.constant 0 : index
    %c18_128 = arith.constant 18 : index
    %c0_129 = arith.constant 0 : index
    %134 = vector.load %arg1[%c0_127, %c18_128, %c0_129] : memref<1x192x8xbf16, #tpu.memory_space<vmem>>, vector<1x144x8xbf16>
    %135 = vector.shape_cast %134 : vector<1x144x8xbf16> to vector<144x8xbf16>
    %c3_130 = arith.constant 3 : index
    %c8_131 = arith.constant 8 : index
    %c0_132 = arith.constant 0 : index
    %136 = vector.load %arg2[%c3_130, %c8_131, %c0_132] : memref<4x32x4xbf16, #tpu.memory_space<vmem>>, vector<1x8x4xbf16>
    %137 = vector.shape_cast %136 : vector<1x8x4xbf16> to vector<8x4xbf16>
    %cst_133 = arith.constant dense<0.000000e+00> : vector<144x4xf32>
    %138 = tpu.matmul %135, %137, %cst_133 {dimension_numbers = #tpu.dot_dimension_numbers<[1], [0], [0], [1], [0, 0, 1, 1], [], []>} : vector<144x8xbf16>, vector<8x4xbf16>, vector<144x4xf32> -> vector<144x4xf32>
    %139 = arith.addf %133, %138 : vector<144x4xf32>
    %c0_134 = arith.constant 0 : index
    %c33_135 = arith.constant 33 : index
    %c0_136 = arith.constant 0 : index
    %140 = vector.load %arg1[%c0_134, %c33_135, %c0_136] : memref<1x192x8xbf16, #tpu.memory_space<vmem>>, vector<1x144x8xbf16>
    %141 = vector.shape_cast %140 : vector<1x144x8xbf16> to vector<144x8xbf16>
    %c3_137 = arith.constant 3 : index
    %c16_138 = arith.constant 16 : index
    %c0_139 = arith.constant 0 : index
    %142 = vector.load %arg2[%c3_137, %c16_138, %c0_139] : memref<4x32x4xbf16, #tpu.memory_space<vmem>>, vector<1x8x4xbf16>
    %143 = vector.shape_cast %142 : vector<1x8x4xbf16> to vector<8x4xbf16>
    %cst_140 = arith.constant dense<0.000000e+00> : vector<144x4xf32>
    %144 = tpu.matmul %141, %143, %cst_140 {dimension_numbers = #tpu.dot_dimension_numbers<[1], [0], [0], [1], [0, 0, 1, 1], [], []>} : vector<144x8xbf16>, vector<8x4xbf16>, vector<144x4xf32> -> vector<144x4xf32>
    %145 = arith.addf %139, %144 : vector<144x4xf32>
    %c0_141 = arith.constant 0 : index
    %c34 = arith.constant 34 : index
    %c0_142 = arith.constant 0 : index
    %146 = vector.load %arg1[%c0_141, %c34, %c0_142] : memref<1x192x8xbf16, #tpu.memory_space<vmem>>, vector<1x144x8xbf16>
    %147 = vector.shape_cast %146 : vector<1x144x8xbf16> to vector<144x8xbf16>
    %c3_143 = arith.constant 3 : index
    %c24_144 = arith.constant 24 : index
    %c0_145 = arith.constant 0 : index
    %148 = vector.load %arg2[%c3_143, %c24_144, %c0_145] : memref<4x32x4xbf16, #tpu.memory_space<vmem>>, vector<1x8x4xbf16>
    %149 = vector.shape_cast %148 : vector<1x8x4xbf16> to vector<8x4xbf16>
    %cst_146 = arith.constant dense<0.000000e+00> : vector<144x4xf32>
    %150 = tpu.matmul %147, %149, %cst_146 {dimension_numbers = #tpu.dot_dimension_numbers<[1], [0], [0], [1], [0, 0, 1, 1], [], []>} : vector<144x8xbf16>, vector<8x4xbf16>, vector<144x4xf32> -> vector<144x4xf32>
    %151 = arith.addf %145, %150 : vector<144x4xf32>
    %152 = vector.broadcast %0 : vector<144x1xf32> to vector<144x4xf32>
    %153 = arith.mulf %151, %152 : vector<144x4xf32>
    %154 = arith.truncf %153 : vector<144x4xf32> to vector<144x4xbf16>
    %c0_147 = arith.constant 0 : index
    %c3_148 = arith.constant 3 : index
    %c0_149 = arith.constant 0 : index
    %c0_150 = arith.constant 0 : index
    %155 = vector.load %arg4[%c0_147, %c3_148, %c0_149, %c0_150] : memref<1x4x144x4xbf16, #tpu.memory_space<vmem>>, vector<1x1x144x4xbf16>
    %156 = vector.shape_cast %155 : vector<1x1x144x4xbf16> to vector<144x4xbf16>
    %157 = vector.shape_cast %154 : vector<144x4xbf16> to vector<1x1x144x4xbf16>
    tpu.vector_store %arg4[%c0_147, %c3_148, %c0_149, %c0_150], %157 {strides = array<i32>} : memref<1x4x144x4xbf16, #tpu.memory_space<vmem>>, vector<1x1x144x4xbf16>,
    %cst_151 = arith.constant dense<0.000000e+00> : vector<4xf32>
    %158 = vector.multi_reduction <add>, %153, %cst_151 [0] : vector<144x4xf32> to vector<4xf32>
    %159 = vector.shape_cast %158 : vector<4xf32> to vector<1x4xf32>
    %c0_152 = arith.constant 0 : index
    %c3_153 = arith.constant 3 : index
    %c0_154 = arith.constant 0 : index
    %c0_155 = arith.constant 0 : index
    %160 = vector.load %arg5[%c0_152, %c3_153, %c0_154, %c0_155] : memref<1x4x2x4xf32, #tpu.memory_space<vmem>>, vector<1x1x1x4xf32>
    %161 = vector.shape_cast %160 : vector<1x1x1x4xf32> to vector<1x4xf32>
    %162 = vector.shape_cast %159 : vector<1x4xf32> to vector<1x1x1x4xf32>
    tpu.vector_store %arg5[%c0_152, %c3_153, %c0_154, %c0_155], %162 {strides = array<i32>} : memref<1x4x2x4xf32, #tpu.memory_space<vmem>>, vector<1x1x1x4xf32>,
    %163 = arith.mulf %153, %153 : vector<144x4xf32>
    %cst_156 = arith.constant dense<0.000000e+00> : vector<4xf32>
    %164 = vector.multi_reduction <add>, %163, %cst_156 [0] : vector<144x4xf32> to vector<4xf32>
    %165 = vector.shape_cast %164 : vector<4xf32> to vector<1x4xf32>
    %c0_157 = arith.constant 0 : index
    %c3_158 = arith.constant 3 : index
    %c1_159 = arith.constant 1 : index
    %c0_160 = arith.constant 0 : index
    %166 = vector.load %arg5[%c0_157, %c3_158, %c1_159, %c0_160] : memref<1x4x2x4xf32, #tpu.memory_space<vmem>>, vector<1x1x1x4xf32>
    %167 = vector.shape_cast %166 : vector<1x1x1x4xf32> to vector<1x4xf32>
    %168 = vector.shape_cast %165 : vector<1x4xf32> to vector<1x1x1x4xf32>
    tpu.vector_store %arg5[%c0_157, %c3_158, %c1_159, %c0_160], %168 {strides = array<i32>} : memref<1x4x2x4xf32, #tpu.memory_space<vmem>>, vector<1x1x1x4xf32>,
    return
  }
  func.func @transform_0(%arg0: i32) -> (i32, i32, i32) {
    %c0_i32 = arith.constant 0 : i32
    %c0_i32_0 = arith.constant 0 : i32
    %c0_i32_1 = arith.constant 0 : i32
    return %arg0, %c0_i32, %c0_i32_0 : i32, i32, i32
  }
  func.func @transform_1(%arg0: i32) -> (i32, i32, i32) {
    %c0_i32 = arith.constant 0 : i32
    %c0_i32_0 = arith.constant 0 : i32
    %c0_i32_1 = arith.constant 0 : i32
    %c0_i32_2 = arith.constant 0 : i32
    return %c0_i32, %c0_i32_0, %c0_i32_1 : i32, i32, i32
  }
  func.func @transform_2(%arg0: i32) -> (i32, i32) {
    %c0_i32 = arith.constant 0 : i32
    %c0_i32_0 = arith.constant 0 : i32
    %c0_i32_1 = arith.constant 0 : i32
    return %c0_i32, %c0_i32_0 : i32, i32
  }
  func.func @transform_3(%arg0: i32) -> (i32, i32, i32, i32) {
    %c0_i32 = arith.constant 0 : i32
    %c0_i32_0 = arith.constant 0 : i32
    %c0_i32_1 = arith.constant 0 : i32
    %c0_i32_2 = arith.constant 0 : i32
    return %arg0, %c0_i32, %c0_i32_0, %c0_i32_1 : i32, i32, i32, i32
  }
  func.func @transform_4(%arg0: i32) -> (i32, i32, i32, i32) {
    %c0_i32 = arith.constant 0 : i32
    %c0_i32_0 = arith.constant 0 : i32
    %c0_i32_1 = arith.constant 0 : i32
    %c0_i32_2 = arith.constant 0 : i32
    return %arg0, %c0_i32, %c0_i32_0, %c0_i32_1 : i32, i32, i32, i32
  }
}

module attributes {stable_mosaic.version = 11 : i64} {
  func.func @_bn_concat_kernel(%arg0: i32, %arg1: i32, %arg2: memref<1x8x1x8x8xf32, #tpu.memory_space<vmem>>, %arg3: memref<1x2x9x16x4xbf16, #tpu.memory_space<vmem>>, %arg4: memref<2x4xf32, #tpu.memory_space<vmem>>, %arg5: memref<1x2x8x8x8xf32, #tpu.memory_space<vmem>>) attributes {dimension_semantics = [#tpu.dimension_semantics<parallel>, #tpu.dimension_semantics<parallel>], iteration_bounds = array<i64: 2, 2>, scalar_prefetch = 0 : i64, scratch_operands = 0 : i64, tpu.core_type = #tpu.core_type<tc>, window_params = [{transform_indices = @transform_0, window_bounds = array<i64: 1, 8, 1, 8, 8>}, {transform_indices = @transform_1, window_bounds = array<i64: 1, 2, 9, 16, 4>}, {pipeline_mode = #tpu.pipeline_mode<synchronous>, transform_indices = @transform_2, window_bounds = array<i64: 2, 4>}, {transform_indices = @transform_3, window_bounds = array<i64: 1, 2, 8, 8, 8>}]} {
    %c0 = arith.constant 0 : index
    %c0_0 = arith.constant 0 : index
    %0 = vector.load %arg4[%c0, %c0_0] : memref<2x4xf32, #tpu.memory_space<vmem>>, vector<2x4xf32>
    %1 = vector.extract_strided_slice %0 {offsets = [0, 0], sizes = [1, 4], strides = [1, 1]} : vector<2x4xf32> to vector<1x4xf32>
    %2 = vector.shape_cast %1 : vector<1x4xf32> to vector<1x1x4xf32>
    %3 = vector.extract_strided_slice %0 {offsets = [1, 0], sizes = [1, 4], strides = [1, 1]} : vector<2x4xf32> to vector<1x4xf32>
    %4 = vector.shape_cast %3 : vector<1x4xf32> to vector<1x1x4xf32>
    %c0_1 = arith.constant 0 : index
    %c0_2 = arith.constant 0 : index
    %c0_3 = arith.constant 0 : index
    %c0_4 = arith.constant 0 : index
    %c0_5 = arith.constant 0 : index
    %5 = vector.load %arg2[%c0_1, %c0_2, %c0_3, %c0_4, %c0_5] : memref<1x8x1x8x8xf32, #tpu.memory_space<vmem>>, vector<1x8x1x8x8xf32>
    %6 = vector.shape_cast %5 : vector<1x8x1x8x8xf32> to vector<8x8x8xf32>
    %c0_6 = arith.constant 0 : index
    %c0_7 = arith.constant 0 : index
    %c0_8 = arith.constant 0 : index
    %c0_9 = arith.constant 0 : index
    %c0_10 = arith.constant 0 : index
    %7 = vector.load %arg3[%c0_6, %c0_7, %c0_8, %c0_9, %c0_10] : memref<1x2x9x16x4xbf16, #tpu.memory_space<vmem>>, vector<1x1x9x16x4xbf16>
    %8 = vector.shape_cast %7 : vector<1x1x9x16x4xbf16> to vector<9x16x4xbf16>
    %9 = vector.extract_strided_slice %8 {offsets = [0, 0, 0], sizes = [8, 8, 4], strides = [1, 1, 1]} : vector<9x16x4xbf16> to vector<8x8x4xbf16>
    %10 = arith.extf %9 : vector<8x8x4xbf16> to vector<8x8x4xf32>
    %11 = vector.broadcast %2 : vector<1x1x4xf32> to vector<8x8x4xf32>
    %12 = arith.mulf %10, %11 : vector<8x8x4xf32>
    %13 = vector.broadcast %4 : vector<1x1x4xf32> to vector<8x8x4xf32>
    %14 = arith.addf %12, %13 : vector<8x8x4xf32>
    %15 = vector.extract_strided_slice %6 {offsets = [0, 0, 0], sizes = [8, 8, 4], strides = [1, 1, 1]} : vector<8x8x8xf32> to vector<8x8x4xf32>
    %16 = tpu.concatenate %15, %14 in 2 : vector<8x8x4xf32>, vector<8x8x4xf32> -> vector<8x8x8xf32>
    %c0_11 = arith.constant 0 : index
    %c0_12 = arith.constant 0 : index
    %c0_13 = arith.constant 0 : index
    %c0_14 = arith.constant 0 : index
    %c0_15 = arith.constant 0 : index
    %17 = vector.load %arg5[%c0_11, %c0_12, %c0_13, %c0_14, %c0_15] : memref<1x2x8x8x8xf32, #tpu.memory_space<vmem>>, vector<1x1x8x8x8xf32>
    %18 = vector.shape_cast %17 : vector<1x1x8x8x8xf32> to vector<8x8x8xf32>
    %19 = vector.shape_cast %16 : vector<8x8x8xf32> to vector<1x1x8x8x8xf32>
    tpu.vector_store %arg5[%c0_11, %c0_12, %c0_13, %c0_14, %c0_15], %19 {strides = array<i32>} : memref<1x2x8x8x8xf32, #tpu.memory_space<vmem>>, vector<1x1x8x8x8xf32>,
    %c0_16 = arith.constant 0 : index
    %c1 = arith.constant 1 : index
    %c0_17 = arith.constant 0 : index
    %c0_18 = arith.constant 0 : index
    %c0_19 = arith.constant 0 : index
    %20 = vector.load %arg3[%c0_16, %c1, %c0_17, %c0_18, %c0_19] : memref<1x2x9x16x4xbf16, #tpu.memory_space<vmem>>, vector<1x1x9x16x4xbf16>
    %21 = vector.shape_cast %20 : vector<1x1x9x16x4xbf16> to vector<9x16x4xbf16>
    %22 = vector.extract_strided_slice %21 {offsets = [0, 0, 0], sizes = [8, 8, 4], strides = [1, 1, 1]} : vector<9x16x4xbf16> to vector<8x8x4xbf16>
    %23 = arith.extf %22 : vector<8x8x4xbf16> to vector<8x8x4xf32>
    %24 = vector.broadcast %2 : vector<1x1x4xf32> to vector<8x8x4xf32>
    %25 = arith.mulf %23, %24 : vector<8x8x4xf32>
    %26 = vector.broadcast %4 : vector<1x1x4xf32> to vector<8x8x4xf32>
    %27 = arith.addf %25, %26 : vector<8x8x4xf32>
    %28 = vector.extract_strided_slice %6 {offsets = [0, 0, 4], sizes = [8, 8, 4], strides = [1, 1, 1]} : vector<8x8x8xf32> to vector<8x8x4xf32>
    %29 = tpu.concatenate %28, %27 in 2 : vector<8x8x4xf32>, vector<8x8x4xf32> -> vector<8x8x8xf32>
    %c0_20 = arith.constant 0 : index
    %c1_21 = arith.constant 1 : index
    %c0_22 = arith.constant 0 : index
    %c0_23 = arith.constant 0 : index
    %c0_24 = arith.constant 0 : index
    %30 = vector.load %arg5[%c0_20, %c1_21, %c0_22, %c0_23, %c0_24] : memref<1x2x8x8x8xf32, #tpu.memory_space<vmem>>, vector<1x1x8x8x8xf32>
    %31 = vector.shape_cast %30 : vector<1x1x8x8x8xf32> to vector<8x8x8xf32>
    %32 = vector.shape_cast %29 : vector<8x8x8xf32> to vector<1x1x8x8x8xf32>
    tpu.vector_store %arg5[%c0_20, %c1_21, %c0_22, %c0_23, %c0_24], %32 {strides = array<i32>} : memref<1x2x8x8x8xf32, #tpu.memory_space<vmem>>, vector<1x1x8x8x8xf32>,
    return
  }
  func.func @transform_0(%arg0: i32, %arg1: i32) -> (i32, i32, i32, i32, i32) {
    %c0_i32 = arith.constant 0 : i32
    %c0_i32_0 = arith.constant 0 : i32
    %c0_i32_1 = arith.constant 0 : i32
    %c0_i32_2 = arith.constant 0 : i32
    return %arg0, %c0_i32, %arg1, %c0_i32_0, %c0_i32_1 : i32, i32, i32, i32, i32
  }
  func.func @transform_1(%arg0: i32, %arg1: i32) -> (i32, i32, i32, i32, i32) {
    %c0_i32 = arith.constant 0 : i32
    %c0_i32_0 = arith.constant 0 : i32
    %c0_i32_1 = arith.constant 0 : i32
    %c0_i32_2 = arith.constant 0 : i32
    return %arg0, %arg1, %c0_i32, %c0_i32_0, %c0_i32_1 : i32, i32, i32, i32, i32
  }
  func.func @transform_2(%arg0: i32, %arg1: i32) -> (i32, i32) {
    %c0_i32 = arith.constant 0 : i32
    %c0_i32_0 = arith.constant 0 : i32
    %c0_i32_1 = arith.constant 0 : i32
    return %c0_i32, %c0_i32_0 : i32, i32
  }
  func.func @transform_3(%arg0: i32, %arg1: i32) -> (i32, i32, i32, i32, i32) {
    %c0_i32 = arith.constant 0 : i32
    %c0_i32_0 = arith.constant 0 : i32
    %c0_i32_1 = arith.constant 0 : i32
    %c0_i32_2 = arith.constant 0 : i32
    return %arg0, %arg1, %c0_i32, %c0_i32_0, %c0_i32_1 : i32, i32, i32, i32, i32
  }
}

</mosaic_0001>

<bundles_post_ra>
// kernel: unet_block_forward.3
= control target key start
LH: loop header
LB: loop body
LE: loop exit
PB: predicated region body
PF: predicated region fallthrough
CT: control target
= control target key end

     0   :  { %s528_s9 = smov 0   ;;  %s577_s0 = inlined_call_operand.vmem [shape: bf16[128,64], index: 0, kind: input, shape index: {}]   ;;  %s578_s1 = inlined_call_operand.vmem [shape: bf16[64,8], index: 1, kind: input, shape index: {}]   ;;  %s579_s2 = inlined_call_operand.vmem [shape: bf16[128,8], index: 2, kind: output, shape index: {}]  }
   0x1 LB: > { %s407_s10 = sadd.s32 4294967295, %s511_s9   ;;  %p411_p0 = scmp.ge.s32.totalorder %s511_s9, 1  ;;  %s511_s9 = sphi %s528_s9, %s12_s9  }
   0x2   : > { %p113_p1 = scmp.lt.s32.totalorder %s511_s9, 3 }
   0x4   : > { %p114_p2 = pnand %p411_p0, %p113_p1 }
   0x5   : > { %s412_s13 = sshll.u32 (!%p114_p2), %s407_s10, 3 }
   0x6   : > { %117 = sbr.rel (%p114_p2) target bundleno = 232 (0xe8), region = 28  ;;  %p136_p3 = scmp.lt.s32.totalorder (!%p114_p2), %s412_s13, 15 }
   0xb   : > { %v501_v0 = vld [vmem:[%s578_s1 + $0x18] sm:$0xff]   ;;  %v502_v1 = vld [vmem:[%s578_s1 + $0x10] sm:$0xff]   ;;  %s581_s13 = smov (!%p136_p3, %s412_s13), 15  ;;  %v503_v2 = vld [vmem:[%s578_s1 + $0x8] sm:$0xff]   ;;  %vm224_vm0 = vcmask 523264   ;;  %vm342_vm9 = vcmask 60416  }
   0xc   : > { %469 = vmatprep.subr.bf16.mxu0 %v501_v0  ;;  %485 = vmatprep.subr.bf16.mxu1 %v501_v0  ;;  %s413_s18 = sshll.u32 %s581_s13, 2  ;;  %v504_v6 = vld [vmem:[%s578_s1] sm:$0xff]  }
   0xd   : > { %470 = vmatpush3.bf16.msra.mxu0 %v501_v0  ;;  %489 = vmatpush3.bf16.msra.mxu1 %v501_v0  ;;  %s139_s21 = scalar_lea.vmem %s577_s0, %s413_s18  ;;  %s145_s26 = scalar_lea.vmem %s579_s2, %s413_s18 }
   0xe   : > { %471 = vmatprep.subr.bf16.mxu0 %v502_v1  ;;  %486 = vmatprep.subr.bf16.mxu1 %v502_v1  ;;  %v443_v3 = vld [vmem:[%s139_s21] sm:$0xff]   ;;  %v459_v4 = vld [vmem:[%s139_s21 + $0x10] sm:$0xff]   ;;  %v458_v5 = vld [vmem:[%s139_s21 + $0x8] sm:$0xff]  }
   0xf   : > { %v444_v7 = vunpack.c.l.bf16 %v443_v3  ;;  %v445_v8 = vunpack.c.h.bf16 %v443_v3  ;;  %v452_v9 = vunpack.c.l.bf16 %v459_v4  ;;  %v453_v10 = vunpack.c.h.bf16 %v459_v4  ;;  %v460_v11 = vld [vmem:[%s139_s21 + $0x18] sm:$0xff]  }
  0x10   : > { %v448_v12 = vunpack.c.l.bf16 %v458_v5  ;;  %v449_v13 = vunpack.c.h.bf16 %v458_v5  ;;  %v456_v14 = vunpack.c.l.bf16 %v460_v11  ;;  %v457_v15 = vunpack.c.h.bf16 %v460_v11 }
  0x11   : > { %472 = vmatpush3.bf16.msra.mxu0 %v502_v1  ;;  %490 = vmatpush3.bf16.msra.mxu1 %v502_v1  ;;  %vm164_vm1 = vcmp.ge.f32.partialorder %v444_v7, 0.0  ;;  %vm165_vm2 = vcmp.ge.f32.partialorder %v445_v8, 0.0  ;;  %v172_v16 = vmul.f32 0.2, %v444_v7  ;;  %v173_v17 = vmul.f32 0.2, %v445_v8 }
  0x12   : > { %473 = vmatprep.subr.bf16.mxu0 %v503_v2  ;;  %487 = vmatprep.subr.bf16.mxu1 %v503_v2  ;;  %vm168_vm3 = vcmp.ge.f32.partialorder %v452_v9, 0.0  ;;  %vm169_vm4 = vcmp.ge.f32.partialorder %v453_v10, 0.0  ;;  %v176_v18 = vmul.f32 0.2, %v452_v9  ;;  %v177_v19 = vmul.f32 0.2, %v453_v10 }
  0x13   : > { %v180_v20 = vsel %vm164_vm1, %v444_v7, %v172_v16  ;;  %v181_v21 = vsel %vm165_vm2, %v445_v8, %v173_v17  ;;  %vm166_vm5 = vcmp.ge.f32.partialorder %v448_v12, 0.0  ;;  %vm167_vm6 = vcmp.ge.f32.partialorder %v449_v13, 0.0 }
  0x14   : > { %v188_v22 = vpack.c.bf16 %v181_v21, %v180_v20  ;;  %v184_v23 = vsel %vm168_vm3, %v452_v9, %v176_v18  ;;  %v185_v24 = vsel %vm169_vm4, %v453_v10, %v177_v19  ;;  %v174_v25 = vmul.f32 0.2, %v448_v12 }
  0x15   : > { %474 = vmatpush3.bf16.msra.mxu0 %v503_v2  ;;  %491 = vmatpush3.bf16.msra.mxu1 %v503_v2  ;;  %v190_v26 = vpack.c.bf16 %v185_v24, %v184_v23  ;;  %v175_v27 = vmul.f32 0.2, %v449_v13  ;;  %vm170_vm7 = vcmp.ge.f32.partialorder %v456_v14, 0.0  ;;  %vm171_vm8 = vcmp.ge.f32.partialorder %v457_v15, 0.0 }
  0x16   : > { %475 = vmatprep.subr.bf16.mxu0 %v504_v6  ;;  %488 = vmatprep.subr.bf16.mxu1 %v504_v6  ;;  %v182_v28 = vsel %vm166_vm5, %v448_v12, %v174_v25  ;;  %v178_v29 = vmul.f32 0.2, %v456_v14  ;;  %v179_v30 = vmul.f32 0.2, %v457_v15 }
  0x17   : > { %477 = vmatprep.mubr.msk.bf16.mxu0 %vm224_vm0, %v188_v22  ;;  %481 = vmatprep.mubr.msk.bf16.mxu1 %vm224_vm0, %v190_v26  ;;  %v183_v31 = vsel %vm167_vm6, %v449_v13, %v175_v27 }
  0x18   : > { %v189_v32 = vpack.c.bf16 %v183_v31, %v182_v28  ;;  %v186_v33 = vsel %vm170_vm7, %v456_v14, %v178_v29  ;;  %v187_v34 = vsel %vm171_vm8, %v457_v15, %v179_v30 }
  0x19   : > { %476 = vmatpush3.bf16.msra.mxu0 %v504_v6  ;;  %492 = vmatpush3.bf16.msra.mxu1 %v504_v6  ;;  %v191_v35 = vpack.c.bf16 %v187_v34, %v186_v33 }
  0x1c   : > { %478 = vmatmul.mubr.msk.bf16.vlgmr.msra.gmra.mxu0 %vm224_vm0, %v189_v32  ;;  %482 = vmatmul.mubr.msk.bf16.vlgmr.msra.gmra.mxu1 %vm224_vm0, %v191_v35 }
  0xdc   : > { %v479_v36 = vpop.f32.mrf.mxu0  ;;  %v483_v38 = vpop.f32.mrf.mxu1 }
  0xdd   : > { %v304_v37 = vmax.f32 %v479_v36, 0.0  ;;  %v308_v39 = vmax.f32 %v483_v38, 0.0 }
  0xde   : > { %v271_v40 = vpop.f32.mrf.mxu0  ;;  %v287_v43 = vpop.f32.mrf.mxu1 }
  0xdf   : > { %v436_v41 = vpack.c.bf16 %v304_v37, %v304_v37  ;;  %v302_v42 = vmax.f32 %v271_v40, 0.0  ;;  %v440_v44 = vpack.c.bf16 %v308_v39, %v308_v39  ;;  %v306_v45 = vmax.f32 %v287_v43, 0.0 }
  0xe0   : > { %v480_v46 = vpop.f32.mrf.mxu0  ;;  %v484_v49 = vpop.f32.mrf.mxu1 }
  0xe1   : > { %345 = vst.msk [vmem:[%s145_s26 + $0x8] sm:$0xf] %vm342_vm9, %v436_v41  ;;  %v434_v47 = vpack.c.bf16 %v302_v42, %v302_v42  ;;  %v305_v48 = vmax.f32 %v480_v46, 0.0  ;;  %349 = vst.msk [vmem:[%s145_s26 + $0x18] sm:$0xf] %vm342_vm9, %v440_v44  ;;  %v438_v50 = vpack.c.bf16 %v306_v45, %v306_v45  ;;  %v309_v51 = vmax.f32 %v484_v49, 0.0 }
  0xe2   : > { %v274_v52 = vpop.f32.mrf.mxu0  ;;  %v290_v55 = vpop.f32.mrf.mxu1 }
  0xe3   : > { %343 = vst.msk [vmem:[%s145_s26] sm:$0xf] %vm342_vm9, %v434_v47  ;;  %v437_v53 = vpack.c.bf16 %v305_v48, %v305_v48  ;;  %v303_v54 = vmax.f32 %v274_v52, 0.0  ;;  %347 = vst.msk [vmem:[%s145_s26 + $0x10] sm:$0xf] %vm342_vm9, %v438_v50  ;;  %v441_v56 = vpack.c.bf16 %v309_v51, %v309_v51  ;;  %v307_v57 = vmax.f32 %v290_v55, 0.0 }
  0xe5   : > { %346 = vst.msk [vmem:[%s145_s26 + $0xc] sm:$0xf] %vm342_vm9, %v437_v53  ;;  %v435_v58 = vpack.c.bf16 %v303_v54, %v303_v54  ;;  %350 = vst.msk [vmem:[%s145_s26 + $0x1c] sm:$0xf] %vm342_vm9, %v441_v56  ;;  %v439_v59 = vpack.c.bf16 %v307_v57, %v307_v57 }
  0xe7   : > { %344 = vst.msk [vmem:[%s145_s26 + $0x4] sm:$0xf] %vm342_vm9, %v435_v58  ;;  %348 = vst.msk [vmem:[%s145_s26 + $0x14] sm:$0xf] %vm342_vm9, %v439_v59 }
  0xe8 PF: > { %s12_s9 = sadd.s32 1, %s511_s9  }
  0xe9   : > { %p9_p4 = scmp.ge.s32.totalorder %s12_s9, 4  }
  0xeb   :  { %11 = sbr.rel (!%p9_p4) target bundleno = 1 (0x1), region = 58 }

// kernel: unet_block_forward.5
= control target key start
LH: loop header
LB: loop body
LE: loop exit
PB: predicated region body
PF: predicated region fallthrough
CT: control target
= control target key end

     0   :  { %s805_s12 = smov 0   ;;  %s807_s13 = smov 0   ;;  %s1046_s0 = inlined_call_operand.vmem [shape: f32[2,8,2,8,8], index: 0, kind: input, shape index: {}]   ;;  %s1047_s1 = inlined_call_operand.vmem [shape: bf16[2,4,9,16,4], index: 1, kind: input, shape index: {}]   ;;  %s1048_s2 = inlined_call_operand.vmem [shape: f32[2,4], index: 2, kind: input, shape index: {}]   ;;  %s1049_s3 = inlined_call_operand.vmem [shape: f32[2,4,8,8,8], index: 3, kind: output, shape index: {}]  }
   0x1   :  { %s809_s14 = smov 0   ;;  %s811_s15 = smov 0  }
   0x2   :  { %s813_s16 = smov 0   ;;  %s815_s17 = smov 0  }
   0x3   :  { %s817_s18 = smov 0  }
   0x4 LB: > { %s22_s19 = sadd.s32 1, %s773_s16  ;;  %s25_s20 = sadd.s32 1, %s777_s17  ;;  %s781_s18 = sphi %s817_s18, %s13_s18   ;;  %s777_s17 = sphi %s815_s17, %s1055_s17   ;;  %s773_s16 = sphi %s813_s16, %s1054_s16   ;;  %s769_s15 = sphi %s811_s15, %s1053_s15   ;;  %s765_s14 = sphi %s809_s14, %s1052_s14   ;;  %s761_s13 = sphi %s807_s13, %s1051_s13   ;;  %s757_s12 = sphi %s805_s12, %s1050_s12  }
   0x5   : > { %p23_p0 = scmp.ge.s32.totalorder %s22_s19, 2  ;;  %p41_p1 = scmp.ne.s32.totalorder %s761_s13, %s757_s12 }
   0x6   : > { %p42_p2 = scmp.eq.s32.totalorder %s781_s18, 0  ;;  %s34_s24 = sadd.s32 1, %s761_s13 }
   0x7   : > { %s1057_s19 = smov (%p23_p0, %s22_s19), 0  ;;  %s1059_s20 = smov (!%p23_p0, %s25_s20), %s777_s17 }
   0x8   : > { %p43_p3 = por %p42_p2, %p41_p1  ;;  %p27_p4 = scmp.ge.s32.totalorder %s1059_s20, 2 }
   0x9   : > { %s30_s21 = ssub.s32 %s773_s16, %s1057_s19  ;;  %p637_p6 = scmp.ge.s32.totalorder %s781_s18, 4 }
   0xa   : > { %s1061_s20 = smov (%p27_p4, %s1059_s20), 0 }
   0xb   : > { %s29_s22 = ssub.s32 %s777_s17, %s1061_s20  ;;  %147 = sbr.rel (%p637_p6) target bundleno = 26 (0x1a), region = 20 }
   0xc   : > { %s31_s23 = sor.u32 %s30_s21, %s29_s22 }
   0xd   : > { %p32_p5 = scmp.eq.s32.totalorder %s31_s23, 0 }
   0xf   : > { %s856_s25 = scalar_select %p32_p5, %s761_s13, %s34_s24  }
  0x10   : > { %150 = sbr.rel (!%p43_p3) target bundleno = 26 (0x1a), region = 24  ;;  %s152_s26 = sand.u32 (%p43_p3), 1, %s761_s13  }
  0x11   : > { %s639_s27 = sshll.u32 (%p43_p3), %s777_s17, 4  ;;  %s638_s28 = sshll.u32 (%p43_p3), %s152_s26, 6 }
  0x12   : > { %s156_s29 = sadd.s32 (%p43_p3), %s773_s16, %s639_s27  ;;  %s154_s7 = scalar_lea.vmem (%p43_p3), [#allocation2], %s638_s28 }
  0x13   : > { %s640_s30 = sshll.u32 (%p43_p3), %s156_s29, 3 }
  0x14   : > { %s158_s6 = scalar_lea.vmem (%p43_p3), %s1046_s0, %s640_s30 }
  0x15   : > { %v201_v0 = vld [vmem:[%s158_s6] sm:$0xff]  ;;  %v203_v1 = vld [vmem:[%s158_s6 + $0x10] sm:$0xff] }
  0x16   : > { %v205_v2 = vld [vmem:[%s158_s6 + $0x20] sm:$0xff]  ;;  %202 = vst [vmem:[%s154_s7] sm:$0xff] %v201_v0  ;;  %204 = vst [vmem:[%s154_s7 + $0x8] sm:$0xff] %v203_v1  ;;  %v207_v3 = vld [vmem:[%s158_s6 + $0x30] sm:$0xff] }
  0x17   : > { %206 = vst [vmem:[%s154_s7 + $0x10] sm:$0xff] %v205_v2  ;;  %v209_v4 = vld [vmem:[%s158_s6 + $0x40] sm:$0xff]  ;;  %v211_v5 = vld [vmem:[%s158_s6 + $0x50] sm:$0xff]  ;;  %208 = vst [vmem:[%s154_s7 + $0x18] sm:$0xff] %v207_v3 }
  0x18   : > { %210 = vst [vmem:[%s154_s7 + $0x20] sm:$0xff] %v209_v4  ;;  %212 = vst [vmem:[%s154_s7 + $0x28] sm:$0xff] %v211_v5  ;;  %v213_v6 = vld [vmem:[%s158_s6 + $0x60] sm:$0xff]  ;;  %v215_v7 = vld [vmem:[%s158_s6 + $0x70] sm:$0xff] }
  0x19   : > { %214 = vst [vmem:[%s154_s7 + $0x30] sm:$0xff] %v213_v6  ;;  %216 = vst [vmem:[%s154_s7 + $0x38] sm:$0xff] %v215_v7 }
  0x1a PF: > { %p641_p7 = scmp.ge.s32.totalorder %s781_s18, 1  ;;  %p235_p8 = scmp.lt.s32.totalorder %s781_s18, 5 }
  0x1c   : > { %p236_p9 = pnand %p641_p7, %p235_p8 }
  0x1d   : > { %s242_s8 = sand.u32 (!%p236_p9), 1, %s757_s12   ;;  %s643_s10 = sshll.u32 (!%p236_p9), %s765_s14, 1 }
  0x1e   : > { %239 = sbr.rel (%p236_p9) target bundleno = 206 (0xce), region = 66  ;;  %s642_s9 = sshll.u32 (!%p236_p9), %s242_s8, 6 }
  0x1f   : > { %p281_p10 = scmp.lt.s32.totalorder (!%p236_p9), %s769_s15, 1  ;;  %s870_s11 = scalar_lea.vmem (!%p236_p9), [#allocation2], %s642_s9 }
  0x20   : > { %p283_p11 = scmp.lt.s32.totalorder (!%p236_p9), %s643_s10, 3  ;;  %s783_s21 = smov (!%p236_p9), 124  }
  0x23   : > { %v327_v8 = vlaneseq  ;;  %v873_v9 = vld [vmem:[%s870_s11 + $0x8] sm:$0xff]  ;;  %v876_v10 = vld [vmem:[%s870_s11] sm:$0xff]  ;;  %s1063_s15 = smov (!%p281_p10, %s769_s15), 1  ;;  %s1065_s10 = smov (!%p283_p11, %s643_s10), 3  ;;  %v926_v45 = vld [vmem:[%s870_s11 + $0x18] sm:$0xff]  ;;  %vm383_vm0 = vcmask 31744  }
  0x24   : > { %444 = vrot.lane.b32.xlu1 %v873_v9, %s783_s21  ;;  %442 = vrot.lane.b32.xlu0 %v876_v10, %s783_s21  ;;  %s668_s12 = smul.u32 72, %s1063_s15  ;;  %s647_s14 = sshll.u32 %s1063_s15, 5  ;;  %v302_v13 = vld [vmem:[%s1048_s2] sm:$0x3]  ;;  %v305_v46 = vld [vmem:[%s870_s11 + $0x10] sm:$0xff]  ;;  %vm392_vm1 = vcmask 64512  }
  0x25   : > { %v328_v11 = vshrl.u32 %v327_v8, 7  ;;  %s667_s22 = smul.u32 18, %s1065_s10  ;;  %s646_s23 = sshll.u32 %s1065_s10, 3  ;;  %v308_v51 = vld [vmem:[%s870_s11 + $0x28] sm:$0xff]  ;;  %v307_v52 = vld [vmem:[%s870_s11 + $0x20] sm:$0xff]  ;;  %v310_v58 = vld [vmem:[%s870_s11 + $0x38] sm:$0xff] }
  0x26   : > { %s886_s27 = sadd.s32 %s647_s14, %s646_s23  ;;  %s784_s15 = smov 4   ;;  %v309_v59 = vld [vmem:[%s870_s11 + $0x30] sm:$0xff] }
  0x27   : > { %v329_v12 = vsub.s32 0, %v328_v11  ;;  %v341_v14 = vsub.s32 1, %v328_v11  ;;  %s287_s28 = sadd.s32 %s668_s12, %s667_s22  ;;  %s648_s6 = sshll.u32 %s886_s27, 3 }
  0x28   : > { %s644_s29 = sshll.u32 %s287_s28, 2  ;;  %s972_s9 = scalar_lea.vmem %s1049_s3, %s648_s6 }
  0x29   : > { %s891_s5 = scalar_lea.vmem %s1047_s1, %s644_s29  ;;  %v893_v15 = vrot.slane %v302_v13, %v329_v12  ;;  %v896_v17 = vrot.slane %v302_v13, %v341_v14 }
  0x2a   : > { %v313_v16 = vld [vmem:[%s891_s5] ss:$16 sps:$4 sm:$0xff]   ;;  %v314_v18 = vld [vmem:[%s891_s5 + $0x8] ss:$16 sps:$4 sm:$0xff]  }
  0x2b   : > { %v316_v19 = vld [vmem:[%s891_s5 + $0x20] ss:$8 sps:$4 sm:$0xff]   ;;  %v321_v20 = vunpack.c.h.bf16 %v313_v16  ;;  %v319_v21 = vunpack.c.l.bf16 %v313_v16  ;;  %v322_v22 = vunpack.c.h.bf16 %v314_v18  ;;  %v320_v23 = vunpack.c.l.bf16 %v314_v18  ;;  %v318_v30 = vld [vmem:[%s891_s5 + $0x30] ss:$8 sps:$4 sm:$0xff]  }
  0x2c   : > { %v324_v24 = vunpack.c.h.bf16 %v316_v19  ;;  %v323_v25 = vunpack.c.l.bf16 %v316_v19  ;;  %v326_v34 = vunpack.c.h.bf16 %v318_v30  ;;  %v325_v38 = vunpack.c.l.bf16 %v318_v30  ;;  %v650_v47 = vld [vmem:[%s891_s5 + $0x48] ss:$8 sps:$4 sm:$0xff]   ;;  %v652_v50 = vld [vmem:[%s891_s5 + $0x58] ss:$8 sps:$4 sm:$0xff]  }
  0x2d   : > { %v333_v26 = vmul.f32 %v893_v15, %v321_v20  ;;  %v331_v27 = vmul.f32 %v893_v15, %v319_v21  ;;  %v334_v28 = vmul.f32 %v893_v15, %v322_v22  ;;  %v332_v29 = vmul.f32 %v893_v15, %v320_v23  ;;  %v654_v57 = vld [vmem:[%s891_s5 + $0x68] ss:$8 sps:$4 sm:$0xff]   ;;  %v656_v2 = vld [vmem:[%s891_s5 + $0x78] ss:$8 sps:$4 sm:$0xff]  }
  0x2e   : > { %v336_v33 = vmul.f32 %v893_v15, %v324_v24  ;;  %v335_v37 = vmul.f32 %v893_v15, %v323_v25  ;;  %v338_v39 = vmul.f32 %v893_v15, %v326_v34  ;;  %v337_v42 = vmul.f32 %v893_v15, %v325_v38 }
  0x2f   : > { %v345_v31 = vadd.f32 %v896_v17, %v333_v26  ;;  %v343_v32 = vadd.f32 %v896_v17, %v331_v27  ;;  %v346_v35 = vadd.f32 %v896_v17, %v334_v28  ;;  %v344_v36 = vadd.f32 %v896_v17, %v332_v29 }
  0x30   : > { %v348_v40 = vadd.f32 %v896_v17, %v336_v33  ;;  %v347_v41 = vadd.f32 %v896_v17, %v335_v37  ;;  %v350_v43 = vadd.f32 %v896_v17, %v338_v39  ;;  %v349_v44 = vadd.f32 %v896_v17, %v337_v42 }
  0x31   : > { %363 = vrot.lane.b32.xlu1 %v345_v31, %s784_s15  ;;  %359 = vrot.lane.b32.xlu0 %v343_v32, %s784_s15  ;;  %v411_v48 = vunpack.c.h.bf16 %v650_v47  ;;  %v410_v49 = vunpack.c.l.bf16 %v650_v47  ;;  %v413_v53 = vunpack.c.h.bf16 %v652_v50  ;;  %v412_v56 = vunpack.c.l.bf16 %v652_v50 }
  0x32   : > { %v415_v61 = vunpack.c.h.bf16 %v654_v57  ;;  %v414_v1 = vunpack.c.l.bf16 %v654_v57  ;;  %v417_v4 = vunpack.c.h.bf16 %v656_v2  ;;  %v416_v8 = vunpack.c.l.bf16 %v656_v2 }
  0x33   : > { %v419_v54 = vmul.f32 %v411_v48, %v893_v15  ;;  %v418_v55 = vmul.f32 %v410_v49, %v893_v15  ;;  %v421_v60 = vmul.f32 %v413_v53, %v893_v15  ;;  %v420_v0 = vmul.f32 %v412_v56, %v893_v15 }
  0x34   : > { %v423_v3 = vmul.f32 %v415_v61, %v893_v15  ;;  %v422_v7 = vmul.f32 %v414_v1, %v893_v15  ;;  %v425_v11 = vmul.f32 %v417_v4, %v893_v15  ;;  %v424_v14 = vmul.f32 %v416_v8, %v893_v15 }
  0x35   : > { %365 = vrot.lane.b32.xlu1 %v346_v35, %s784_s15  ;;  %361 = vrot.lane.b32.xlu0 %v344_v36, %s784_s15  ;;  %v427_v62 = vadd.f32 %v419_v54, %v896_v17  ;;  %v426_v63 = vadd.f32 %v418_v55, %v896_v17  ;;  %v429_v5 = vadd.f32 %v421_v60, %v896_v17 }
  0x36   : > { %v428_v6 = vadd.f32 %v420_v0, %v896_v17  ;;  %v431_v12 = vadd.f32 %v423_v3, %v896_v17  ;;  %v430_v13 = vadd.f32 %v422_v7, %v896_v17  ;;  %v433_v16 = vadd.f32 %v425_v11, %v896_v17 }
  0x37   : > { %v432_v18 = vadd.f32 %v424_v14, %v896_v17 }
  0x39   : > { %369 = vrot.lane.b32.xlu1 %v348_v40, %s784_s15  ;;  %367 = vrot.lane.b32.xlu0 %v347_v41, %s784_s15 }
  0x3d   : > { %373 = vrot.lane.b32.xlu1 %v350_v43, %s784_s15  ;;  %371 = vrot.lane.b32.xlu0 %v349_v44, %s784_s15 }
  0x41   : > { %448 = vrot.lane.b32.xlu1 %v926_v45, %s783_s21  ;;  %446 = vrot.lane.b32.xlu0 %v305_v46, %s783_s21 }
  0x45   : > { %452 = vrot.lane.b32.xlu1 %v308_v51, %s783_s21  ;;  %450 = vrot.lane.b32.xlu0 %v307_v52, %s783_s21 }
  0x49   : > { %456 = vrot.lane.b32.xlu1 %v310_v58, %s783_s21  ;;  %454 = vrot.lane.b32.xlu0 %v309_v59, %s783_s21 }
  0x4d   : > { %476 = vrot.lane.b32.xlu1 %v427_v62, %s784_s15  ;;  %474 = vrot.lane.b32.xlu0 %v426_v63, %s784_s15 }
  0x51   : > { %480 = vrot.lane.b32.xlu1 %v429_v5, %s784_s15  ;;  %478 = vrot.lane.b32.xlu0 %v428_v6, %s784_s15 }
  0x55   : > { %484 = vrot.lane.b32.xlu1 %v431_v12, %s784_s15  ;;  %482 = vrot.lane.b32.xlu0 %v430_v13, %s784_s15 }
  0x59   : > { %488 = vrot.lane.b32.xlu1 %v433_v16, %s784_s15  ;;  %486 = vrot.lane.b32.xlu0 %v432_v18, %s784_s15 }
  0x96   : > { %v445_v19 = vpop.permute.xlu1 %444  ;;  %v443_v20 = vpop.permute.xlu0 %442 }
  0xa3   : > { %v364_v15 = vpop.permute.xlu1 %363  ;;  %v360_v17 = vpop.permute.xlu0 %359 }
  0xa4   : > { %v386_v21 = vsel %vm383_vm0, %v305_v46, %v364_v15  ;;  %v384_v22 = vsel %vm383_vm0, %v876_v10, %v360_v17 }
  0xa5   : > { %395 = vst.msk [vmem:[%s972_s9 + $0x10] sm:$0xff] %vm392_vm1, %v386_v21  ;;  %393 = vst.msk [vmem:[%s972_s9] sm:$0xff] %vm392_vm1, %v384_v22 }
  0xa7   : > { %v366_v23 = vpop.permute.xlu1 %365  ;;  %v362_v24 = vpop.permute.xlu0 %361 }
  0xa8   : > { %v387_v25 = vsel %vm383_vm0, %v926_v45, %v366_v23  ;;  %v385_v26 = vsel %vm383_vm0, %v873_v9, %v362_v24 }
  0xa9   : > { %396 = vst.msk [vmem:[%s972_s9 + $0x18] sm:$0xff] %vm392_vm1, %v387_v25  ;;  %394 = vst.msk [vmem:[%s972_s9 + $0x8] sm:$0xff] %vm392_vm1, %v385_v26 }
  0xab   : > { %v370_v27 = vpop.permute.xlu1 %369  ;;  %v368_v10 = vpop.permute.xlu0 %367 }
  0xac   : > { %v389_v28 = vsel %vm383_vm0, %v308_v51, %v370_v27  ;;  %v388_v29 = vsel %vm383_vm0, %v307_v52, %v368_v10 }
  0xad   : > { %398 = vst.msk [vmem:[%s972_s9 + $0x28] sm:$0xff] %vm392_vm1, %v389_v28  ;;  %397 = vst.msk [vmem:[%s972_s9 + $0x20] sm:$0xff] %vm392_vm1, %v388_v29 }
  0xaf   : > { %v374_v30 = vpop.permute.xlu1 %373  ;;  %v372_v31 = vpop.permute.xlu0 %371 }
  0xb0   : > { %v391_v9 = vsel %vm383_vm0, %v310_v58, %v374_v30  ;;  %v390_v32 = vsel %vm383_vm0, %v309_v59, %v372_v31 }
  0xb1   : > { %400 = vst.msk [vmem:[%s972_s9 + $0x38] sm:$0xff] %vm392_vm1, %v391_v9  ;;  %399 = vst.msk [vmem:[%s972_s9 + $0x30] sm:$0xff] %vm392_vm1, %v390_v32 }
  0xb3   : > { %v449_v33 = vpop.permute.xlu1 %448  ;;  %v447_v34 = vpop.permute.xlu0 %446 }
  0xb7   : > { %v453_v35 = vpop.permute.xlu1 %452  ;;  %v451_v36 = vpop.permute.xlu0 %450 }
  0xbb   : > { %v457_v37 = vpop.permute.xlu1 %456  ;;  %v455_v38 = vpop.permute.xlu0 %454 }
  0xbf   : > { %v477_v39 = vpop.permute.xlu1 %476  ;;  %v475_v40 = vpop.permute.xlu0 %474 }
  0xc0   : > { %v499_v41 = vsel %vm383_vm0, %v445_v19, %v477_v39  ;;  %v498_v42 = vsel %vm383_vm0, %v443_v20, %v475_v40 }
  0xc1   : > { %658 = vst.msk [vmem:[%s972_s9 + $0x48] sm:$0xff] %vm392_vm1, %v499_v41  ;;  %657 = vst.msk [vmem:[%s972_s9 + $0x40] sm:$0xff] %vm392_vm1, %v498_v42 }
  0xc3   : > { %v481_v43 = vpop.permute.xlu1 %480  ;;  %v479_v44 = vpop.permute.xlu0 %478 }
  0xc4   : > { %v501_v45 = vsel %vm383_vm0, %v449_v33, %v481_v43  ;;  %v500_v46 = vsel %vm383_vm0, %v447_v34, %v479_v44 }
  0xc5   : > { %660 = vst.msk [vmem:[%s972_s9 + $0x58] sm:$0xff] %vm392_vm1, %v501_v45  ;;  %659 = vst.msk [vmem:[%s972_s9 + $0x50] sm:$0xff] %vm392_vm1, %v500_v46 }
  0xc7   : > { %v485_v47 = vpop.permute.xlu1 %484  ;;  %v483_v48 = vpop.permute.xlu0 %482 }
  0xc8   : > { %v503_v49 = vsel %vm383_vm0, %v453_v35, %v485_v47  ;;  %v502_v50 = vsel %vm383_vm0, %v451_v36, %v483_v48 }
  0xc9   : > { %662 = vst.msk [vmem:[%s972_s9 + $0x68] sm:$0xff] %vm392_vm1, %v503_v49  ;;  %661 = vst.msk [vmem:[%s972_s9 + $0x60] sm:$0xff] %vm392_vm1, %v502_v50 }
  0xcb   : > { %v489_v51 = vpop.permute.xlu1 %488  ;;  %v487_v52 = vpop.permute.xlu0 %486 }
  0xcc   : > { %v505_v53 = vsel %vm383_vm0, %v457_v37, %v489_v51  ;;  %v504_v54 = vsel %vm383_vm0, %v455_v38, %v487_v52 }
  0xcd   : > { %664 = vst.msk [vmem:[%s972_s9 + $0x78] sm:$0xff] %vm392_vm1, %v505_v53  ;;  %663 = vst.msk [vmem:[%s972_s9 + $0x70] sm:$0xff] %vm392_vm1, %v504_v54 }
  0xce PF: > { %s13_s18 = sadd.s32 1, %s781_s18   ;;  %s1050_s12 = smov %s761_s13 }
  0xcf   : > { %p10_p12 = scmp.ge.s32.totalorder %s13_s18, 6   ;;  %s1051_s13 = smov %s856_s25 }
  0xd0   : > { %s1052_s14 = smov %s773_s16  ;;  %s1053_s15 = smov %s777_s17 }
  0xd1   : > { %s1054_s16 = smov %s1057_s19  ;;  %s1055_s17 = smov %s1061_s20 }
  0xd2   :  { %12 = sbr.rel (!%p10_p12) target bundleno = 4 (0x4), region = 110 }

// kernel: unet_block_forward.4
= control target key start
LH: loop header
LB: loop body
LE: loop exit
PB: predicated region body
PF: predicated region fallthrough
CT: control target
= control target key end

     0   :  { %s6322_s15 = smov 0   ;;  %s7867_s0 = inlined_call_operand.vmem [shape: bf16[2,192,8], index: 0, kind: input, shape index: {}]   ;;  %s7868_s1 = inlined_call_operand.vmem [shape: bf16[4,32,4], index: 1, kind: input, shape index: {}]   ;;  %s7869_s2 = inlined_call_operand.vmem [shape: f32[144,1], index: 2, kind: input, shape index: {}]   ;;  %s7870_s3 = inlined_call_operand.vmem [shape: bf16[2,4,144,4], index: 3, kind: output, shape index: {0}]   ;;  %s7871_s4 = inlined_call_operand.vmem [shape: f32[2,4,2,4], index: 4, kind: output, shape index: {1}]  }
   0x1 LB: > { %s4928_s16 = sadd.s32 4294967295, %s6292_s15   ;;  %p4932_p0 = scmp.ge.s32.totalorder %s6292_s15, 1  ;;  %s6292_s15 = sphi %s6322_s15, %s15_s15  }
   0x2   : > { %p165_p1 = scmp.lt.s32.totalorder %s6292_s15, 3 }
   0x4   : > { %p166_p2 = pnand %p4932_p0, %p165_p1 }
   0x5   : > { %p196_p3 = scmp.lt.s32.totalorder (!%p166_p2), %s4928_s16, 1 }
   0x6   : > { %169 = sbr.rel (%p166_p2) target bundleno = 813 (0x32d), region = 32 }
   0xb   : > { %v248_v0 = vld [vmem:[%s7868_s1] sm:$0xf]  ;;  %vm404_vm0 = vcmask 1043456   ;;  %v6294_v1 = vmov 0.0   ;;  %v250_v3 = vld [vmem:[%s7868_s1 + $0x4] sm:$0xf] }
   0xc   : > { %5600 = vmatprep.subr.bf16.mxu1 %v6294_v1  ;;  %v532_v2 = vsel %vm404_vm0, %v248_v0, 0  ;;  %5562 = vmatprep.subr.bf16.mxu0 %v6294_v1  ;;  %vm6295_vm1 = vmmov 0   ;;  %v406_v4 = vsel %vm404_vm0, %v250_v3, 0  ;;  %s7873_s16 = smov (!%p196_p3, %s4928_s16), 1  ;;  %v875_v5 = vld [vmem:[%s7868_s1 + $0xc] sm:$0xf] }
   0xd   : > { %5601 = vmatpush3.bf16.msra.mxu1 %v532_v2  ;;  %5602 = vmatprep.mubr.msk.bf16.mxu1 %vm6295_vm1, %v6294_v1  ;;  %s6170_s21 = smul.u32 96, %s7873_s16  ;;  %vm376_vm2 = vcmask 64512   ;;  %v1028_v7 = vsel %vm404_vm0, %v875_v5, 0  ;;  %v657_v12 = vld [vmem:[%s7868_s1 + $0x8] sm:$0xf]  ;;  %v6296_v30 = vmov 0  }
   0xe   : > { %5563 = vmatpush3.bf16.msra.mxu0 %v406_v4  ;;  %5564 = vmatprep.mubr.msk.bf16.mxu0 %vm6295_vm1, %v6294_v1  ;;  %vm299_vm3 = vsmask.f32 7424  ;;  %v731_v19 = vsel %vm404_vm0, %v657_v12, 0  ;;  %v212_v43 = vld [vmem:[%s7869_s2] sm:$0xff]  ;;  %v213_v47 = vld [vmem:[%s7869_s2 + $0x8] sm:$0xff]  ;;  %v214_v48 = vld [vmem:[%s7869_s2 + $0x10] sm:$0xff] }
   0xf   : > { %5638 = vmatprep.subr.bf16.mxu0 %v6294_v1  ;;  %5676 = vmatprep.subr.bf16.mxu1 %v6294_v1  ;;  %s6355_s26 = scalar_lea.vmem %s7867_s0, %s6170_s21  ;;  %v216_v52 = vld [vmem:[%s7869_s2 + $0x20] sm:$0xff]  ;;  %v215_v53 = vld [vmem:[%s7869_s2 + $0x18] sm:$0xff]  ;;  %v217_v58 = vld [vmem:[%s7869_s2 + $0x28] sm:$0xff]  ;;  %vm1527_vm4 = vcmask 1046528   ;;  %s6171_s5 = smul.u32 288, %s7873_s16  ;;  %vm1333_vm5 = vcmask 27648  }
  0x10   : > { %v6185_v6 = vld [vmem:[%s6355_s26] sm:$0xff]   ;;  %v6186_v8 = vld [vmem:[%s6355_s26 + $0x8] sm:$0xff]   ;;  %v6187_v13 = vld [vmem:[%s6355_s26 + $0x10] sm:$0xff]   ;;  %6183 = vset.pattern.permute.xlu0 %v6296_v30  ;;  %6184 = vset.pattern.permute.xlu1 %v6296_v30  ;;  %vm1352_vm6 = vcmask 31744   ;;  %s5329_s13 = sshll.u32 %s7873_s16, 3  ;;  %vm1394_vm7 = vcmask 24576  }
  0x11   : > { %5603 = vmatmul.mubr.msk.bf16.vlgmr.msra.gmra.mxu1 %vm376_vm2, %v6185_v6  ;;  %v301_v9 = vshrl.u32 %v6185_v6, 16  ;;  %v303_v10 = vshll.u32 %v6185_v6, 16  ;;  %v308_v11 = vshll.u32 %v6186_v8, 16  ;;  %v312_v17 = vshrl.u32 %v6186_v8, 16  ;;  %v6188_v23 = vld [vmem:[%s6355_s26 + $0x18] sm:$0xff]   ;;  %v6189_v27 = vld [vmem:[%s6355_s26 + $0x20] sm:$0xff]   ;;  %1155 = vperm.xlu0 %6183, %v212_v43   ;;  %s6808_s8 = scalar_lea.vmem %s7870_s3, %s6171_s5  ;;  %s7105_s19 = scalar_lea.vmem %s7871_s4, %s5329_s13 }
  0x12   : > { %5677 = vmatpush3.bf16.msra.mxu1 %v1028_v7  ;;  %5606 = vmatprep.mubr.msk.bf16.mxu1 %vm6295_vm1, %v6294_v1  ;;  %v316_v18 = vshll.u32 %v6187_v13, 16  ;;  %v320_v25 = vshrl.u32 %v6187_v13, 16  ;;  %v324_v26 = vshll.u32 %v6188_v23, 16  ;;  %v328_v32 = vshrl.u32 %v6188_v23, 16  ;;  %v6190_v36 = vld [vmem:[%s6355_s26 + $0x28] sm:$0xff]   ;;  %v6191_v42 = vld [vmem:[%s6355_s26 + $0x30] sm:$0xff]  }
  0x13   : > { %v305_v14 = vrot.slane %v303_v10, 1  ;;  %5752 = vmatprep.subr.bf16.mxu1 %v6294_v1  ;;  %v310_v15 = vrot.slane %v308_v11, 1  ;;  %v332_v33 = vshll.u32 %v6189_v27, 16  ;;  %v336_v38 = vshrl.u32 %v6189_v27, 16  ;;  %v6192_v49 = vld [vmem:[%s6355_s26 + $0x38] sm:$0xff]   ;;  %1165 = vperm.xlu1 %6184, %v214_v48   ;;  %v6193_v57 = vld [vmem:[%s6355_s26 + $0x40] sm:$0xff]  }
  0x14   : > { %v318_v22 = vrot.slane %v316_v18, 1  ;;  %v326_v29 = vrot.slane %v324_v26, 1  ;;  %v340_v39 = vshll.u32 %v6190_v36, 16  ;;  %v344_v45 = vshrl.u32 %v6190_v36, 16  ;;  %v218_v59 = vld [vmem:[%s7869_s2 + $0x30] sm:$0xff]  ;;  %v219_v63 = vld [vmem:[%s7869_s2 + $0x38] sm:$0xff] }
  0x15   : > { %v306_v16 = vor.u32 %v305_v14, %v301_v9  ;;  %v314_v21 = vor.u32 %v312_v17, %v310_v15  ;;  %v334_v35 = vrot.slane %v332_v33, 1  ;;  %v348_v46 = vshll.u32 %v6191_v42, 16  ;;  %1160 = vperm.xlu0 %6183, %v213_v47   ;;  %v6194_v0 = vld [vmem:[%s6355_s26 + $0x48] ss:$0 sps:$4 sm:$0x11]   ;;  %v6196_v10 = vld [vmem:[%s6355_s26 + $0x10] sm:$0xff]  }
  0x16   : > { %v322_v28 = vor.u32 %v320_v25, %v318_v22  ;;  %v330_v34 = vor.u32 %v328_v32, %v326_v29  ;;  %v342_v41 = vrot.slane %v340_v39, 1  ;;  %v352_v54 = vshrl.u32 %v6191_v42, 16  ;;  %v6195_v4 = vld [vmem:[%s6355_s26 + $0x8] sm:$0xff]   ;;  %v6198_v17 = vld [vmem:[%s6355_s26 + $0x18] sm:$0xff]   ;;  %v5021_v30 = vld [vmem:[%s7868_s1 + $0x14] sm:$0xf] }
  0x17   : > { %v311_v20 = vsel %vm299_vm3, %v306_v16, %v310_v15  ;;  %v319_v24 = vsel %vm299_vm3, %v314_v21, %v318_v22  ;;  %v338_v40 = vor.u32 %v336_v38, %v334_v35  ;;  %v350_v51 = vrot.slane %v348_v46, 1  ;;  %1170 = vperm.xlu1 %6184, %v215_v53   ;;  %v223_v22 = vld [vmem:[%s7869_s2 + $0x58] sm:$0xff]  ;;  %v6200_v33 = vld [vmem:[%s6355_s26 + $0x20] sm:$0xff]   ;;  %v6202_v43 = vld [vmem:[%s6355_s26 + $0x28] sm:$0xff]  }
  0x18   : > { %5565 = vmatmul.mubr.msk.bf16.vlgmr.msra.gmra.mxu0 %vm376_vm2, %v311_v20  ;;  %v327_v31 = vsel %vm299_vm3, %v322_v28, %v326_v29  ;;  %v335_v37 = vsel %vm299_vm3, %v330_v34, %v334_v35  ;;  %v346_v50 = vor.u32 %v344_v45, %v342_v41  ;;  %v356_v56 = vshll.u32 %v6192_v49, 16  ;;  %v6197_v34 = vld [vmem:[%s6355_s26 + $0x8] sm:$0xff]   ;;  %v227_v46 = vld [vmem:[%s7869_s2 + $0x78] sm:$0xff] }
  0x19   : > { %5639 = vmatpush3.bf16.msra.mxu0 %v731_v19  ;;  %5607 = vmatmul.mubr.msk.bf16.gmra.mxu1 %vm376_vm2, %v6186_v8  ;;  %v343_v44 = vsel %vm299_vm3, %v338_v40, %v342_v41  ;;  %v354_v60 = vor.u32 %v352_v54, %v350_v51  ;;  %v364_v62 = vshll.u32 %v6193_v57, 16  ;;  %v360_v3 = vshrl.u32 %v6192_v49, 16  ;;  %v220_v8 = vld [vmem:[%s7869_s2 + $0x40] sm:$0xff]  ;;  %v222_v19 = vld [vmem:[%s7869_s2 + $0x50] sm:$0xff]  ;;  %v6201_v54 = vld [vmem:[%s6355_s26 + $0x18] sm:$0xff]  }
  0x1a   : > { %5568 = vmatprep.mubr.msk.bf16.mxu0 %vm6295_vm1, %v6294_v1  ;;  %5610 = vmatprep.mubr.msk.bf16.mxu1 %vm6295_vm1, %v6294_v1  ;;  %v351_v55 = vsel %vm299_vm3, %v346_v50, %v350_v51  ;;  %v358_v61 = vrot.slane %v356_v56, 1  ;;  %v368_v6 = vshrl.u32 %v6193_v57, 16  ;;  %v372_v7 = vshll.u32 %v6194_v0, 16  ;;  %v226_v41 = vld [vmem:[%s7869_s2 + $0x70] sm:$0xff]  ;;  %v228_v50 = vld [vmem:[%s7869_s2 + $0x80] sm:$0xff] }
  0x1b   : > { %5714 = vmatprep.subr.bf16.mxu0 %v6294_v1  ;;  %1175 = vperm.xlu0 %6183, %v216_v52   ;;  %v366_v5 = vrot.slane %v364_v62, 1  ;;  %v925_v11 = vshrl.u32 %v6195_v4, 16  ;;  %v927_v12 = vshll.u32 %v6195_v4, 16  ;;  %v932_v16 = vshll.u32 %v6196_v10, 16  ;;  %v6204_v52 = vld [vmem:[%s6355_s26 + $0x30] sm:$0xff]   ;;  %v6203_v62 = vld [vmem:[%s6355_s26 + $0x20] sm:$0xff]  }
  0x1c   : > { %1180 = vperm.xlu1 %6184, %v217_v58   ;;  %v359_v2 = vsel %vm299_vm3, %v354_v60, %v358_v61  ;;  %v362_v9 = vor.u32 %v360_v3, %v358_v61  ;;  %v374_v18 = vrot.slane %v372_v7, 1  ;;  %v936_v26 = vshrl.u32 %v6196_v10, 16  ;;  %v6206_v61 = vld [vmem:[%s6355_s26 + $0x38] sm:$0xff]  }
  0x1d   : > { %v929_v15 = vrot.slane %v927_v12, 1  ;;  %v370_v20 = vor.u32 %v368_v6, %v366_v5  ;;  %v934_v21 = vrot.slane %v932_v16, 1  ;;  %v944_v38 = vshrl.u32 %v6198_v17, 16  ;;  %v6205_v6 = vld [vmem:[%s6355_s26 + $0x28] sm:$0xff]  }
  0x1e   : > { %v367_v14 = vsel %vm299_vm3, %v362_v9, %v366_v5  ;;  %v948_v39 = vshll.u32 %v6200_v33, 16  ;;  %v956_v47 = vshll.u32 %v6202_v43, 16  ;;  %v960_v56 = vshrl.u32 %v6202_v43, 16  ;;  %v6208_v5 = vld [vmem:[%s6355_s26 + $0x40] sm:$0xff]   ;;  %v6210_v12 = vld [vmem:[%s6355_s26 + $0x48] sm:$0xff]  }
  0x1f   : > { %1185 = vperm.xlu0 %6183, %v218_v59   ;;  %v375_v25 = vsel %vm299_vm3, %v370_v20, %v374_v18  ;;  %v938_v35 = vor.u32 %v936_v26, %v934_v21  ;;  %v968_v0 = vshrl.u32 %v6204_v52, 16  ;;  %v980_v9 = vshll.u32 %v6208_v5, 16  ;;  %v1456_v20 = vld [vmem:[%s6355_s26] sm:$0xf] }
  0x20   : > { %5569 = vmatmul.mubr.msk.bf16.gmra.mxu0 %vm376_vm2, %v319_v24  ;;  %1190 = vperm.xlu1 %6184, %v219_v63   ;;  %v5020_v24 = vld [vmem:[%s7868_s1 + $0x10] sm:$0xf]  ;;  %v958_v51 = vrot.slane %v956_v47, 1  ;;  %v988_v16 = vshll.u32 %v6210_v12, 16 }
  0x21   : > { %5611 = vmatmul.mubr.msk.bf16.gmra.mxu1 %vm376_vm2, %v6187_v13  ;;  %5572 = vmatprep.mubr.msk.bf16.mxu0 %vm6295_vm1, %v6294_v1  ;;  %v221_v13 = vld [vmem:[%s7869_s2 + $0x48] sm:$0xff]  ;;  %v1789_v29 = vsel %vm404_vm0, %v5020_v24, 0  ;;  %v992_v24 = vshrl.u32 %v6210_v12, 16 }
  0x22   : > { %5614 = vmatprep.mubr.msk.bf16.mxu1 %vm6295_vm1, %v6294_v1  ;;  %v962_v59 = vor.u32 %v960_v56, %v958_v51  ;;  %v990_v18 = vrot.slane %v988_v16, 1 }
  0x23   : > { %1195 = vperm.xlu0 %6183, %v220_v8   ;;  %v976_v8 = vshrl.u32 %v6206_v61, 16 }
  0x24   : > { %1200 = vperm.xlu1 %6184, %v221_v13   ;;  %v6207_v13 = vld [vmem:[%s6355_s26 + $0x30] sm:$0xff]  }
  0x27   : > { %1205 = vperm.xlu0 %6183, %v222_v19   ;;  %v6212_v19 = vld [vmem:[%s6355_s26 + $0x50] ss:$0 sps:$4 sm:$0x11]  }
  0x28   : > { %5573 = vmatmul.mubr.msk.bf16.gmra.mxu0 %vm376_vm2, %v327_v31  ;;  %1210 = vperm.xlu1 %6184, %v223_v22   ;;  %v224_v31 = vld [vmem:[%s7869_s2 + $0x60] sm:$0xff]  ;;  %v6209_v22 = vld [vmem:[%s6355_s26 + $0x38] sm:$0xff]  }
  0x29   : > { %5615 = vmatmul.mubr.msk.bf16.gmra.mxu1 %vm376_vm2, %v6188_v23  ;;  %5576 = vmatprep.mubr.msk.bf16.mxu0 %vm6295_vm1, %v6294_v1  ;;  %v930_v23 = vor.u32 %v929_v15, %v925_v11  ;;  %v982_v11 = vrot.slane %v980_v9, 1  ;;  %v984_v15 = vshrl.u32 %v6208_v5, 16 }
  0x2a   : > { %5618 = vmatprep.mubr.msk.bf16.mxu1 %vm6295_vm1, %v6294_v1 }
  0x2b   : > { %v935_v28 = vsel %vm299_vm3, %v930_v23, %v934_v21  ;;  %1215 = vperm.xlu0 %6183, %v224_v31   ;;  %v1457_v21 = vld [vmem:[%s6355_s26 + $0x4] sm:$0xf] }
  0x2c   : > { %v5041_v26 = vcombine.low %v1456_v20, %v1457_v21  ;;  %v6211_v31 = vld [vmem:[%s6355_s26 + $0x40] sm:$0xff]  }
  0x2f   : > { %1225 = vperm.xlu0 %6183, %v226_v41   ;;  %v5071_v41 = vld [vmem:[%s7868_s1 + $0x1c] sm:$0xf] }
  0x30   : > { %5577 = vmatmul.mubr.msk.bf16.gmra.mxu0 %vm376_vm2, %v335_v37  ;;  %v1575_v37 = vsel %vm404_vm0, %v5021_v30, 0  ;;  %v1688_v30 = vshll.u32 %v5041_v26, 16 }
  0x31   : > { %5619 = vmatmul.mubr.msk.bf16.gmra.mxu1 %vm376_vm2, %v6189_v27  ;;  %5580 = vmatprep.mubr.msk.bf16.mxu0 %vm6295_vm1, %v6294_v1  ;;  %v940_v27 = vshll.u32 %v6198_v17, 16  ;;  %v986_v17 = vor.u32 %v984_v15, %v982_v11 }
  0x32   : > { %5622 = vmatprep.mubr.msk.bf16.mxu1 %vm6295_vm1, %v6294_v1 }
  0x33   : > { %v942_v32 = vrot.slane %v940_v27, 1  ;;  %1235 = vperm.xlu0 %6183, %v228_v50   ;;  %v991_v23 = vsel %vm299_vm3, %v986_v17, %v990_v18  ;;  %v994_v27 = vor.u32 %v992_v24, %v990_v18 }
  0x35   : > { %v943_v40 = vsel %vm299_vm3, %v938_v35, %v942_v32  ;;  %v946_v45 = vor.u32 %v944_v38, %v942_v32  ;;  %v1477_v38 = vld [vmem:[%s6355_s26] sm:$0xe] }
  0x38   : > { %5581 = vmatmul.mubr.msk.bf16.gmra.mxu0 %vm376_vm2, %v343_v44  ;;  %v6199_v44 = vld [vmem:[%s6355_s26 + $0x10] sm:$0xff]  }
  0x39   : > { %5623 = vmatmul.mubr.msk.bf16.gmra.mxu1 %vm376_vm2, %v6190_v36  ;;  %5584 = vmatprep.mubr.msk.bf16.mxu0 %vm6295_vm1, %v6294_v1  ;;  %v225_v36 = vld [vmem:[%s7869_s2 + $0x68] sm:$0xff] }
  0x3a   : > { %5626 = vmatprep.mubr.msk.bf16.mxu1 %vm6295_vm1, %v6294_v1  ;;  %1220 = vperm.xlu1 %6184, %v225_v36  }
  0x3e   : > { %1230 = vperm.xlu1 %6184, %v227_v46   ;;  %v2245_v46 = vsel %vm404_vm0, %v5071_v41, 0 }
  0x40   : > { %5585 = vmatmul.mubr.msk.bf16.gmra.mxu0 %vm376_vm2, %v351_v55  ;;  %v229_v55 = vld [vmem:[%s7869_s2 + $0x88] sm:$0xff] }
  0x41   : > { %5627 = vmatmul.mubr.msk.bf16.gmra.mxu1 %vm376_vm2, %v6191_v42  ;;  %5588 = vmatprep.mubr.msk.bf16.mxu0 %vm6295_vm1, %v6294_v1  ;;  %v950_v42 = vrot.slane %v948_v39, 1  ;;  %v6217_v39 = vld [vmem:[%s6355_s26 + $0x10] sm:$0xff]  }
  0x42   : > { %5630 = vmatprep.mubr.msk.bf16.mxu1 %vm6295_vm1, %v6294_v1  ;;  %1240 = vperm.xlu1 %6184, %v229_v55   ;;  %v1705_v56 = vshrl.u32 %v6217_v39, 16 }
  0x43   : > { %v951_v48 = vsel %vm299_vm3, %v946_v45, %v950_v42  ;;  %v1701_v45 = vshll.u32 %v6217_v39, 16 }
  0x45   : > { %v1703_v50 = vrot.slane %v1701_v45, 1 }
  0x48   : > { %5589 = vmatmul.mubr.msk.bf16.gmra.mxu0 %vm376_vm2, %v359_v2  ;;  %v972_v2 = vshll.u32 %v6206_v61, 16  ;;  %v6219_v61 = vld [vmem:[%s6355_s26 + $0x20] sm:$0xff]  }
  0x49   : > { %5631 = vmatmul.mubr.msk.bf16.gmra.mxu1 %vm376_vm2, %v6192_v49  ;;  %5592 = vmatprep.mubr.msk.bf16.mxu0 %vm6295_vm1, %v6294_v1  ;;  %v952_v49 = vshrl.u32 %v6200_v33, 16  ;;  %v1686_v33 = vshrl.u32 %v5041_v26, 16  ;;  %v1721_v9 = vshrl.u32 %v6219_v61, 16 }
  0x4a   : > { %5634 = vmatprep.mubr.msk.bf16.mxu1 %vm6295_vm1, %v6294_v1  ;;  %v974_v4 = vrot.slane %v972_v2, 1  ;;  %v1717_v2 = vshll.u32 %v6219_v61, 16 }
  0x4b   : > { %v954_v53 = vor.u32 %v952_v49, %v950_v42  ;;  %v5022_v42 = vcombine.low %v1477_v38, %v1457_v21 }
  0x4c   : > { %v978_v10 = vor.u32 %v976_v8, %v974_v4  ;;  %v1719_v5 = vrot.slane %v1717_v2, 1  ;;  %v6226_v2 = vld [vmem:[%s6355_s26 + $0x10] sm:$0xff]  }
  0x4d   : > { %v959_v58 = vsel %vm299_vm3, %v954_v53, %v958_v51  ;;  %v1528_v47 = vrot.slane %v5022_v42, 1  ;;  %v6218_v51 = vld [vmem:[%s6355_s26 + $0x18] sm:$0xff]  }
  0x4e   : > { %v1723_v12 = vor.u32 %v1721_v9, %v1719_v5 }
  0x50   : > { %5593 = vmatmul.mubr.msk.bf16.gmra.mxu0 %vm376_vm2, %v367_v14  ;;  %v983_v14 = vsel %vm299_vm3, %v978_v10, %v982_v11  ;;  %v1535_v11 = vrot.slane %v6219_v61, 1 }
  0x51   : > { %5635 = vmatmul.mubr.msk.bf16.gmra.mxu1 %vm376_vm2, %v6193_v57  ;;  %5596 = vmatprep.mubr.msk.bf16.mxu0 %vm6295_vm1, %v6294_v1  ;;  %v964_v57 = vshll.u32 %v6204_v52, 16  ;;  %v5051_v52 = vld [vmem:[%s7868_s1 + $0x18] sm:$0xf] }
  0x52   : > { %5678 = vmatprep.mubr.msk.bf16.mxu1 %vm6295_vm1, %v6294_v1 }
  0x53   : > { %v966_v60 = vrot.slane %v964_v57, 1  ;;  %v1709_v57 = vshll.u32 %v6218_v51, 16 }
  0x55   : > { %v967_v63 = vsel %vm299_vm3, %v962_v59, %v966_v60  ;;  %v970_v3 = vor.u32 %v968_v0, %v966_v60  ;;  %v1707_v59 = vor.u32 %v1705_v56, %v1703_v50  ;;  %v1711_v60 = vrot.slane %v1709_v57, 1  ;;  %v2193_v57 = vld [vmem:[%s6355_s26 + $0x8] sm:$0xe] }
  0x56   : > { %v1713_v0 = vshrl.u32 %v6218_v51, 16 }
  0x57   : > { %v975_v7 = vsel %vm299_vm3, %v970_v3, %v974_v4  ;;  %v1533_v3 = vrot.slane %v6218_v51, 1 }
  0x58   : > { %5597 = vmatmul.mubr.msk.bf16.gmra.mxu0 %vm376_vm2, %v375_v25  ;;  %v996_v25 = vshll.u32 %v6212_v19, 16  ;;  %v1715_v4 = vor.u32 %v1713_v0, %v1711_v60 }
  0x59   : > { %5679 = vmatmul.mubr.msk.bf16.vlgmr.msra.gmra.mxu1 %vm376_vm2, %v935_v28  ;;  %5640 = vmatprep.mubr.msk.bf16.mxu0 %vm6295_vm1, %v6294_v1  ;;  %v1536_v15 = vsel %vm1527_vm4, %v1533_v3, %v1535_v11 }
  0x5a   : > { %5753 = vmatpush3.bf16.msra.mxu1 %v1789_v29  ;;  %5682 = vmatprep.mubr.msk.bf16.mxu1 %vm6295_vm1, %v6294_v1  ;;  %v998_v28 = vrot.slane %v996_v25, 1  ;;  %v6214_v29 = vld [vmem:[%s6355_s26 + $0x8] sm:$0xff]   ;;  %v1720_v8 = vsel %vm299_vm3, %v1715_v4, %v1719_v5 }
  0x5b   : > { %5828 = vmatprep.subr.bf16.mxu1 %v6294_v1  ;;  %v1693_v35 = vshll.u32 %v6214_v29, 16 }
  0x5c   : > { %v999_v32 = vsel %vm299_vm3, %v994_v27, %v998_v28 }
  0x60   : > { %5641 = vmatmul.mubr.msk.bf16.vlgmr.msra.gmra.mxu0 %vm376_vm2, %v6197_v34  ;;  %v1690_v34 = vrot.slane %v1688_v30, 1  ;;  %v6223_v30 = vld [vmem:[%s6355_s26 + $0x40] sm:$0xff]  }
  0x61   : > { %5715 = vmatpush3.bf16.msra.mxu0 %v1575_v37  ;;  %5683 = vmatmul.mubr.msk.bf16.gmra.mxu1 %vm376_vm2, %v943_v40  ;;  %v1695_v37 = vrot.slane %v1693_v35, 1  ;;  %v6213_v40 = vld [vmem:[%s6355_s26 + $0x48] sm:$0xff]  }
  0x62   : > { %5644 = vmatprep.mubr.msk.bf16.mxu0 %vm6295_vm1, %v6294_v1  ;;  %5686 = vmatprep.mubr.msk.bf16.mxu1 %vm6295_vm1, %v6294_v1  ;;  %v1691_v36 = vor.u32 %v1690_v34, %v1686_v33  ;;  %v1749_v34 = vshll.u32 %v6223_v30, 16 }
  0x63   : > { %5790 = vmatprep.subr.bf16.mxu0 %v6294_v1 }
  0x64   : > { %v1696_v43 = vsel %vm299_vm3, %v1691_v36, %v1695_v37  ;;  %v1751_v38 = vrot.slane %v1749_v34, 1 }
  0x68   : > { %5645 = vmatmul.mubr.msk.bf16.gmra.mxu0 %vm376_vm2, %v6199_v44  ;;  %v1697_v44 = vshrl.u32 %v6214_v29, 16 }
  0x69   : > { %5687 = vmatmul.mubr.msk.bf16.gmra.mxu1 %vm376_vm2, %v951_v48  ;;  %5648 = vmatprep.mubr.msk.bf16.mxu0 %vm6295_vm1, %v6294_v1  ;;  %v1529_v48 = vrot.slane %v6214_v29, 1 }
  0x6a   : > { %5690 = vmatprep.mubr.msk.bf16.mxu1 %vm6295_vm1, %v6294_v1  ;;  %v1699_v49 = vor.u32 %v1697_v44, %v1695_v37  ;;  %v1753_v44 = vshrl.u32 %v6223_v30, 16 }
  0x6b   : > { %v1530_v53 = vsel %vm1527_vm4, %v1528_v47, %v1529_v48 }
  0x6c   : > { %v1704_v55 = vsel %vm299_vm3, %v1699_v49, %v1703_v50  ;;  %v1543_v50 = vrot.slane %v6223_v30, 1 }
  0x70   : > { %5649 = vmatmul.mubr.msk.bf16.gmra.mxu0 %vm376_vm2, %v6201_v54  ;;  %v2068_v54 = vsel %vm404_vm0, %v5051_v52, 0  ;;  %v1755_v52 = vor.u32 %v1753_v44, %v1751_v38 }
  0x71   : > { %5691 = vmatmul.mubr.msk.bf16.gmra.mxu1 %vm376_vm2, %v959_v58  ;;  %5652 = vmatprep.mubr.msk.bf16.mxu0 %vm6295_vm1, %v6294_v1  ;;  %v1531_v58 = vrot.slane %v6217_v39, 1  ;;  %v6224_v39 = vld [vmem:[%s6355_s26 + $0x48] ss:$0 sps:$4 sm:$0x11]  }
  0x72   : > { %5694 = vmatprep.mubr.msk.bf16.mxu1 %vm6295_vm1, %v6294_v1  ;;  %v1757_v45 = vshll.u32 %v6224_v39, 16 }
  0x78   : > { %5653 = vmatmul.mubr.msk.bf16.gmra.mxu0 %vm376_vm2, %v6203_v62  ;;  %v1532_v62 = vsel %vm1527_vm4, %v1529_v48, %v1531_v58 }
  0x79   : > { %5695 = vmatmul.mubr.msk.bf16.gmra.mxu1 %vm376_vm2, %v967_v63  ;;  %5656 = vmatprep.mubr.msk.bf16.mxu0 %vm6295_vm1, %v6294_v1  ;;  %v1712_v63 = vsel %vm299_vm3, %v1707_v59, %v1711_v60 }
  0x7a   : > { %5698 = vmatprep.mubr.msk.bf16.mxu1 %vm6295_vm1, %v6294_v1 }
  0x80   : > { %5657 = vmatmul.mubr.msk.bf16.gmra.mxu0 %vm376_vm2, %v6205_v6  ;;  %v6220_v6 = vld [vmem:[%s6355_s26 + $0x28] sm:$0xff]  }
  0x81   : > { %5699 = vmatmul.mubr.msk.bf16.gmra.mxu1 %vm376_vm2, %v975_v7  ;;  %5660 = vmatprep.mubr.msk.bf16.mxu0 %vm6295_vm1, %v6294_v1  ;;  %v1534_v7 = vsel %vm1527_vm4, %v1531_v58, %v1533_v3  ;;  %v1725_v10 = vshll.u32 %v6220_v6, 16  ;;  %v1729_v17 = vshrl.u32 %v6220_v6, 16  ;;  %v1537_v19 = vrot.slane %v6220_v6, 1 }
  0x82   : > { %5702 = vmatprep.mubr.msk.bf16.mxu1 %vm6295_vm1, %v6294_v1  ;;  %v1545_v6 = vrot.slane %v6224_v39, 1 }
  0x88   : > { %5661 = vmatmul.mubr.msk.bf16.gmra.mxu0 %vm376_vm2, %v6207_v13  ;;  %v1727_v13 = vrot.slane %v1725_v10, 1 }
  0x89   : > { %5703 = vmatmul.mubr.msk.bf16.gmra.mxu1 %vm376_vm2, %v983_v14  ;;  %5664 = vmatprep.mubr.msk.bf16.mxu0 %vm6295_vm1, %v6294_v1  ;;  %v6221_v14 = vld [vmem:[%s6355_s26 + $0x30] sm:$0xff]  }
  0x8a   : > { %5706 = vmatprep.mubr.msk.bf16.mxu1 %vm6295_vm1, %v6294_v1  ;;  %v1728_v16 = vsel %vm299_vm3, %v1723_v12, %v1727_v13  ;;  %v1733_v18 = vshll.u32 %v6221_v14, 16  ;;  %v1731_v20 = vor.u32 %v1729_v17, %v1727_v13  ;;  %v1737_v25 = vshrl.u32 %v6221_v14, 16 }
  0x8b   : > { %v1539_v27 = vrot.slane %v6221_v14, 1  ;;  %v2199_v12 = vrot.slane %v6226_v2, 1 }
  0x8c   : > { %v1735_v21 = vrot.slane %v1733_v18, 1 }
  0x8e   : > { %v1736_v24 = vsel %vm299_vm3, %v1731_v20, %v1735_v21  ;;  %v1739_v28 = vor.u32 %v1737_v25, %v1735_v21  ;;  %v1972_v21 = vshll.u32 %v6226_v2, 16 }
  0x90   : > { %5665 = vmatmul.mubr.msk.bf16.gmra.mxu0 %vm376_vm2, %v6209_v22  ;;  %v6222_v22 = vld [vmem:[%s6355_s26 + $0x38] sm:$0xff]  }
  0x91   : > { %5707 = vmatmul.mubr.msk.bf16.gmra.mxu1 %vm376_vm2, %v991_v23  ;;  %5668 = vmatprep.mubr.msk.bf16.mxu0 %vm6295_vm1, %v6294_v1  ;;  %v1538_v23 = vsel %vm1527_vm4, %v1535_v11, %v1537_v19  ;;  %v1741_v26 = vshll.u32 %v6222_v22, 16  ;;  %v1745_v33 = vshrl.u32 %v6222_v22, 16  ;;  %v1541_v36 = vrot.slane %v6222_v22, 1 }
  0x92   : > { %5710 = vmatprep.mubr.msk.bf16.mxu1 %vm6295_vm1, %v6294_v1 }
  0x93   : > { %v1743_v29 = vrot.slane %v1741_v26, 1  ;;  %v1542_v42 = vsel %vm1527_vm4, %v1539_v27, %v1541_v36  ;;  %v1544_v61 = vsel %vm1527_vm4, %v1541_v36, %v1543_v50 }
  0x95   : > { %v1747_v37 = vor.u32 %v1745_v33, %v1743_v29 }
  0x98   : > { %5669 = vmatmul.mubr.msk.bf16.gmra.mxu0 %vm376_vm2, %v6211_v31  ;;  %v1540_v31 = vsel %vm1527_vm4, %v1537_v19, %v1539_v27 }
  0x99   : > { %5711 = vmatmul.mubr.msk.bf16.gmra.mxu1 %vm376_vm2, %v999_v32  ;;  %5672 = vmatprep.mubr.msk.bf16.mxu0 %vm6295_vm1, %v6294_v1  ;;  %v1744_v32 = vsel %vm299_vm3, %v1739_v28, %v1743_v29 }
  0x9a   : > { %5754 = vmatprep.mubr.msk.bf16.mxu1 %vm6295_vm1, %v6294_v1 }
  0xa0   : > { %5673 = vmatmul.mubr.msk.bf16.gmra.mxu0 %vm376_vm2, %v6213_v40 }
  0xa1   : > { %5755 = vmatmul.mubr.msk.bf16.vlgmr.msra.gmra.mxu1 %vm376_vm2, %v1696_v43  ;;  %5716 = vmatprep.mubr.msk.bf16.mxu0 %vm6295_vm1, %v6294_v1  ;;  %v1752_v43 = vsel %vm299_vm3, %v1747_v37, %v1751_v38 }
  0xa2   : > { %5829 = vmatpush3.bf16.msra.mxu1 %v2245_v46  ;;  %5758 = vmatprep.mubr.msk.bf16.mxu1 %vm6295_vm1, %v6294_v1 }
  0xa3   : > { %5904 = vmatprep.subr.bf16.mxu1 %v6294_v1 }
  0xa8   : > { %5717 = vmatmul.mubr.msk.bf16.vlgmr.msra.gmra.mxu0 %vm376_vm2, %v1530_v53  ;;  %v1759_v53 = vrot.slane %v1757_v45, 1  ;;  %v6229_v45 = vld [vmem:[%s6355_s26 + $0x20] sm:$0xff]  }
  0xa9   : > { %5791 = vmatpush3.bf16.msra.mxu0 %v2068_v54  ;;  %5759 = vmatmul.mubr.msk.bf16.gmra.mxu1 %vm376_vm2, %v1704_v55  ;;  %v1896_v54 = vld [vmem:[%s6355_s26 + $0x8] sm:$0xf]  ;;  %v1897_v55 = vld [vmem:[%s6355_s26 + $0xc] sm:$0xf] }
  0xaa   : > { %5720 = vmatprep.mubr.msk.bf16.mxu0 %vm6295_vm1, %v6294_v1  ;;  %5762 = vmatprep.mubr.msk.bf16.mxu1 %vm6295_vm1, %v6294_v1  ;;  %v1760_v0 = vsel %vm299_vm3, %v1755_v52, %v1759_v53  ;;  %v5072_v3 = vcombine.low %v2193_v57, %v1897_v55 }
  0xab   : > { %5866 = vmatprep.subr.bf16.mxu0 %v6294_v1 }
  0xac   : > { %v2198_v11 = vrot.slane %v5072_v3, 1 }
  0xb0   : > { %5721 = vmatmul.mubr.msk.bf16.gmra.mxu0 %vm376_vm2, %v1532_v62  ;;  %v5052_v62 = vcombine.low %v1896_v54, %v1897_v55  ;;  %v2203_v54 = vrot.slane %v6229_v45, 1 }
  0xb1   : > { %5763 = vmatmul.mubr.msk.bf16.gmra.mxu1 %vm376_vm2, %v1712_v63  ;;  %5724 = vmatprep.mubr.msk.bf16.mxu0 %vm6295_vm1, %v6294_v1 }
  0xb2   : > { %5766 = vmatprep.mubr.msk.bf16.mxu1 %vm6295_vm1, %v6294_v1  ;;  %v1967_v9 = vshll.u32 %v5052_v62, 16  ;;  %v1965_v19 = vshrl.u32 %v5052_v62, 16  ;;  %v1988_v62 = vshll.u32 %v6229_v45, 16 }
  0xb4   : > { %v1969_v20 = vrot.slane %v1967_v9, 1  ;;  %v1990_v9 = vrot.slane %v1988_v62, 1 }
  0xb6   : > { %v1970_v30 = vor.u32 %v1969_v20, %v1965_v19 }
  0xb8   : > { %5725 = vmatmul.mubr.msk.bf16.gmra.mxu0 %vm376_vm2, %v1534_v7 }
  0xb9   : > { %5767 = vmatmul.mubr.msk.bf16.gmra.mxu1 %vm376_vm2, %v1720_v8  ;;  %5728 = vmatprep.mubr.msk.bf16.mxu0 %vm6295_vm1, %v6294_v1 }
  0xba   : > { %5770 = vmatprep.mubr.msk.bf16.mxu1 %vm6295_vm1, %v6294_v1 }
  0xc0   : > { %5729 = vmatmul.mubr.msk.bf16.gmra.mxu0 %vm376_vm2, %v1536_v15  ;;  %v1546_v15 = vsel %vm1527_vm4, %v1543_v50, %v1545_v6 }
  0xc1   : > { %5771 = vmatmul.mubr.msk.bf16.gmra.mxu1 %vm376_vm2, %v1728_v16  ;;  %5732 = vmatprep.mubr.msk.bf16.mxu0 %vm6295_vm1, %v6294_v1  ;;  %v5120_v16 = vld [vmem:[%s7868_s1 + $0x20] sm:$0xf] }
  0xc2   : > { %5774 = vmatprep.mubr.msk.bf16.mxu1 %vm6295_vm1, %v6294_v1  ;;  %v2882_v26 = vsel %vm404_vm0, %v5120_v16, 0 }
  0xc8   : > { %5733 = vmatmul.mubr.msk.bf16.gmra.mxu0 %vm376_vm2, %v1538_v23  ;;  %v2200_v23 = vsel %vm1527_vm4, %v2198_v11, %v2199_v12 }
  0xc9   : > { %5775 = vmatmul.mubr.msk.bf16.gmra.mxu1 %vm376_vm2, %v1736_v24  ;;  %5736 = vmatprep.mubr.msk.bf16.mxu0 %vm6295_vm1, %v6294_v1  ;;  %v6228_v24 = vld [vmem:[%s6355_s26 + $0x18] sm:$0xff]  }
  0xca   : > { %5778 = vmatprep.mubr.msk.bf16.mxu1 %vm6295_vm1, %v6294_v1  ;;  %v2201_v33 = vrot.slane %v6228_v24, 1 }
  0xcc   : > { %v2202_v44 = vsel %vm1527_vm4, %v2199_v12, %v2201_v33 }
  0xd0   : > { %5737 = vmatmul.mubr.msk.bf16.gmra.mxu0 %vm376_vm2, %v1540_v31  ;;  %v1974_v31 = vrot.slane %v1972_v21, 1 }
  0xd1   : > { %v568_v35 = vpop.f32.mrf.mxu1  ;;  %5779 = vmatmul.mubr.msk.bf16.gmra.mxu1 %vm376_vm2, %v1744_v32  ;;  %5740 = vmatprep.mubr.msk.bf16.mxu0 %vm6295_vm1, %v6294_v1 }
  0xd2   : > { %5782 = vmatprep.mubr.msk.bf16.mxu1 %vm6295_vm1, %v6294_v1  ;;  %v1975_v39 = vsel %vm299_vm3, %v1970_v30, %v1974_v31 }
  0xd3   : > { %v5604_v40 = vpop.f32.mrf.mxu1 }
  0xd4   : > { %v1976_v40 = vshrl.u32 %v6226_v2, 16  ;;  %v6230_v2 = vld [vmem:[%s6355_s26 + $0x28] sm:$0xff]  }
  0xd5   : > { %v571_v41 = vpop.f32.mrf.mxu1  ;;  %v2205_v11 = vrot.slane %v6230_v2, 1  ;;  %v1996_v19 = vshll.u32 %v6230_v2, 16 }
  0xd7   : > { %v5605_v46 = vpop.f32.mrf.mxu1  ;;  %v2206_v21 = vsel %vm1527_vm4, %v2203_v54, %v2205_v11 }
  0xd8   : > { %v442_v47 = vpop.f32.mrf.mxu0  ;;  %5741 = vmatmul.mubr.msk.bf16.gmra.mxu0 %vm376_vm2, %v1542_v42 }
  0xd9   : > { %v6660_v48 = vadd.f32 %v568_v35, %v442_v47  ;;  %v576_v49 = vpop.f32.mrf.mxu1  ;;  %5783 = vmatmul.mubr.msk.bf16.gmra.mxu1 %vm376_vm2, %v1752_v43  ;;  %5744 = vmatprep.mubr.msk.bf16.mxu0 %vm6295_vm1, %v6294_v1  ;;  %v5121_v35 = vld [vmem:[%s7868_s1 + $0x24] sm:$0xf] }
  0xda   : > { %v5566_v51 = vpop.f32.mrf.mxu0  ;;  %5786 = vmatprep.mubr.msk.bf16.mxu1 %vm6295_vm1, %v6294_v1  ;;  %v2756_v43 = vsel %vm404_vm0, %v5121_v35, 0 }
  0xdb   : > { %v5608_v56 = vpop.f32.mrf.mxu1  ;;  %v1978_v51 = vor.u32 %v1976_v40, %v1974_v31 }
  0xdc   : > { %v445_v58 = vpop.f32.mrf.mxu0 }
  0xdd   : > { %v6670_v59 = vadd.f32 %v571_v41, %v445_v58  ;;  %v579_v60 = vpop.f32.mrf.mxu1  ;;  %v1980_v41 = vshll.u32 %v6228_v24, 16 }
  0xde   : > { %v5567_v63 = vpop.f32.mrf.mxu0 }
  0xdf   : > { %v5609_v4 = vpop.f32.mrf.mxu1  ;;  %v1982_v52 = vrot.slane %v1980_v41, 1 }
  0xe0   : > { %v450_v5 = vpop.f32.mrf.mxu0  ;;  %5745 = vmatmul.mubr.msk.bf16.gmra.mxu0 %vm376_vm2, %v1544_v61  ;;  %v1984_v61 = vshrl.u32 %v6228_v24, 16 }
  0xe1   : > { %v6676_v7 = vadd.f32 %v576_v49, %v450_v5  ;;  %v584_v8 = vpop.f32.mrf.mxu1  ;;  %5787 = vmatmul.mubr.msk.bf16.gmra.mxu1 %vm376_vm2, %v1760_v0  ;;  %5748 = vmatprep.mubr.msk.bf16.mxu0 %vm6295_vm1, %v6294_v1  ;;  %v2204_v0 = vsel %vm1527_vm4, %v2201_v33, %v2203_v54 }
  0xe2   : > { %v5570_v10 = vpop.f32.mrf.mxu0  ;;  %5830 = vmatprep.mubr.msk.bf16.mxu1 %vm6295_vm1, %v6294_v1 }
  0xe3   : > { %v5612_v13 = vpop.f32.mrf.mxu1 }
  0xe4   : > { %v453_v14 = vpop.f32.mrf.mxu0 }
  0xe5   : > { %v6687_v17 = vadd.f32 %v579_v60, %v453_v14  ;;  %v587_v18 = vpop.f32.mrf.mxu1  ;;  %v1983_v60 = vsel %vm299_vm3, %v1978_v51, %v1982_v52 }
  0xe6   : > { %v5571_v22 = vpop.f32.mrf.mxu0 }
  0xe7   : > { %v5613_v25 = vpop.f32.mrf.mxu1  ;;  %v6231_v22 = vld [vmem:[%s6355_s26 + $0x30] sm:$0xff]  }
  0xe8   : > { %v458_v27 = vpop.f32.mrf.mxu0  ;;  %5749 = vmatmul.mubr.msk.bf16.gmra.mxu0 %vm376_vm2, %v1546_v15  ;;  %v2207_v31 = vrot.slane %v6231_v22, 1 }
  0xe9   : > { %v6693_v28 = vadd.f32 %v584_v8, %v458_v27  ;;  %v592_v29 = vpop.f32.mrf.mxu1  ;;  %5831 = vmatmul.mubr.msk.bf16.vlgmr.msra.gmra.mxu1 %vm376_vm2, %v2200_v23  ;;  %5792 = vmatprep.mubr.msk.bf16.mxu0 %vm6295_vm1, %v6294_v1  ;;  %v1986_v8 = vor.u32 %v1984_v61, %v1982_v52 }
  0xea   : > { %v5574_v32 = vpop.f32.mrf.mxu0  ;;  %5905 = vmatpush3.bf16.msra.mxu1 %v2882_v26  ;;  %5834 = vmatprep.mubr.msk.bf16.mxu1 %vm6295_vm1, %v6294_v1  ;;  %v2208_v41 = vsel %vm1527_vm4, %v2205_v11, %v2207_v31 }
  0xeb   : > { %v5616_v34 = vpop.f32.mrf.mxu1  ;;  %5980 = vmatprep.subr.bf16.mxu1 %v6294_v1  ;;  %v1991_v16 = vsel %vm299_vm3, %v1986_v8, %v1990_v9 }
  0xec   : > { %v461_v36 = vpop.f32.mrf.mxu0 }
  0xed   : > { %v6704_v37 = vadd.f32 %v587_v18, %v461_v36  ;;  %v595_v38 = vpop.f32.mrf.mxu1  ;;  %v1992_v18 = vshrl.u32 %v6229_v45, 16 }
  0xee   : > { %v5575_v42 = vpop.f32.mrf.mxu0 }
  0xef   : > { %v5617_v46 = vpop.f32.mrf.mxu1  ;;  %v1994_v27 = vor.u32 %v1992_v18, %v1990_v9  ;;  %v6232_v42 = vld [vmem:[%s6355_s26 + $0x38] sm:$0xff]  }
  0xf0   : > { %v466_v47 = vpop.f32.mrf.mxu0  ;;  %5793 = vmatmul.mubr.msk.bf16.vlgmr.msra.gmra.mxu0 %vm376_vm2, %v1975_v39  ;;  %v2004_v39 = vshll.u32 %v6231_v22, 16  ;;  %v2209_v52 = vrot.slane %v6232_v42, 1  ;;  %v2012_v61 = vshll.u32 %v6232_v42, 16 }
  0xf1   : > { %v6711_v49 = vadd.f32 %v592_v29, %v466_v47  ;;  %5867 = vmatpush3.bf16.msra.mxu0 %v2756_v43  ;;  %v600_v50 = vpop.f32.mrf.mxu1  ;;  %5835 = vmatmul.mubr.msk.bf16.gmra.mxu1 %vm376_vm2, %v2202_v44  ;;  %v1998_v29 = vrot.slane %v1996_v19, 1  ;;  %v2016_v19 = vshrl.u32 %v6232_v42, 16 }
  0xf2   : > { %v5578_v53 = vpop.f32.mrf.mxu0  ;;  %5796 = vmatprep.mubr.msk.bf16.mxu0 %vm6295_vm1, %v6294_v1  ;;  %5838 = vmatprep.mubr.msk.bf16.mxu1 %vm6295_vm1, %v6294_v1  ;;  %v2014_v9 = vrot.slane %v2012_v61, 1 }
  0xf3   : > { %v5620_v55 = vpop.f32.mrf.mxu1  ;;  %5942 = vmatprep.subr.bf16.mxu0 %v6294_v1  ;;  %v1999_v36 = vsel %vm299_vm3, %v1994_v27, %v1998_v29 }
  0xf4   : > { %v469_v56 = vpop.f32.mrf.mxu0 }
  0xf5   : > { %v6719_v57 = vadd.f32 %v595_v38, %v469_v56  ;;  %v603_v58 = vpop.f32.mrf.mxu1  ;;  %v2000_v38 = vshrl.u32 %v6230_v2, 16 }
  0xf6   : > { %v5579_v63 = vpop.f32.mrf.mxu0 }
  0xf7   : > { %v5621_v3 = vpop.f32.mrf.mxu1  ;;  %v2002_v47 = vor.u32 %v2000_v38, %v1998_v29  ;;  %v2210_v63 = vsel %vm1527_vm4, %v2207_v31, %v2209_v52 }
  0xf8   : > { %v474_v4 = vpop.f32.mrf.mxu0  ;;  %5797 = vmatmul.mubr.msk.bf16.gmra.mxu0 %vm376_vm2, %v1983_v60  ;;  %v2008_v60 = vshrl.u32 %v6231_v22, 16 }
  0xf9   : > { %v6725_v5 = vadd.f32 %v600_v50, %v474_v4  ;;  %v608_v6 = vpop.f32.mrf.mxu1  ;;  %5839 = vmatmul.mubr.msk.bf16.gmra.mxu1 %vm376_vm2, %v2204_v0  ;;  %5800 = vmatprep.mubr.msk.bf16.mxu0 %vm6295_vm1, %v6294_v1  ;;  %v2006_v50 = vrot.slane %v2004_v39, 1  ;;  %v6233_v0 = vld [vmem:[%s6355_s26 + $0x40] sm:$0xff]  }
  0xfa   : > { %v5582_v10 = vpop.f32.mrf.mxu0  ;;  %5842 = vmatprep.mubr.msk.bf16.mxu1 %vm6295_vm1, %v6294_v1  ;;  %v2211_v11 = vrot.slane %v6233_v0, 1 }
  0xfb   : > { %v5624_v12 = vpop.f32.mrf.mxu1  ;;  %v2010_v8 = vor.u32 %v2008_v60, %v2006_v50 }
  0xfc   : > { %v477_v13 = vpop.f32.mrf.mxu0  ;;  %v2212_v22 = vsel %vm1527_vm4, %v2209_v52, %v2211_v11 }
  0xfd   : > { %v6732_v14 = vadd.f32 %v603_v58, %v477_v13  ;;  %v611_v15 = vpop.f32.mrf.mxu1  ;;  %v2007_v58 = vsel %vm299_vm3, %v2002_v47, %v2006_v50  ;;  %v2015_v18 = vsel %vm299_vm3, %v2010_v8, %v2014_v9 }
  0xfe   : > { %v5583_v20 = vpop.f32.mrf.mxu0 }
  0xff   : > { %v5625_v23 = vpop.f32.mrf.mxu1  ;;  %v2020_v20 = vshll.u32 %v6233_v0, 16 }
 0x100   : > { %v482_v24 = vpop.f32.mrf.mxu0  ;;  %5801 = vmatmul.mubr.msk.bf16.gmra.mxu0 %vm376_vm2, %v1991_v16  ;;  %v6234_v23 = vld [vmem:[%s6355_s26 + $0x48] sm:$0xff]  }
 0x101   : > { %v6738_v25 = vadd.f32 %v608_v6, %v482_v24  ;;  %v616_v26 = vpop.f32.mrf.mxu1  ;;  %5843 = vmatmul.mubr.msk.bf16.gmra.mxu1 %vm376_vm2, %v2206_v21  ;;  %5804 = vmatprep.mubr.msk.bf16.mxu0 %vm6295_vm1, %v6294_v1  ;;  %v2022_v31 = vrot.slane %v2020_v20, 1  ;;  %v2028_v42 = vshll.u32 %v6234_v23, 16  ;;  %v2032_v61 = vshrl.u32 %v6234_v23, 16 }
 0x102   : > { %v5586_v30 = vpop.f32.mrf.mxu0  ;;  %5846 = vmatprep.mubr.msk.bf16.mxu1 %vm6295_vm1, %v6294_v1 }
 0x103   : > { %v5628_v32 = vpop.f32.mrf.mxu1  ;;  %v2018_v30 = vor.u32 %v2016_v19, %v2014_v9 }
 0x104   : > { %v485_v33 = vpop.f32.mrf.mxu0 }
 0x105   : > { %v6745_v34 = vadd.f32 %v611_v15, %v485_v33  ;;  %v619_v35 = vpop.f32.mrf.mxu1  ;;  %v2213_v33 = vrot.slane %v6234_v23, 1 }
 0x106   : > { %v5587_v40 = vpop.f32.mrf.mxu0 }
 0x107   : > { %v5629_v43 = vpop.f32.mrf.mxu1  ;;  %v2023_v40 = vsel %vm299_vm3, %v2018_v30, %v2022_v31 }
 0x108   : > { %v490_v44 = vpop.f32.mrf.mxu0  ;;  %5805 = vmatmul.mubr.msk.bf16.gmra.mxu0 %vm376_vm2, %v1999_v36 }
 0x109   : > { %v6751_v45 = vadd.f32 %v616_v26, %v490_v44  ;;  %v624_v46 = vpop.f32.mrf.mxu1  ;;  %5847 = vmatmul.mubr.msk.bf16.gmra.mxu1 %vm376_vm2, %v2208_v41  ;;  %5808 = vmatprep.mubr.msk.bf16.mxu0 %vm6295_vm1, %v6294_v1  ;;  %v2024_v41 = vshrl.u32 %v6233_v0, 16  ;;  %v2214_v44 = vsel %vm1527_vm4, %v2211_v11, %v2213_v33 }
 0x10a   : > { %v5590_v51 = vpop.f32.mrf.mxu0  ;;  %5850 = vmatprep.mubr.msk.bf16.mxu1 %vm6295_vm1, %v6294_v1 }
 0x10b   : > { %v5632_v53 = vpop.f32.mrf.mxu1  ;;  %v6790_v51 = vpop.permute.xlu0 %1155 }
 0x10c   : > { %v493_v54 = vpop.f32.mrf.mxu0 }
 0x10d   : > { %v6758_v55 = vadd.f32 %v619_v35, %v493_v54  ;;  %v627_v56 = vpop.f32.mrf.mxu1  ;;  %v2026_v54 = vor.u32 %v2024_v41, %v2022_v31  ;;  %v5169_v41 = vld [vmem:[%s7868_s1 + $0x2c] sm:$0xf] }
 0x10e   : > { %v5591_v62 = vpop.f32.mrf.mxu0 }
 0x10f   : > { %v5633_v2 = vpop.f32.mrf.mxu1  ;;  %v6810_v11 = vpop.permute.xlu0 %1160 }
 0x110   : > { %v498_v3 = vpop.f32.mrf.mxu0  ;;  %5809 = vmatmul.mubr.msk.bf16.gmra.mxu0 %vm376_vm2, %v2007_v58 }
 0x111   : > { %v6764_v4 = vadd.f32 %v624_v46, %v498_v3  ;;  %v632_v6 = vpop.f32.mrf.mxu1  ;;  %5851 = vmatmul.mubr.msk.bf16.gmra.mxu1 %vm376_vm2, %v2210_v63  ;;  %5812 = vmatprep.mubr.msk.bf16.mxu0 %vm6295_vm1, %v6294_v1  ;;  %v6235_v46 = vld [vmem:[%s6355_s26 + $0x50] ss:$0 sps:$4 sm:$0x11]  }
 0x112   : > { %v5594_v10 = vpop.f32.mrf.mxu0  ;;  %5854 = vmatprep.mubr.msk.bf16.mxu1 %vm6295_vm1, %v6294_v1  ;;  %v2215_v60 = vrot.slane %v6235_v46, 1  ;;  %v2036_v62 = vshll.u32 %v6235_v46, 16 }
 0x113   : > { %v5636_v12 = vpop.f32.mrf.mxu1 }
 0x114   : > { %v501_v13 = vpop.f32.mrf.mxu0  ;;  %v2216_v12 = vsel %vm1527_vm4, %v2213_v33, %v2215_v60 }
 0x115   : > { %v6771_v15 = vadd.f32 %v627_v56, %v501_v13  ;;  %v635_v16 = vpop.f32.mrf.mxu1  ;;  %v2030_v56 = vrot.slane %v2028_v42, 1 }
 0x116   : > { %v5595_v21 = vpop.f32.mrf.mxu0 }
 0x117   : > { %v5637_v24 = vpop.f32.mrf.mxu1  ;;  %v2031_v9 = vsel %vm299_vm3, %v2026_v54, %v2030_v56  ;;  %v2034_v13 = vor.u32 %v2032_v61, %v2030_v56  ;;  %v6814_v21 = vpop.permute.xlu1 %1165 }
 0x118   : > { %v506_v26 = vpop.f32.mrf.mxu0  ;;  %5813 = vmatmul.mubr.msk.bf16.gmra.mxu0 %vm376_vm2, %v2015_v18 }
 0x119   : > { %v6777_v27 = vadd.f32 %v632_v6, %v506_v26  ;;  %v1064_v29 = vpop.f32.mrf.mxu1  ;;  %5855 = vmatmul.mubr.msk.bf16.gmra.mxu1 %vm376_vm2, %v2212_v22  ;;  %5816 = vmatprep.mubr.msk.bf16.mxu0 %vm6295_vm1, %v6294_v1  ;;  %v6817_v22 = vld [vmem:[%s6355_s26 + $0x10] sm:$0xff]  }
 0x11a   : > { %v5598_v32 = vpop.f32.mrf.mxu0  ;;  %5858 = vmatprep.mubr.msk.bf16.mxu1 %vm6295_vm1, %v6294_v1 }
 0x11b   : > { %v5680_v35 = vpop.f32.mrf.mxu1  ;;  %v6843_v61 = vpop.permute.xlu1 %1170 }
 0x11c   : > { %v509_v36 = vpop.f32.mrf.mxu0 }
 0x11d   : > { %v6784_v38 = vadd.f32 %v635_v16, %v509_v36  ;;  %v1067_v39 = vpop.f32.mrf.mxu1  ;;  %v2038_v16 = vrot.slane %v2036_v62, 1  ;;  %v3378_v62 = vsel %vm404_vm0, %v5169_v41, 0 }
 0x11e   : > { %v5599_v43 = vpop.f32.mrf.mxu0 }
 0x11f   : > { %v5681_v47 = vpop.f32.mrf.mxu1  ;;  %v2039_v33 = vsel %vm299_vm3, %v2034_v13, %v2038_v16 }
 0x120   : > { %v767_v50 = vpop.f32.mrf.mxu0  ;;  %5817 = vmatmul.mubr.msk.bf16.gmra.mxu0 %vm376_vm2, %v2023_v40  ;;  %v2660_v47 = vshll.u32 %v6817_v22, 16 }
 0x121   : > { %v838_v52 = vadd.f32 %v767_v50, %v6660_v48  ;;  %v1072_v53 = vpop.f32.mrf.mxu1  ;;  %5859 = vmatmul.mubr.msk.bf16.gmra.mxu1 %vm376_vm2, %v2214_v44  ;;  %5820 = vmatprep.mubr.msk.bf16.mxu0 %vm6295_vm1, %v6294_v1  ;;  %v6800_v48 = vld [vmem:[%s6355_s26 + $0x8] sm:$0xff]  }
 0x122   : > { %v5642_v58 = vpop.f32.mrf.mxu0  ;;  %5862 = vmatprep.mubr.msk.bf16.mxu1 %vm6295_vm1, %v6294_v1  ;;  %v2655_v23 = vshll.u32 %v6800_v48, 16  ;;  %v2653_v44 = vshrl.u32 %v6800_v48, 16 }
 0x123   : > { %v1135_v63 = vadd.f32 %v1064_v29, %v838_v52  ;;  %v5684_v0 = vpop.f32.mrf.mxu1 }
 0x124   : > { %v770_v2 = vpop.f32.mrf.mxu0  ;;  %v2657_v46 = vrot.slane %v2655_v23, 1  ;;  %v6860_v23 = vpop.permute.xlu0 %1175 }
 0x125   : > { %v1243_v3 = vmul.f32 %v6790_v51, %v1135_v63  ;;  %v839_v6 = vadd.f32 %v770_v2, %v6670_v59  ;;  %v1075_v8 = vpop.f32.mrf.mxu1 }
 0x126   : > { %v5643_v10 = vpop.f32.mrf.mxu0 }
 0x127   : > { %v5330_v59 = vpack.c.bf16 %v1243_v3, %v1243_v3  ;;  %v1136_v18 = vadd.f32 %v1067_v39, %v839_v6  ;;  %v5685_v19 = vpop.f32.mrf.mxu1  ;;  %v1396_v24 = vmul.f32 %v1243_v3, %v1243_v3  ;;  %v1353_v31 = vsel %vm1352_vm6, %v1243_v3, 0.0 }
 0x128   : > { %v775_v20 = vpop.f32.mrf.mxu0  ;;  %5821 = vmatmul.mubr.msk.bf16.gmra.mxu0 %vm376_vm2, %v2031_v9 }
 0x129   : > { %1334 = vst.msk [vmem:[%s6808_s8] sm:$0xf] %vm1333_vm5, %v5330_v59  ;;  %v1244_v26 = vmul.f32 %v6810_v11, %v1136_v18  ;;  %v840_v29 = vadd.f32 %v775_v20, %v6676_v7  ;;  %v1080_v30 = vpop.f32.mrf.mxu1  ;;  %5863 = vmatmul.mubr.msk.bf16.gmra.mxu1 %vm376_vm2, %v2216_v12  ;;  %5824 = vmatprep.mubr.msk.bf16.mxu0 %vm6295_vm1, %v6294_v1  ;;  %v1414_v50 = vsel %vm1352_vm6, %v1396_v24, 0.0 }
 0x12a   : > { %v5646_v32 = vpop.f32.mrf.mxu0  ;;  %5906 = vmatprep.mubr.msk.bf16.mxu1 %vm6295_vm1, %v6294_v1  ;;  %v2658_v12 = vor.u32 %v2657_v46, %v2653_v44  ;;  %v6877_v44 = vpop.permute.xlu1 %1180 }
 0x12b   : > { %v5331_v35 = vpack.c.bf16 %v1244_v26, %v1244_v26  ;;  %v1354_v36 = vsel %vm1352_vm6, %v1244_v26, 0.0  ;;  %v1397_v39 = vmul.f32 %v1244_v26, %v1244_v26  ;;  %v1137_v7 = vadd.f32 %v1072_v53, %v840_v29  ;;  %v5688_v40 = vpop.f32.mrf.mxu1 }
 0x12c   : > { %v1355_v42 = vadd.f32 %v1354_v36, %v1353_v31  ;;  %v778_v43 = vpop.f32.mrf.mxu0 }
 0x12d   : > { %1335 = vst.msk [vmem:[%s6808_s8 + $0x4] sm:$0xf] %vm1333_vm5, %v5331_v35  ;;  %v1415_v52 = vsel %vm1352_vm6, %v1397_v39, 0.0  ;;  %v1245_v53 = vmul.f32 %v6814_v21, %v1137_v7  ;;  %v841_v54 = vadd.f32 %v778_v43, %v6687_v17  ;;  %v1083_v56 = vpop.f32.mrf.mxu1  ;;  %v6849_v17 = vld [vmem:[%s6355_s26 + $0x18] sm:$0xff]   ;;  %v2664_v35 = vshrl.u32 %v6817_v22, 16 }
 0x12e   : > { %v1416_v58 = vadd.f32 %v1415_v52, %v1414_v50  ;;  %v5647_v60 = vpop.f32.mrf.mxu0  ;;  %v2668_v36 = vshll.u32 %v6849_v17, 16 }
 0x12f   : > { %v5332_v63 = vpack.c.bf16 %v1245_v53, %v1245_v53  ;;  %v1356_v0 = vsel %vm1352_vm6, %v1245_v53, 0.0  ;;  %v1398_v2 = vmul.f32 %v1245_v53, %v1245_v53  ;;  %v1138_v3 = vadd.f32 %v1075_v8, %v841_v54  ;;  %v5689_v6 = vpop.f32.mrf.mxu1 }
 0x130   : > { %v1357_v9 = vadd.f32 %v1356_v0, %v1355_v42  ;;  %v783_v10 = vpop.f32.mrf.mxu0  ;;  %5825 = vmatmul.mubr.msk.bf16.gmra.mxu0 %vm376_vm2, %v2039_v33  ;;  %v2662_v8 = vrot.slane %v2660_v47, 1 }
 0x131   : > { %1336 = vst.msk [vmem:[%s6808_s8 + $0x8] sm:$0xf] %vm1333_vm5, %v5332_v63  ;;  %v1417_v13 = vsel %vm1352_vm6, %v1398_v2, 0.0  ;;  %v1246_v16 = vmul.f32 %v6843_v61, %v1138_v3  ;;  %v842_v59 = vadd.f32 %v783_v10, %v6693_v28  ;;  %v1088_v18 = vpop.f32.mrf.mxu1  ;;  %5907 = vmatmul.mubr.msk.bf16.vlgmr.msra.gmra.mxu1 %vm376_vm2, %v6800_v48  ;;  %5868 = vmatprep.mubr.msk.bf16.mxu0 %vm6295_vm1, %v6294_v1  ;;  %v5150_v48 = vld [vmem:[%s7868_s1 + $0x28] sm:$0xf]  ;;  %v6892_v10 = vpop.permute.xlu0 %1185 }
 0x132   : > { %v1418_v19 = vadd.f32 %v1417_v13, %v1416_v58  ;;  %v5650_v20 = vpop.f32.mrf.mxu0  ;;  %5981 = vmatpush3.bf16.msra.mxu1 %v3378_v62  ;;  %5910 = vmatprep.mubr.msk.bf16.mxu1 %vm6295_vm1, %v6294_v1  ;;  %v2663_v41 = vsel %vm299_vm3, %v2658_v12, %v2662_v8  ;;  %v3081_v46 = vsel %vm404_vm0, %v5150_v48, 0  ;;  %v2670_v62 = vrot.slane %v2668_v36, 1 }
 0x133   : > { %v5333_v24 = vpack.c.bf16 %v1246_v16, %v1246_v16  ;;  %v1358_v28 = vsel %vm1352_vm6, %v1246_v16, 0.0  ;;  %v1399_v26 = vmul.f32 %v1246_v16, %v1246_v16  ;;  %v1139_v29 = vadd.f32 %v1080_v30, %v842_v59  ;;  %v5692_v31 = vpop.f32.mrf.mxu1  ;;  %6056 = vmatprep.subr.bf16.mxu1 %v6294_v1 }
 0x134   : > { %v1359_v32 = vadd.f32 %v1358_v28, %v1357_v9  ;;  %v786_v33 = vpop.f32.mrf.mxu0  ;;  %v2672_v20 = vshrl.u32 %v6849_v17, 16 }
 0x135   : > { %1337 = vst.msk [vmem:[%s6808_s8 + $0xc] sm:$0xf] %vm1333_vm5, %v5333_v24  ;;  %v1419_v39 = vsel %vm1352_vm6, %v1399_v26, 0.0  ;;  %v1247_v7 = vmul.f32 %v6860_v23, %v1139_v29  ;;  %v843_v30 = vadd.f32 %v786_v33, %v6704_v37  ;;  %v1091_v40 = vpop.f32.mrf.mxu1  ;;  %v2666_v37 = vor.u32 %v2664_v35, %v2662_v8 }
 0x136   : > { %v1420_v42 = vadd.f32 %v1419_v39, %v1418_v19  ;;  %v5651_v43 = vpop.f32.mrf.mxu0 }
 0x137   : > { %v5334_v47 = vpack.c.bf16 %v1247_v7, %v1247_v7  ;;  %v1360_v50 = vsel %vm1352_vm6, %v1247_v7, 0.0  ;;  %v1400_v52 = vmul.f32 %v1247_v7, %v1247_v7  ;;  %v1140_v53 = vadd.f32 %v1083_v56, %v843_v30  ;;  %v5693_v54 = vpop.f32.mrf.mxu1  ;;  %v6890_v56 = vld [vmem:[%s6355_s26 + $0x20] sm:$0xff]  }
 0x138   : > { %v1361_v58 = vadd.f32 %v1360_v50, %v1359_v32  ;;  %v791_v60 = vpop.f32.mrf.mxu0  ;;  %5869 = vmatmul.mubr.msk.bf16.vlgmr.msra.gmra.mxu0 %vm376_vm2, %v2663_v41  ;;  %v2671_v19 = vsel %vm299_vm3, %v2666_v37, %v2670_v62  ;;  %v2676_v29 = vshll.u32 %v6890_v56, 16  ;;  %v6908_v32 = vpop.permute.xlu1 %1190 }
 0x139   : > { %1338 = vst.msk [vmem:[%s6808_s8 + $0x10] sm:$0xf] %vm1333_vm5, %v5334_v47  ;;  %v1421_v63 = vsel %vm1352_vm6, %v1400_v52, 0.0  ;;  %v1248_v0 = vmul.f32 %v6877_v44, %v1140_v53  ;;  %v844_v2 = vadd.f32 %v791_v60, %v6711_v49  ;;  %5943 = vmatpush3.bf16.msra.mxu0 %v3081_v46  ;;  %v1096_v3 = vpop.f32.mrf.mxu1  ;;  %5911 = vmatmul.mubr.msk.bf16.gmra.mxu1 %vm376_vm2, %v6817_v22  ;;  %v6924_v54 = vpop.permute.xlu0 %1195 }
 0x13a   : > { %v1422_v6 = vadd.f32 %v1421_v63, %v1420_v42  ;;  %v5654_v9 = vpop.f32.mrf.mxu0  ;;  %5872 = vmatprep.mubr.msk.bf16.mxu0 %vm6295_vm1, %v6294_v1  ;;  %5914 = vmatprep.mubr.msk.bf16.mxu1 %vm6295_vm1, %v6294_v1  ;;  %v2674_v42 = vor.u32 %v2672_v20, %v2670_v62 }
 0x13b   : > { %v5335_v12 = vpack.c.bf16 %v1248_v0, %v1248_v0  ;;  %v1362_v49 = vsel %vm1352_vm6, %v1248_v0, 0.0  ;;  %v1401_v13 = vmul.f32 %v1248_v0, %v1248_v0  ;;  %v1141_v16 = vadd.f32 %v1088_v18, %v844_v2  ;;  %v5696_v59 = vpop.f32.mrf.mxu1  ;;  %6018 = vmatprep.subr.bf16.mxu0 %v6294_v1 }
 0x13c   : > { %v1363_v22 = vadd.f32 %v1362_v49, %v1361_v58  ;;  %v794_v8 = vpop.f32.mrf.mxu0  ;;  %v2680_v0 = vshrl.u32 %v6890_v56, 16  ;;  %v6937_v59 = vpop.permute.xlu1 %1200 }
 0x13d   : > { %1339 = vst.msk [vmem:[%s6808_s8 + $0x14] sm:$0xf] %vm1333_vm5, %v5335_v12  ;;  %v1423_v24 = vsel %vm1352_vm6, %v1401_v13, 0.0  ;;  %v1249_v28 = vmul.f32 %v6892_v10, %v1141_v16  ;;  %v845_v26 = vadd.f32 %v794_v8, %v6719_v57  ;;  %v1099_v18 = vpop.f32.mrf.mxu1  ;;  %v6913_v57 = vld [vmem:[%s6355_s26 + $0x28] sm:$0xff]  }
 0x13e   : > { %v1424_v31 = vadd.f32 %v1423_v24, %v1422_v6  ;;  %v5655_v48 = vpop.f32.mrf.mxu0  ;;  %v2684_v2 = vshll.u32 %v6913_v57, 16 }
 0x13f   : > { %v5336_v33 = vpack.c.bf16 %v1249_v28, %v1249_v28  ;;  %v1364_v35 = vsel %vm1352_vm6, %v1249_v28, 0.0  ;;  %v1402_v36 = vmul.f32 %v1249_v28, %v1249_v28  ;;  %v1142_v39 = vadd.f32 %v1091_v40, %v845_v26  ;;  %v5697_v7 = vpop.f32.mrf.mxu1 }
 0x140   : > { %v1365_v30 = vadd.f32 %v1364_v35, %v1363_v22  ;;  %v799_v41 = vpop.f32.mrf.mxu0  ;;  %5873 = vmatmul.mubr.msk.bf16.gmra.mxu0 %vm376_vm2, %v2671_v19  ;;  %v2678_v40 = vrot.slane %v2676_v29, 1  ;;  %v2686_v29 = vrot.slane %v2684_v2, 1  ;;  %v6953_v7 = vpop.permute.xlu0 %1205 }
 0x141   : > { %1340 = vst.msk [vmem:[%s6808_s8 + $0x18] sm:$0xf] %vm1333_vm5, %v5336_v33  ;;  %v1425_v43 = vsel %vm1352_vm6, %v1402_v36, 0.0  ;;  %v1250_v46 = vmul.f32 %v6908_v32, %v1142_v39  ;;  %v846_v47 = vadd.f32 %v799_v41, %v6725_v5  ;;  %v1104_v50 = vpop.f32.mrf.mxu1  ;;  %5915 = vmatmul.mubr.msk.bf16.gmra.mxu1 %vm376_vm2, %v6849_v17  ;;  %5876 = vmatprep.mubr.msk.bf16.mxu0 %vm6295_vm1, %v6294_v1 }
 0x142   : > { %v1426_v52 = vadd.f32 %v1425_v43, %v1424_v31  ;;  %v5658_v53 = vpop.f32.mrf.mxu0  ;;  %5918 = vmatprep.mubr.msk.bf16.mxu1 %vm6295_vm1, %v6294_v1  ;;  %v2679_v13 = vsel %vm299_vm3, %v2674_v42, %v2678_v40 }
 0x143   : > { %v5337_v58 = vpack.c.bf16 %v1250_v46, %v1250_v46  ;;  %v1366_v60 = vsel %vm1352_vm6, %v1250_v46, 0.0  ;;  %v1403_v5 = vmul.f32 %v1250_v46, %v1250_v46  ;;  %v1143_v37 = vadd.f32 %v1096_v3, %v846_v47  ;;  %v5700_v62 = vpop.f32.mrf.mxu1 }
 0x144   : > { %v1367_v63 = vadd.f32 %v1366_v60, %v1365_v30  ;;  %v802_v17 = vpop.f32.mrf.mxu0  ;;  %v6966_v62 = vpop.permute.xlu1 %1210 }
 0x145   : > { %1341 = vst.msk [vmem:[%s6808_s8 + $0x1c] sm:$0xf] %vm1333_vm5, %v5337_v58  ;;  %v1427_v6 = vsel %vm1352_vm6, %v1403_v5, 0.0  ;;  %v1251_v9 = vmul.f32 %v6924_v54, %v1143_v37  ;;  %v847_v12 = vadd.f32 %v802_v17, %v6732_v14  ;;  %v1107_v49 = vpop.f32.mrf.mxu1  ;;  %v2682_v14 = vor.u32 %v2680_v0, %v2678_v40 }
 0x146   : > { %v1428_v3 = vadd.f32 %v1427_v6, %v1426_v52  ;;  %v5659_v16 = vpop.f32.mrf.mxu0  ;;  %v2688_v40 = vshrl.u32 %v6913_v57, 16 }
 0x147   : > { %v5338_v22 = vpack.c.bf16 %v1251_v9, %v1251_v9  ;;  %v1368_v8 = vsel %vm1352_vm6, %v1251_v9, 0.0  ;;  %v1404_v19 = vmul.f32 %v1251_v9, %v1251_v9  ;;  %v1144_v20 = vadd.f32 %v1099_v18, %v847_v12  ;;  %v5701_v24 = vpop.f32.mrf.mxu1  ;;  %v6951_v18 = vld [vmem:[%s6355_s26 + $0x30] sm:$0xff]  }
 0x148   : > { %v1369_v28 = vadd.f32 %v1368_v8, %v1367_v63  ;;  %v807_v26 = vpop.f32.mrf.mxu0  ;;  %5877 = vmatmul.mubr.msk.bf16.gmra.mxu0 %vm376_vm2, %v2679_v13  ;;  %v2687_v47 = vsel %vm299_vm3, %v2682_v14, %v2686_v29  ;;  %v2690_v13 = vor.u32 %v2688_v40, %v2686_v29  ;;  %v6982_v24 = vpop.permute.xlu0 %1215 }
 0x149   : > { %1342 = vst.msk [vmem:[%s6808_s8 + $0x20] sm:$0xf] %vm1333_vm5, %v5338_v22  ;;  %v1429_v31 = vsel %vm1352_vm6, %v1404_v19, 0.0  ;;  %v1252_v48 = vmul.f32 %v6937_v59, %v1144_v20  ;;  %v848_v33 = vadd.f32 %v807_v26, %v6738_v25  ;;  %v1112_v35 = vpop.f32.mrf.mxu1  ;;  %5919 = vmatmul.mubr.msk.bf16.gmra.mxu1 %vm376_vm2, %v6890_v56  ;;  %5880 = vmatprep.mubr.msk.bf16.mxu0 %vm6295_vm1, %v6294_v1 }
 0x14a   : > { %v1430_v36 = vadd.f32 %v1429_v31, %v1428_v3  ;;  %v5662_v39 = vpop.f32.mrf.mxu0  ;;  %5922 = vmatprep.mubr.msk.bf16.mxu1 %vm6295_vm1, %v6294_v1 }
 0x14b   : > { %v5339_v30 = vpack.c.bf16 %v1252_v48, %v1252_v48  ;;  %v1370_v25 = vsel %vm1352_vm6, %v1252_v48, 0.0  ;;  %v1405_v41 = vmul.f32 %v1252_v48, %v1252_v48  ;;  %v1145_v42 = vadd.f32 %v1104_v50, %v848_v33  ;;  %v5704_v43 = vpop.f32.mrf.mxu1 }
 0x14c   : > { %v1371_v56 = vadd.f32 %v1370_v25, %v1369_v28  ;;  %v810_v46 = vpop.f32.mrf.mxu0  ;;  %v2692_v50 = vshll.u32 %v6951_v18, 16  ;;  %v2696_v48 = vshrl.u32 %v6951_v18, 16  ;;  %v6995_v43 = vpop.permute.xlu1 %1220 }
 0x14d   : > { %1343 = vst.msk [vmem:[%s6808_s8 + $0x24] sm:$0xf] %vm1333_vm5, %v5339_v30  ;;  %v1431_v52 = vsel %vm1352_vm6, %v1405_v41, 0.0  ;;  %v1253_v53 = vmul.f32 %v6953_v7, %v1145_v42  ;;  %v849_v58 = vadd.f32 %v810_v46, %v6745_v34  ;;  %v1115_v60 = vpop.f32.mrf.mxu1  ;;  %v6971_v34 = vld [vmem:[%s6355_s26 + $0x38] sm:$0xff]  }
 0x14e   : > { %v1432_v5 = vadd.f32 %v1431_v52, %v1430_v36  ;;  %v5663_v37 = vpop.f32.mrf.mxu0  ;;  %v2700_v33 = vshll.u32 %v6971_v34, 16 }
 0x14f   : > { %v5340_v63 = vpack.c.bf16 %v1253_v53, %v1253_v53  ;;  %v1372_v17 = vsel %vm1352_vm6, %v1253_v53, 0.0  ;;  %v1406_v0 = vmul.f32 %v1253_v53, %v1253_v53  ;;  %v1146_v2 = vadd.f32 %v1107_v49, %v849_v58  ;;  %v5705_v6 = vpop.f32.mrf.mxu1 }
 0x150   : > { %v1373_v9 = vadd.f32 %v1372_v17, %v1371_v56  ;;  %v815_v12 = vpop.f32.mrf.mxu0  ;;  %5881 = vmatmul.mubr.msk.bf16.gmra.mxu0 %vm376_vm2, %v2687_v47  ;;  %v2694_v49 = vrot.slane %v2692_v50, 1  ;;  %v2702_v50 = vrot.slane %v2700_v33, 1  ;;  %v7011_v6 = vpop.permute.xlu0 %1225 }
 0x151   : > { %1344 = vst.msk [vmem:[%s6808_s8 + $0x28] sm:$0xf] %vm1333_vm5, %v5340_v63  ;;  %v1433_v3 = vsel %vm1352_vm6, %v1406_v0, 0.0  ;;  %v1254_v16 = vmul.f32 %v6966_v62, %v1146_v2  ;;  %v850_v22 = vadd.f32 %v815_v12, %v6751_v45  ;;  %v1120_v8 = vpop.f32.mrf.mxu1  ;;  %5923 = vmatmul.mubr.msk.bf16.gmra.mxu1 %vm376_vm2, %v6913_v57  ;;  %5884 = vmatprep.mubr.msk.bf16.mxu0 %vm6295_vm1, %v6294_v1 }
 0x152   : > { %v1434_v19 = vadd.f32 %v1433_v3, %v1432_v5  ;;  %v5666_v20 = vpop.f32.mrf.mxu0  ;;  %5926 = vmatprep.mubr.msk.bf16.mxu1 %vm6295_vm1, %v6294_v1  ;;  %v2695_v41 = vsel %vm299_vm3, %v2690_v13, %v2694_v49 }
 0x153   : > { %v5341_v28 = vpack.c.bf16 %v1254_v16, %v1254_v16  ;;  %v1374_v26 = vsel %vm1352_vm6, %v1254_v16, 0.0  ;;  %v1407_v45 = vmul.f32 %v1254_v16, %v1254_v16  ;;  %v1147_v14 = vadd.f32 %v1112_v35, %v850_v22  ;;  %v5708_v29 = vpop.f32.mrf.mxu1 }
 0x154   : > { %v1375_v31 = vadd.f32 %v1374_v26, %v1373_v9  ;;  %v818_v57 = vpop.f32.mrf.mxu0  ;;  %v7024_v29 = vpop.permute.xlu1 %1230 }
 0x155   : > { %1345 = vst.msk [vmem:[%s6808_s8 + $0x2c] sm:$0xf] %vm1333_vm5, %v5341_v28  ;;  %v1435_v36 = vsel %vm1352_vm6, %v1407_v45, 0.0  ;;  %v1255_v39 = vmul.f32 %v6982_v24, %v1147_v14  ;;  %v851_v30 = vadd.f32 %v818_v57, %v6758_v55  ;;  %v1123_v25 = vpop.f32.mrf.mxu1  ;;  %v2698_v55 = vor.u32 %v2696_v48, %v2694_v49 }
 0x156   : > { %v1436_v35 = vadd.f32 %v1435_v36, %v1434_v19  ;;  %v5667_v42 = vpop.f32.mrf.mxu0  ;;  %v2704_v49 = vshrl.u32 %v6971_v34, 16 }
 0x157   : > { %v5342_v56 = vpack.c.bf16 %v1255_v39, %v1255_v39  ;;  %v1376_v46 = vsel %vm1352_vm6, %v1255_v39, 0.0  ;;  %v1408_v47 = vmul.f32 %v1255_v39, %v1255_v39  ;;  %v1148_v40 = vadd.f32 %v1115_v60, %v851_v30  ;;  %v5709_v52 = vpop.f32.mrf.mxu1  ;;  %v7009_v60 = vld [vmem:[%s6355_s26 + $0x40] sm:$0xff]  }
 0x158   : > { %v1377_v53 = vadd.f32 %v1376_v46, %v1375_v31  ;;  %v823_v58 = vpop.f32.mrf.mxu0  ;;  %5885 = vmatmul.mubr.msk.bf16.gmra.mxu0 %vm376_vm2, %v2695_v41  ;;  %v2703_v22 = vsel %vm299_vm3, %v2698_v55, %v2702_v50  ;;  %v2708_v45 = vshll.u32 %v7009_v60, 16  ;;  %v7027_v31 = vld [vmem:[%s6355_s26 + $0x48] sm:$0xff]   ;;  %v7040_v52 = vpop.permute.xlu0 %1235 }
 0x159   : > { %1346 = vst.msk [vmem:[%s6808_s8 + $0x30] sm:$0xf] %vm1333_vm5, %v5342_v56  ;;  %v1437_v5 = vsel %vm1352_vm6, %v1408_v47, 0.0  ;;  %v1256_v37 = vmul.f32 %v6995_v43, %v1148_v40  ;;  %v852_v63 = vadd.f32 %v823_v58, %v6764_v4  ;;  %v1128_v17 = vpop.f32.mrf.mxu1  ;;  %5927 = vmatmul.mubr.msk.bf16.gmra.mxu1 %vm376_vm2, %v6951_v18  ;;  %5888 = vmatprep.mubr.msk.bf16.mxu0 %vm6295_vm1, %v6294_v1 }
 0x15a   : > { %v1438_v0 = vadd.f32 %v1437_v5, %v1436_v35  ;;  %v5670_v2 = vpop.f32.mrf.mxu0  ;;  %5930 = vmatprep.mubr.msk.bf16.mxu1 %vm6295_vm1, %v6294_v1 }
 0x15b   : > { %v5343_v9 = vpack.c.bf16 %v1256_v37, %v1256_v37  ;;  %v1378_v4 = vsel %vm1352_vm6, %v1256_v37, 0.0  ;;  %v1409_v12 = vmul.f32 %v1256_v37, %v1256_v37  ;;  %v1149_v13 = vadd.f32 %v1120_v8, %v852_v63  ;;  %v5712_v18 = vpop.f32.mrf.mxu1 }
 0x15c   : > { %v1379_v3 = vadd.f32 %v1378_v4, %v1377_v53  ;;  %v826_v16 = vpop.f32.mrf.mxu0  ;;  %v2712_v53 = vshrl.u32 %v7009_v60, 16 }
 0x15d   : > { %1347 = vst.msk [vmem:[%s6808_s8 + $0x34] sm:$0xf] %vm1333_vm5, %v5343_v9  ;;  %v1439_v19 = vsel %vm1352_vm6, %v1409_v12, 0.0  ;;  %v1257_v20 = vmul.f32 %v7011_v6, %v1149_v13  ;;  %v853_v28 = vadd.f32 %v826_v16, %v6771_v15  ;;  %v1131_v26 = vpop.f32.mrf.mxu1  ;;  %v2706_v15 = vor.u32 %v2704_v49, %v2702_v50  ;;  %v6246_v13 = vld [vmem:[%s6355_s26 + $0x10] sm:$0xff]  }
 0x15e   : > { %v1440_v8 = vadd.f32 %v1439_v19, %v1438_v0  ;;  %v5671_v14 = vpop.f32.mrf.mxu0 }
 0x15f   : > { %v5344_v57 = vpack.c.bf16 %v1257_v20, %v1257_v20  ;;  %v1380_v48 = vsel %vm1352_vm6, %v1257_v20, 0.0  ;;  %v1410_v33 = vmul.f32 %v1257_v20, %v1257_v20  ;;  %v1150_v36 = vadd.f32 %v1123_v25, %v853_v28  ;;  %v5713_v39 = vpop.f32.mrf.mxu1  ;;  %v6245_v14 = vld [vmem:[%s6355_s26 + $0x50] ss:$0 sps:$4 sm:$0x11]  }
 0x160   : > { %v1381_v30 = vadd.f32 %v1380_v48, %v1379_v3  ;;  %v831_v41 = vpop.f32.mrf.mxu0  ;;  %5889 = vmatmul.mubr.msk.bf16.gmra.mxu0 %vm376_vm2, %v2703_v22  ;;  %v2710_v25 = vrot.slane %v2708_v45, 1  ;;  %v3277_v39 = vshll.u32 %v6246_v13, 16 }
 0x161   : > { %1348 = vst.msk [vmem:[%s6808_s8 + $0x38] sm:$0xf] %vm1333_vm5, %v5344_v57  ;;  %v1441_v35 = vsel %vm1352_vm6, %v1410_v33, 0.0  ;;  %v1258_v42 = vmul.f32 %v7024_v29, %v1150_v36  ;;  %v854_v56 = vadd.f32 %v831_v41, %v6777_v27  ;;  %v1825_v46 = vpop.f32.mrf.mxu1  ;;  %5931 = vmatmul.mubr.msk.bf16.gmra.mxu1 %vm376_vm2, %v6971_v34  ;;  %5892 = vmatprep.mubr.msk.bf16.mxu0 %vm6295_vm1, %v6294_v1  ;;  %v2716_v27 = vshll.u32 %v7027_v31, 16 }
 0x162   : > { %v1442_v47 = vadd.f32 %v1441_v35, %v1440_v8  ;;  %v5674_v40 = vpop.f32.mrf.mxu0  ;;  %5934 = vmatprep.mubr.msk.bf16.mxu1 %vm6295_vm1, %v6294_v1  ;;  %v2711_v12 = vsel %vm299_vm3, %v2706_v15, %v2710_v25  ;;  %v2714_v16 = vor.u32 %v2712_v53, %v2710_v25  ;;  %v3275_v53 = vshrl.u32 %v6246_v13, 16 }
 0x163   : > { %v5345_v58 = vpack.c.bf16 %v1258_v42, %v1258_v42  ;;  %v1382_v34 = vsel %vm1352_vm6, %v1258_v42, 0.0  ;;  %v1411_v55 = vmul.f32 %v1258_v42, %v1258_v42  ;;  %v1151_v50 = vadd.f32 %v1128_v17, %v854_v56  ;;  %v5756_v5 = vpop.f32.mrf.mxu1  ;;  %v7054_v17 = vpop.permute.xlu1 %1240 }
 0x164   : > { %v1383_v37 = vadd.f32 %v1382_v34, %v1381_v30  ;;  %v834_v63 = vpop.f32.mrf.mxu0  ;;  %v2718_v22 = vrot.slane %v2716_v27, 1  ;;  %v2724_v40 = vshll.u32 %v6245_v14, 16 }
 0x165   : > { %1349 = vst.msk [vmem:[%s6808_s8 + $0x3c] sm:$0xf] %vm1333_vm5, %v5345_v58  ;;  %v1443_v0 = vsel %vm1352_vm6, %v1411_v55, 0.0  ;;  %v1259_v2 = vmul.f32 %v7040_v52, %v1151_v50  ;;  %v855_v9 = vadd.f32 %v834_v63, %v6784_v38  ;;  %v1828_v4 = vpop.f32.mrf.mxu1  ;;  %v3279_v55 = vrot.slane %v3277_v39, 1 }
 0x166   : > { %v1444_v18 = vadd.f32 %v1443_v0, %v1442_v47  ;;  %v5675_v3 = vpop.f32.mrf.mxu0  ;;  %v2720_v47 = vshrl.u32 %v7027_v31, 16 }
 0x167   : > { %v5346_v49 = vpack.c.bf16 %v1259_v2, %v1259_v2  ;;  %v1384_v19 = vsel %vm1352_vm6, %v1259_v2, 0.0  ;;  %v1412_v20 = vmul.f32 %v1259_v2, %v1259_v2  ;;  %v1152_v28 = vadd.f32 %v1131_v26, %v855_v9  ;;  %v5757_v45 = vpop.f32.mrf.mxu1  ;;  %v7070_v26 = vld [vmem:[%s6355_s26 + $0x18] sm:$0xff]  }
 0x168   : > { %v1385_v38 = vadd.f32 %v1384_v19, %v1383_v37  ;;  %v1611_v8 = vpop.f32.mrf.mxu0  ;;  %5893 = vmatmul.mubr.msk.bf16.gmra.mxu0 %vm376_vm2, %v2711_v12  ;;  %v3282_v50 = vshll.u32 %v7070_v26, 16  ;;  %v2722_v13 = vor.u32 %v2720_v47, %v2718_v22  ;;  %v2726_v3 = vrot.slane %v2724_v40, 1  ;;  %v6249_v45 = vld [vmem:[%s6355_s26 + $0x20] sm:$0xff]  }
 0x169   : > { %1350 = vst.msk [vmem:[%s6808_s8 + $0x40] sm:$0xf] %vm1333_vm5, %v5346_v49  ;;  %v1445_v57 = vsel %vm1352_vm6, %v1412_v20, 0.0  ;;  %v1260_v48 = vmul.f32 %v7054_v17, %v1152_v28  ;;  %v7063_v33 = vadd.f32 %v1825_v46, %v1611_v8  ;;  %v1833_v36 = vpop.f32.mrf.mxu1  ;;  %5935 = vmatmul.mubr.msk.bf16.gmra.mxu1 %vm376_vm2, %v7009_v60  ;;  %5896 = vmatprep.mubr.msk.bf16.mxu0 %vm6295_vm1, %v6294_v1 }
 0x16a   : > { %v1446_v30 = vadd.f32 %v1445_v57, %v1444_v18  ;;  %v5718_v41 = vpop.f32.mrf.mxu0  ;;  %5938 = vmatprep.mubr.msk.bf16.mxu1 %vm6295_vm1, %v6294_v1  ;;  %v2719_v46 = vsel %vm299_vm3, %v2714_v16, %v2718_v22  ;;  %v3280_v16 = vor.u32 %v3279_v55, %v3275_v53  ;;  %v3284_v49 = vrot.slane %v3282_v50, 1  ;;  %v6251_v50 = vld [vmem:[%s6355_s26 + $0x28] sm:$0xff]  }
 0x16b   : > { %v5347_v15 = vpack.c.bf16 %v1260_v48, %v1260_v48  ;;  %v1386_v35 = vsel %vm1352_vm6, %v1260_v48, 0.0  ;;  %v1413_v42 = vmul.f32 %v1260_v48, %v1260_v48  ;;  %v5760_v56 = vpop.f32.mrf.mxu1 }
 0x16c   : > { %v1387_v60 = vadd.f32 %v1386_v35, %v1385_v38  ;;  %v1614_v25 = vpop.f32.mrf.mxu0  ;;  %v3285_v39 = vsel %vm299_vm3, %v3280_v16, %v3284_v49  ;;  %v3286_v35 = vshrl.u32 %v7070_v26, 16  ;;  %v3298_v16 = vshll.u32 %v6251_v50, 16 }
 0x16d   : > { %1351 = vst.msk [vmem:[%s6808_s8 + $0x44] sm:$0xf] %vm1333_vm5, %v5347_v15  ;;  %v1447_v27 = vsel %vm1352_vm6, %v1413_v42, 0.0  ;;  %v7080_v58 = vadd.f32 %v1828_v4, %v1614_v25  ;;  %v1836_v34 = vpop.f32.mrf.mxu1  ;;  %v3290_v42 = vshll.u32 %v6249_v45, 16 }
 0x16e   : > { %v1388_v5 = vrot.slane %v1387_v60, 4  ;;  %v1448_v37 = vadd.f32 %v1447_v27, %v1446_v30  ;;  %v5719_v63 = vpop.f32.mrf.mxu0 }
 0x16f   : > { %v5761_v0 = vpop.f32.mrf.mxu1  ;;  %v3292_v55 = vrot.slane %v3290_v42, 1 }
 0x170   : > { %v1389_v2 = vadd.f32 %v1388_v5, %v1387_v60  ;;  %v1449_v9 = vrot.slane %v1448_v37, 4  ;;  %v1619_v12 = vpop.f32.mrf.mxu0  ;;  %5897 = vmatmul.mubr.msk.bf16.gmra.mxu0 %vm376_vm2, %v2719_v46  ;;  %v6248_v0 = vld [vmem:[%s6355_s26 + $0x10] sm:$0xff]  }
 0x171   : > { %v7084_v18 = vadd.f32 %v1833_v36, %v1619_v12  ;;  %v1841_v4 = vpop.f32.mrf.mxu1  ;;  %5939 = vmatmul.mubr.msk.bf16.gmra.mxu1 %vm376_vm2, %v7027_v31  ;;  %5900 = vmatprep.mubr.msk.bf16.mxu0 %vm6295_vm1, %v6294_v1  ;;  %v5227_v31 = vld [vmem:[%s7868_s1 + $0x30] sm:$0xf]  ;;  %v2727_v36 = vsel %vm299_vm3, %v2722_v13, %v2726_v3  ;;  %v3294_v3 = vshrl.u32 %v6249_v45, 16 }
 0x172   : > { %v1390_v19 = vrot.slane %v1389_v2, 2  ;;  %v1450_v20 = vadd.f32 %v1449_v9, %v1448_v37  ;;  %v5722_v28 = vpop.f32.mrf.mxu0  ;;  %5982 = vmatprep.mubr.msk.bf16.mxu1 %vm6295_vm1, %v6294_v1  ;;  %v4047_v46 = vsel %vm404_vm0, %v5227_v31, 0  ;;  %v5228_v37 = vld [vmem:[%s7868_s1 + $0x34] sm:$0xf] }
 0x173   : > { %v5764_v22 = vpop.f32.mrf.mxu1  ;;  %v3833_v13 = vsel %vm404_vm0, %v5228_v37, 0  ;;  %v3296_v45 = vor.u32 %v3294_v3, %v3292_v55 }
 0x174   : > { %v1391_v38 = vadd.f32 %v1390_v19, %v1389_v2  ;;  %v1451_v8 = vrot.slane %v1450_v20, 2  ;;  %v1622_v14 = vpop.f32.mrf.mxu0 }
 0x175   : > { %v7097_v57 = vadd.f32 %v1836_v34, %v1622_v14  ;;  %v1844_v48 = vpop.f32.mrf.mxu1  ;;  %v3288_v34 = vor.u32 %v3286_v35, %v3284_v49 }
 0x176   : > { %v1392_v30 = vrot.slane %v1391_v38, 1  ;;  %v1452_v41 = vadd.f32 %v1451_v8, %v1450_v20  ;;  %v5723_v15 = vpop.f32.mrf.mxu0  ;;  %v6253_v8 = vld [vmem:[%s6355_s26 + $0x30] sm:$0xff]  }
 0x177   : > { %v5765_v56 = vpop.f32.mrf.mxu1  ;;  %v3302_v15 = vshrl.u32 %v6251_v50, 16  ;;  %v3306_v35 = vshll.u32 %v6253_v8, 16 }
 0x178   : > { %v1393_v60 = vadd.f32 %v1392_v30, %v1391_v38  ;;  %v1453_v25 = vrot.slane %v1452_v41, 1  ;;  %v1627_v47 = vpop.f32.mrf.mxu0  ;;  %5901 = vmatmul.mubr.msk.bf16.gmra.mxu0 %vm376_vm2, %v2727_v36  ;;  %v3300_v38 = vrot.slane %v3298_v16, 1 }
 0x179   : > { %v7109_v40 = vadd.f32 %v1841_v4, %v1627_v47  ;;  %v1849_v26 = vpop.f32.mrf.mxu1  ;;  %5983 = vmatmul.mubr.msk.bf16.vlgmr.msra.gmra.mxu1 %vm376_vm2, %v3285_v39  ;;  %5944 = vmatprep.mubr.msk.bf16.mxu0 %vm6295_vm1, %v6294_v1  ;;  %v3293_v4 = vsel %vm299_vm3, %v3288_v34, %v3292_v55  ;;  %v6252_v55 = vld [vmem:[%s6355_s26 + $0x20] sm:$0xff]  }
 0x17a   : > { %1395 = vst.msk [vmem:[%s7105_s19] sm:$0x1] %vm1394_vm7, %v1393_v60  ;;  %v1454_v53 = vadd.f32 %v1453_v25, %v1452_v41  ;;  %v5726_v27 = vpop.f32.mrf.mxu0  ;;  %6057 = vmatpush3.bf16.msra.mxu1 %v4047_v46  ;;  %5986 = vmatprep.mubr.msk.bf16.mxu1 %vm6295_vm1, %v6294_v1  ;;  %v3301_v41 = vsel %vm299_vm3, %v3296_v45, %v3300_v38 }
 0x17b   : > { %v5768_v5 = vpop.f32.mrf.mxu1  ;;  %6132 = vmatprep.subr.bf16.mxu1 %v6294_v1  ;;  %v3304_v47 = vor.u32 %v3302_v15, %v3300_v38  ;;  %v6254_v38 = vld [vmem:[%s6355_s26 + $0x28] sm:$0xff]  }
 0x17c   : > { %1455 = vst.msk [vmem:[%s7105_s19 + $0x1] sm:$0x1] %vm1394_vm7, %v1454_v53  ;;  %v1630_v63 = vpop.f32.mrf.mxu0  ;;  %v6255_v53 = vld [vmem:[%s6355_s26 + $0x38] sm:$0xff]  }
 0x17d   : > { %v7126_v2 = vadd.f32 %v1844_v48, %v1630_v63  ;;  %v1852_v9 = vpop.f32.mrf.mxu1  ;;  %v6250_v48 = vld [vmem:[%s6355_s26 + $0x18] sm:$0xff]  }
 0x17e   : > { %v5727_v12 = vpop.f32.mrf.mxu0 }
 0x17f   : > { %v5769_v49 = vpop.f32.mrf.mxu1 }
 0x180   : > { %v1635_v19 = vpop.f32.mrf.mxu0  ;;  %5945 = vmatmul.mubr.msk.bf16.vlgmr.msra.gmra.mxu0 %vm376_vm2, %v6248_v0  ;;  %v3310_v0 = vshrl.u32 %v6253_v8, 16 }
 0x181   : > { %v7131_v20 = vadd.f32 %v1849_v26, %v1635_v19  ;;  %6019 = vmatpush3.bf16.msra.mxu0 %v3833_v13  ;;  %v1857_v28 = vpop.f32.mrf.mxu1  ;;  %5987 = vmatmul.mubr.msk.bf16.gmra.mxu1 %vm376_vm2, %v3293_v4  ;;  %v3308_v26 = vrot.slane %v3306_v35, 1 }
 0x182   : > { %v5730_v22 = vpop.f32.mrf.mxu0  ;;  %5948 = vmatprep.mubr.msk.bf16.mxu0 %vm6295_vm1, %v6294_v1  ;;  %5990 = vmatprep.mubr.msk.bf16.mxu1 %vm6295_vm1, %v6294_v1 }
 0x183   : > { %v5772_v14 = vpop.f32.mrf.mxu1  ;;  %6094 = vmatprep.subr.bf16.mxu0 %v6294_v1  ;;  %v3309_v63 = vsel %vm299_vm3, %v3304_v47, %v3308_v26  ;;  %v3312_v49 = vor.u32 %v3310_v0, %v3308_v26  ;;  %v6259_v47 = vld [vmem:[%s6355_s26 + $0x48] sm:$0xff]  }
 0x184   : > { %v1638_v31 = vpop.f32.mrf.mxu0  ;;  %v3330_v0 = vshll.u32 %v6259_v47, 16 }
 0x185   : > { %v7141_v36 = vadd.f32 %v1852_v9, %v1638_v31  ;;  %v1860_v39 = vpop.f32.mrf.mxu1  ;;  %v3314_v9 = vshll.u32 %v6255_v53, 16 }
 0x186   : > { %v5731_v30 = vpop.f32.mrf.mxu0 }
 0x187   : > { %v5773_v42 = vpop.f32.mrf.mxu1  ;;  %v3316_v19 = vrot.slane %v3314_v9, 1 }
 0x188   : > { %v1643_v56 = vpop.f32.mrf.mxu0  ;;  %5949 = vmatmul.mubr.msk.bf16.gmra.mxu0 %vm376_vm2, %v6250_v48 }
 0x189   : > { %v7145_v46 = vadd.f32 %v1857_v28, %v1643_v56  ;;  %v1865_v60 = vpop.f32.mrf.mxu1  ;;  %5991 = vmatmul.mubr.msk.bf16.gmra.mxu1 %vm376_vm2, %v3301_v41  ;;  %5952 = vmatprep.mubr.msk.bf16.mxu0 %vm6295_vm1, %v6294_v1  ;;  %v6257_v28 = vld [vmem:[%s6355_s26 + $0x40] sm:$0xff]   ;;  %v3317_v48 = vsel %vm299_vm3, %v3312_v49, %v3316_v19 }
 0x18a   : > { %v5734_v25 = vpop.f32.mrf.mxu0  ;;  %5994 = vmatprep.mubr.msk.bf16.mxu1 %vm6295_vm1, %v6294_v1  ;;  %v3322_v30 = vshll.u32 %v6257_v28, 16 }
 0x18b   : > { %v5776_v27 = vpop.f32.mrf.mxu1 }
 0x18c   : > { %v1646_v34 = vpop.f32.mrf.mxu0  ;;  %v3324_v25 = vrot.slane %v3322_v30, 1  ;;  %v6256_v27 = vld [vmem:[%s6355_s26 + $0x30] sm:$0xff]   ;;  %v3334_v30 = vshrl.u32 %v6259_v47, 16 }
 0x18d   : > { %v7154_v50 = vadd.f32 %v1860_v39, %v1646_v34  ;;  %v1868_v5 = vpop.f32.mrf.mxu1  ;;  %v3318_v39 = vshrl.u32 %v6255_v53, 16 }
 0x18e   : > { %v5735_v37 = vpop.f32.mrf.mxu0 }
 0x18f   : > { %v5777_v12 = vpop.f32.mrf.mxu1 }
 0x190   : > { %v1651_v13 = vpop.f32.mrf.mxu0  ;;  %5953 = vmatmul.mubr.msk.bf16.gmra.mxu0 %vm376_vm2, %v6252_v55 }
 0x191   : > { %v7158_v4 = vadd.f32 %v1865_v60, %v1651_v13  ;;  %v1873_v3 = vpop.f32.mrf.mxu1  ;;  %5995 = vmatmul.mubr.msk.bf16.gmra.mxu1 %vm376_vm2, %v3309_v63  ;;  %5956 = vmatprep.mubr.msk.bf16.mxu0 %vm6295_vm1, %v6294_v1  ;;  %v3320_v60 = vor.u32 %v3318_v39, %v3316_v19  ;;  %v3326_v63 = vshrl.u32 %v6257_v28, 16  ;;  %v3332_v19 = vrot.slane %v3330_v0, 1  ;;  %v6261_v28 = vld [vmem:[%s6355_s26 + $0x50] sm:$0xff]  }
 0x192   : > { %v5738_v16 = vpop.f32.mrf.mxu0  ;;  %5998 = vmatprep.mubr.msk.bf16.mxu1 %vm6295_vm1, %v6294_v1 }
 0x193   : > { %v5780_v22 = vpop.f32.mrf.mxu1  ;;  %v3325_v37 = vsel %vm299_vm3, %v3320_v60, %v3324_v25  ;;  %v3328_v49 = vor.u32 %v3326_v63, %v3324_v25  ;;  %v3336_v47 = vor.u32 %v3334_v30, %v3332_v19  ;;  %v6260_v63 = vld [vmem:[%s6355_s26 + $0x40] sm:$0xff]   ;;  %v7222_v30 = vld [vmem:[%s6355_s26 + $0x10] sm:$0xff]  }
 0x194   : > { %v1654_v45 = vpop.f32.mrf.mxu0 }
 0x195   : > { %v7167_v8 = vadd.f32 %v1868_v5, %v1654_v45  ;;  %v1876_v14 = vpop.f32.mrf.mxu1  ;;  %v3333_v39 = vsel %vm299_vm3, %v3328_v49, %v3332_v19 }
 0x196   : > { %v5739_v31 = vpop.f32.mrf.mxu0 }
 0x197   : > { %v5781_v41 = vpop.f32.mrf.mxu1 }
 0x198   : > { %v1659_v15 = vpop.f32.mrf.mxu0  ;;  %5957 = vmatmul.mubr.msk.bf16.gmra.mxu0 %vm376_vm2, %v6254_v38  ;;  %v6258_v38 = vld [vmem:[%s6355_s26 + $0x38] sm:$0xff]   ;;  %v3338_v41 = vshll.u32 %v6261_v28, 16 }
 0x199   : > { %v7171_v35 = vadd.f32 %v1873_v3, %v1659_v15  ;;  %v1881_v42 = vpop.f32.mrf.mxu1  ;;  %5999 = vmatmul.mubr.msk.bf16.gmra.mxu1 %vm376_vm2, %v3317_v48  ;;  %5960 = vmatprep.mubr.msk.bf16.mxu0 %vm6295_vm1, %v6294_v1 }
 0x19a   : > { %v5742_v56 = vpop.f32.mrf.mxu0  ;;  %6002 = vmatprep.mubr.msk.bf16.mxu1 %vm6295_vm1, %v6294_v1 }
 0x19b   : > { %v5784_v26 = vpop.f32.mrf.mxu1 }
 0x19c   : > { %v1662_v53 = vpop.f32.mrf.mxu0  ;;  %v3340_v26 = vrot.slane %v3338_v41, 1 }
 0x19d   : > { %v7180_v34 = vadd.f32 %v1876_v14, %v1662_v53  ;;  %v1884_v55 = vpop.f32.mrf.mxu1  ;;  %v6263_v53 = vld [vmem:[%s6355_s26 + $0x58] ss:$0 sps:$4 sm:$0x11]  }
 0x19e   : > { %v5743_v5 = vpop.f32.mrf.mxu0  ;;  %v3346_v49 = vshll.u32 %v6263_v53, 16 }
 0x19f   : > { %v5785_v9 = vpop.f32.mrf.mxu1  ;;  %v7207_v5 = vld [vmem:[%s6355_s26 + $0xc] sm:$0xf] }
 0x1a0   : > { %v1667_v12 = vpop.f32.mrf.mxu0  ;;  %5961 = vmatmul.mubr.msk.bf16.gmra.mxu0 %vm376_vm2, %v6256_v27 }
 0x1a1   : > { %v7184_v13 = vadd.f32 %v1881_v42, %v1667_v12  ;;  %v1889_v3 = vpop.f32.mrf.mxu1  ;;  %6003 = vmatmul.mubr.msk.bf16.gmra.mxu1 %vm376_vm2, %v3325_v37  ;;  %5964 = vmatprep.mubr.msk.bf16.mxu0 %vm6295_vm1, %v6294_v1 }
 0x1a2   : > { %v5746_v16 = vpop.f32.mrf.mxu0  ;;  %6006 = vmatprep.mubr.msk.bf16.mxu1 %vm6295_vm1, %v6294_v1 }
 0x1a3   : > { %v5788_v22 = vpop.f32.mrf.mxu1  ;;  %v3342_v16 = vshrl.u32 %v6261_v28, 16 }
 0x1a4   : > { %v1670_v45 = vpop.f32.mrf.mxu0 }
 0x1a5   : > { %v7193_v14 = vadd.f32 %v1884_v55, %v1670_v45  ;;  %v1892_v31 = vpop.f32.mrf.mxu1  ;;  %v3715_v55 = vld [vmem:[%s6355_s26 + $0x8] sm:$0xf]  ;;  %v3344_v28 = vor.u32 %v3342_v16, %v3340_v26 }
 0x1a6   : > { %v5747_v48 = vpop.f32.mrf.mxu0  ;;  %v5248_v22 = vcombine.low %v3715_v55, %v7207_v5 }
 0x1a7   : > { %v5789_v15 = vpop.f32.mrf.mxu1 }
 0x1a8   : > { %v1675_v42 = vpop.f32.mrf.mxu0  ;;  %5965 = vmatmul.mubr.msk.bf16.gmra.mxu0 %vm376_vm2, %v6258_v38  ;;  %v3946_v41 = vshll.u32 %v5248_v22, 16 }
 0x1a9   : > { %v7197_v56 = vadd.f32 %v1889_v3, %v1675_v42  ;;  %v2281_v60 = vpop.f32.mrf.mxu1  ;;  %6007 = vmatmul.mubr.msk.bf16.gmra.mxu1 %vm376_vm2, %v3333_v39  ;;  %5968 = vmatprep.mubr.msk.bf16.mxu0 %vm6295_vm1, %v6294_v1  ;;  %v3341_v3 = vsel %vm299_vm3, %v3336_v47, %v3340_v26  ;;  %v3348_v39 = vrot.slane %v3346_v49, 1 }
 0x1aa   : > { %v5750_v25 = vpop.f32.mrf.mxu0  ;;  %6010 = vmatprep.mubr.msk.bf16.mxu1 %vm6295_vm1, %v6294_v1  ;;  %v3948_v26 = vrot.slane %v3946_v41, 1 }
 0x1ab   : > { %v5832_v27 = vpop.f32.mrf.mxu1 }
 0x1ac   : > { %v1678_v37 = vpop.f32.mrf.mxu0 }
 0x1ad   : > { %v7210_v0 = vadd.f32 %v1892_v31, %v1678_v37  ;;  %v2284_v9 = vpop.f32.mrf.mxu1  ;;  %v3349_v37 = vsel %vm299_vm3, %v3344_v28, %v3348_v39 }
 0x1ae   : > { %v5751_v12 = vpop.f32.mrf.mxu0 }
 0x1af   : > { %v5833_v19 = vpop.f32.mrf.mxu1  ;;  %v3951_v12 = vshll.u32 %v7222_v30, 16 }
 0x1b0   : > { %v2104_v45 = vpop.f32.mrf.mxu0  ;;  %5969 = vmatmul.mubr.msk.bf16.gmra.mxu0 %vm376_vm2, %v6260_v63  ;;  %v3944_v63 = vshrl.u32 %v5248_v22, 16  ;;  %v7231_v19 = vld [vmem:[%s6355_s26 + $0x18] sm:$0xff]  }
 0x1b1   : > { %v2175_v38 = vadd.f32 %v2104_v45, %v7063_v33  ;;  %v2289_v48 = vpop.f32.mrf.mxu1  ;;  %6011 = vmatmul.mubr.msk.bf16.gmra.mxu1 %vm376_vm2, %v3341_v3  ;;  %5972 = vmatprep.mubr.msk.bf16.mxu0 %vm6295_vm1, %v6294_v1  ;;  %v6262_v33 = vld [vmem:[%s6355_s26 + $0x48] sm:$0xff]   ;;  %v3953_v41 = vrot.slane %v3951_v12, 1 }
 0x1b2   : > { %v5794_v31 = vpop.f32.mrf.mxu0  ;;  %6014 = vmatprep.mubr.msk.bf16.mxu1 %vm6295_vm1, %v6294_v1  ;;  %v3949_v39 = vor.u32 %v3948_v26, %v3944_v63  ;;  %v3959_v63 = vshll.u32 %v7231_v19, 16 }
 0x1b3   : > { %v2352_v15 = vadd.f32 %v2281_v60, %v2175_v38  ;;  %v5836_v42 = vpop.f32.mrf.mxu1 }
 0x1b4   : > { %v2107_v25 = vpop.f32.mrf.mxu0 }
 0x1b5   : > { %v2370_v47 = vmul.f32 %v2352_v15, %v6790_v51  ;;  %v2176_v53 = vadd.f32 %v2107_v25, %v7080_v58  ;;  %v2292_v27 = vpop.f32.mrf.mxu1 }
 0x1b6   : > { %v5795_v55 = vpop.f32.mrf.mxu0 }
 0x1b7   : > { %v5348_v3 = vpack.c.bf16 %v2370_v47, %v2370_v47  ;;  %v2353_v60 = vadd.f32 %v2284_v9, %v2176_v53  ;;  %v5837_v16 = vpop.f32.mrf.mxu1  ;;  %v2522_v58 = vmul.f32 %v2370_v47, %v2370_v47  ;;  %v3736_v9 = vld [vmem:[%s6355_s26 + $0x8] sm:$0xe]  ;;  %v2479_v31 = vsel %vm1352_vm6, %v2370_v47, 0.0  ;;  %v5278_v53 = vld [vmem:[%s7868_s1 + $0x3c] sm:$0xf]  ;;  %v6264_v47 = vld [vmem:[%s6355_s26 + $0x50] sm:$0xff]  }
 0x1b8   : > { %v2112_v49 = vpop.f32.mrf.mxu0  ;;  %5973 = vmatmul.mubr.msk.bf16.gmra.mxu0 %vm376_vm2, %v6262_v33 }
 0x1b9   : > { %5100 = vst.msk [vmem:[%s6808_s8 + $0x48] sm:$0xf] %vm1333_vm5, %v5348_v3  ;;  %v2371_v45 = vmul.f32 %v2353_v60, %v6810_v11  ;;  %v2177_v38 = vadd.f32 %v2112_v49, %v7084_v18  ;;  %v2297_v22 = vpop.f32.mrf.mxu1  ;;  %6015 = vmatmul.mubr.msk.bf16.gmra.mxu1 %vm376_vm2, %v3349_v37  ;;  %5976 = vmatprep.mubr.msk.bf16.mxu0 %vm6295_vm1, %v6294_v1  ;;  %v3955_v60 = vshrl.u32 %v7222_v30, 16  ;;  %v2540_v26 = vsel %vm1352_vm6, %v2522_v58, 0.0 }
 0x1ba   : > { %v5798_v28 = vpop.f32.mrf.mxu0  ;;  %6058 = vmatprep.mubr.msk.bf16.mxu1 %vm6295_vm1, %v6294_v1  ;;  %v5229_v3 = vcombine.low %v3736_v9, %v7207_v5  ;;  %v3954_v5 = vsel %vm299_vm3, %v3949_v39, %v3953_v41  ;;  %v4503_v9 = vsel %vm404_vm0, %v5278_v53, 0 }
 0x1bb   : > { %v5349_v15 = vpack.c.bf16 %v2371_v45, %v2371_v45  ;;  %v2480_v18 = vsel %vm1352_vm6, %v2371_v45, 0.0  ;;  %v2523_v42 = vmul.f32 %v2371_v45, %v2371_v45  ;;  %v2354_v25 = vadd.f32 %v2289_v48, %v2177_v38  ;;  %v5840_v33 = vpop.f32.mrf.mxu1 }
 0x1bc   : > { %v2481_v55 = vadd.f32 %v2480_v18, %v2479_v31  ;;  %v2115_v37 = vpop.f32.mrf.mxu0 }
 0x1bd   : > { %5101 = vst.msk [vmem:[%s6808_s8 + $0x4c] sm:$0xf] %vm1333_vm5, %v5349_v15  ;;  %v2541_v48 = vsel %vm1352_vm6, %v2523_v42, 0.0  ;;  %v2372_v12 = vmul.f32 %v2354_v25, %v6814_v21  ;;  %v2178_v16 = vadd.f32 %v2115_v37, %v7097_v57  ;;  %v2300_v49 = vpop.f32.mrf.mxu1  ;;  %v3786_v57 = vrot.slane %v5229_v3, 1 }
 0x1be   : > { %v2542_v45 = vadd.f32 %v2541_v48, %v2540_v26  ;;  %v5799_v38 = vpop.f32.mrf.mxu0  ;;  %v3787_v25 = vrot.slane %v7222_v30, 1  ;;  %v3957_v37 = vor.u32 %v3955_v60, %v3953_v41  ;;  %v7274_v41 = vld [vmem:[%s6355_s26 + $0x20] sm:$0xff]  }
 0x1bf   : > { %v5350_v31 = vpack.c.bf16 %v2372_v12, %v2372_v12  ;;  %v2482_v28 = vsel %vm1352_vm6, %v2372_v12, 0.0  ;;  %v2524_v58 = vmul.f32 %v2372_v12, %v2372_v12  ;;  %v2355_v18 = vadd.f32 %v2292_v27, %v2178_v16  ;;  %v5841_v15 = vpop.f32.mrf.mxu1  ;;  %v5258_v38 = vld [vmem:[%s7868_s1 + $0x38] sm:$0xf] }
 0x1c0   : > { %v2483_v33 = vadd.f32 %v2482_v28, %v2481_v55  ;;  %v2120_v42 = vpop.f32.mrf.mxu0  ;;  %5977 = vmatmul.mubr.msk.bf16.gmra.mxu0 %vm376_vm2, %v6264_v47  ;;  %v3961_v27 = vrot.slane %v3959_v63, 1 }
 0x1c1   : > { %5102 = vst.msk [vmem:[%s6808_s8 + $0x50] sm:$0xf] %vm1333_vm5, %v5350_v31  ;;  %v2543_v39 = vsel %vm1352_vm6, %v2524_v58, 0.0  ;;  %v2373_v53 = vmul.f32 %v2355_v18, %v6843_v61  ;;  %v2179_v26 = vadd.f32 %v2120_v42, %v7109_v40  ;;  %v2305_v48 = vpop.f32.mrf.mxu1  ;;  %6059 = vmatmul.mubr.msk.bf16.vlgmr.msra.gmra.mxu1 %vm376_vm2, %v3954_v5  ;;  %6020 = vmatprep.mubr.msk.bf16.mxu0 %vm6295_vm1, %v6294_v1  ;;  %v3963_v42 = vshrl.u32 %v7231_v19, 16 }
 0x1c2   : > { %v2544_v55 = vadd.f32 %v2543_v39, %v2542_v45  ;;  %v5802_v47 = vpop.f32.mrf.mxu0  ;;  %6133 = vmatpush3.bf16.msra.mxu1 %v4503_v9  ;;  %6062 = vmatprep.mubr.msk.bf16.mxu1 %vm6295_vm1, %v6294_v1  ;;  %v3788_v45 = vsel %vm1527_vm4, %v3786_v57, %v3787_v25  ;;  %v3962_v58 = vsel %vm299_vm3, %v3957_v37, %v3961_v27  ;;  %v3967_v57 = vshll.u32 %v7274_v41, 16 }
 0x1c3   : > { %v5351_v3 = vpack.c.bf16 %v2373_v53, %v2373_v53  ;;  %v2484_v60 = vsel %vm1352_vm6, %v2373_v53, 0.0  ;;  %v2525_v40 = vmul.f32 %v2373_v53, %v2373_v53  ;;  %v2356_v12 = vadd.f32 %v2297_v22, %v2179_v26  ;;  %v5844_v16 = vpop.f32.mrf.mxu1 }
 0x1c4   : > { %v2485_v5 = vadd.f32 %v2484_v60, %v2483_v33  ;;  %v2123_v63 = vpop.f32.mrf.mxu0  ;;  %v4326_v33 = vsel %vm404_vm0, %v5258_v38, 0 }
 0x1c5   : > { %5103 = vst.msk [vmem:[%s6808_s8 + $0x54] sm:$0xf] %vm1333_vm5, %v5351_v3  ;;  %v2545_v9 = vsel %vm1352_vm6, %v2525_v40, 0.0  ;;  %v2374_v31 = vmul.f32 %v2356_v12, %v6860_v23  ;;  %v2180_v28 = vadd.f32 %v2123_v63, %v7126_v2  ;;  %v2308_v22 = vpop.f32.mrf.mxu1  ;;  %v3969_v63 = vrot.slane %v3967_v57, 1 }
 0x1c6   : > { %v2546_v18 = vadd.f32 %v2545_v9, %v2544_v55  ;;  %v5803_v15 = vpop.f32.mrf.mxu0 }
 0x1c7   : > { %v5352_v39 = vpack.c.bf16 %v2374_v31, %v2374_v31  ;;  %v2486_v53 = vsel %vm1352_vm6, %v2374_v31, 0.0  ;;  %v2526_v26 = vmul.f32 %v2374_v31, %v2374_v31  ;;  %v2357_v47 = vadd.f32 %v2300_v49, %v2180_v28  ;;  %v5845_v3 = vpop.f32.mrf.mxu1 }
 0x1c8   : > { %v2487_v60 = vadd.f32 %v2486_v53, %v2485_v5  ;;  %v2128_v2 = vpop.f32.mrf.mxu0  ;;  %6021 = vmatmul.mubr.msk.bf16.vlgmr.msra.gmra.mxu0 %vm376_vm2, %v3788_v45  ;;  %v3789_v49 = vrot.slane %v7231_v19, 1  ;;  %v3965_v5 = vor.u32 %v3963_v42, %v3961_v27  ;;  %v7306_v45 = vld [vmem:[%s6355_s26 + $0x28] sm:$0xff]  }
 0x1c9   : > { %5104 = vst.msk [vmem:[%s6808_s8 + $0x58] sm:$0xf] %vm1333_vm5, %v5352_v39  ;;  %v2547_v37 = vsel %vm1352_vm6, %v2526_v26, 0.0  ;;  %v2375_v55 = vmul.f32 %v2357_v47, %v6877_v44  ;;  %v2181_v40 = vadd.f32 %v2128_v2, %v7131_v20  ;;  %6095 = vmatpush3.bf16.msra.mxu0 %v4326_v33  ;;  %v2313_v12 = vpop.f32.mrf.mxu1  ;;  %6063 = vmatmul.mubr.msk.bf16.gmra.mxu1 %vm376_vm2, %v3962_v58  ;;  %v3971_v26 = vshrl.u32 %v7274_v41, 16 }
 0x1ca   : > { %v2548_v16 = vadd.f32 %v2547_v37, %v2546_v18  ;;  %v5806_v38 = vpop.f32.mrf.mxu0  ;;  %6024 = vmatprep.mubr.msk.bf16.mxu0 %vm6295_vm1, %v6294_v1  ;;  %6066 = vmatprep.mubr.msk.bf16.mxu1 %vm6295_vm1, %v6294_v1  ;;  %v3790_v42 = vsel %vm1527_vm4, %v3787_v25, %v3789_v49  ;;  %v3975_v47 = vshll.u32 %v7306_v45, 16 }
 0x1cb   : > { %v5353_v20 = vpack.c.bf16 %v2375_v55, %v2375_v55  ;;  %v2488_v9 = vsel %vm1352_vm6, %v2375_v55, 0.0  ;;  %v2527_v31 = vmul.f32 %v2375_v55, %v2375_v55  ;;  %v2358_v28 = vadd.f32 %v2305_v48, %v2181_v40  ;;  %v5848_v58 = vpop.f32.mrf.mxu1 }
 0x1cc   : > { %v2489_v15 = vadd.f32 %v2488_v9, %v2487_v60  ;;  %v2131_v19 = vpop.f32.mrf.mxu0  ;;  %v3970_v48 = vsel %vm299_vm3, %v3965_v5, %v3969_v63  ;;  %v3973_v9 = vor.u32 %v3971_v26, %v3969_v63 }
 0x1cd   : > { %5105 = vst.msk [vmem:[%s6808_s8 + $0x5c] sm:$0xf] %vm1333_vm5, %v5353_v20  ;;  %v2549_v18 = vsel %vm1352_vm6, %v2527_v31, 0.0  ;;  %v2376_v33 = vmul.f32 %v2358_v28, %v6892_v10  ;;  %v2182_v39 = vadd.f32 %v2131_v19, %v7141_v36  ;;  %v2316_v27 = vpop.f32.mrf.mxu1  ;;  %v3977_v31 = vrot.slane %v3975_v47, 1  ;;  %v7334_v28 = vld [vmem:[%s6355_s26 + $0x30] sm:$0xff]  }
 0x1ce   : > { %v2550_v57 = vadd.f32 %v2549_v18, %v2548_v16  ;;  %v5807_v53 = vpop.f32.mrf.mxu0 }
 0x1cf   : > { %v5354_v3 = vpack.c.bf16 %v2376_v33, %v2376_v33  ;;  %v2490_v60 = vsel %vm1352_vm6, %v2376_v33, 0.0  ;;  %v2528_v2 = vmul.f32 %v2376_v33, %v2376_v33  ;;  %v2359_v37 = vadd.f32 %v2308_v22, %v2182_v39  ;;  %v5849_v36 = vpop.f32.mrf.mxu1 }
 0x1d0   : > { %v2491_v55 = vadd.f32 %v2490_v60, %v2489_v15  ;;  %v2136_v40 = vpop.f32.mrf.mxu0  ;;  %6025 = vmatmul.mubr.msk.bf16.gmra.mxu0 %vm376_vm2, %v3790_v42  ;;  %v3791_v22 = vrot.slane %v7274_v41, 1  ;;  %v3978_v47 = vsel %vm299_vm3, %v3973_v9, %v3977_v31 }
 0x1d1   : > { %5106 = vst.msk [vmem:[%s6808_s8 + $0x60] sm:$0xf] %vm1333_vm5, %v5354_v3  ;;  %v2551_v30 = vsel %vm1352_vm6, %v2528_v2, 0.0  ;;  %v2377_v25 = vmul.f32 %v2359_v37, %v6908_v32  ;;  %v2183_v16 = vadd.f32 %v2136_v40, %v7145_v46  ;;  %v2321_v38 = vpop.f32.mrf.mxu1  ;;  %6067 = vmatmul.mubr.msk.bf16.gmra.mxu1 %vm376_vm2, %v3970_v48  ;;  %6028 = vmatprep.mubr.msk.bf16.mxu0 %vm6295_vm1, %v6294_v1  ;;  %v3983_v3 = vshll.u32 %v7334_v28, 16 }
 0x1d2   : > { %v2552_v5 = vadd.f32 %v2551_v30, %v2550_v57  ;;  %v5810_v20 = vpop.f32.mrf.mxu0  ;;  %6070 = vmatprep.mubr.msk.bf16.mxu1 %vm6295_vm1, %v6294_v1  ;;  %v3792_v53 = vsel %vm1527_vm4, %v3789_v49, %v3791_v22 }
 0x1d3   : > { %v5355_v58 = vpack.c.bf16 %v2377_v25, %v2377_v25  ;;  %v2492_v46 = vsel %vm1352_vm6, %v2377_v25, 0.0  ;;  %v2529_v15 = vmul.f32 %v2377_v25, %v2377_v25  ;;  %v2360_v19 = vadd.f32 %v2313_v12, %v2183_v16  ;;  %v5852_v18 = vpop.f32.mrf.mxu1 }
 0x1d4   : > { %v2493_v33 = vadd.f32 %v2492_v46, %v2491_v55  ;;  %v2139_v39 = vpop.f32.mrf.mxu0  ;;  %v3979_v12 = vshrl.u32 %v7306_v45, 16  ;;  %v7360_v46 = vld [vmem:[%s6355_s26 + $0x38] sm:$0xff]  }
 0x1d5   : > { %5107 = vst.msk [vmem:[%s6808_s8 + $0x64] sm:$0xf] %vm1333_vm5, %v5355_v58  ;;  %v2553_v41 = vsel %vm1352_vm6, %v2529_v15, 0.0  ;;  %v2378_v42 = vmul.f32 %v2360_v19, %v6924_v54  ;;  %v2184_v57 = vadd.f32 %v2139_v39, %v7154_v50  ;;  %v2324_v63 = vpop.f32.mrf.mxu1  ;;  %v3985_v58 = vrot.slane %v3983_v3, 1 }
 0x1d6   : > { %v2554_v48 = vadd.f32 %v2553_v41, %v2552_v5  ;;  %v5811_v26 = vpop.f32.mrf.mxu0  ;;  %v3981_v9 = vor.u32 %v3979_v12, %v3977_v31  ;;  %v3991_v12 = vshll.u32 %v7360_v46, 16 }
 0x1d7   : > { %v5356_v60 = vpack.c.bf16 %v2378_v42, %v2378_v42  ;;  %v2494_v2 = vsel %vm1352_vm6, %v2378_v42, 0.0  ;;  %v2530_v37 = vmul.f32 %v2378_v42, %v2378_v42  ;;  %v2361_v36 = vadd.f32 %v2316_v27, %v2184_v57  ;;  %v5853_v55 = vpop.f32.mrf.mxu1 }
 0x1d8   : > { %v2495_v40 = vadd.f32 %v2494_v2, %v2493_v33  ;;  %v2144_v50 = vpop.f32.mrf.mxu0  ;;  %6029 = vmatmul.mubr.msk.bf16.gmra.mxu0 %vm376_vm2, %v3792_v53  ;;  %v3793_v27 = vrot.slane %v7306_v45, 1 }
 0x1d9   : > { %5108 = vst.msk [vmem:[%s6808_s8 + $0x68] sm:$0xf] %vm1333_vm5, %v5356_v60  ;;  %v2555_v49 = vsel %vm1352_vm6, %v2530_v37, 0.0  ;;  %v2379_v30 = vmul.f32 %v2361_v36, %v6937_v59  ;;  %v2185_v25 = vadd.f32 %v2144_v50, %v7158_v4  ;;  %v2329_v16 = vpop.f32.mrf.mxu1  ;;  %6071 = vmatmul.mubr.msk.bf16.gmra.mxu1 %vm376_vm2, %v3978_v47  ;;  %6032 = vmatprep.mubr.msk.bf16.mxu0 %vm6295_vm1, %v6294_v1 }
 0x1da   : > { %v2556_v5 = vadd.f32 %v2555_v49, %v2554_v48  ;;  %v5814_v20 = vpop.f32.mrf.mxu0  ;;  %6074 = vmatprep.mubr.msk.bf16.mxu1 %vm6295_vm1, %v6294_v1  ;;  %v3794_v53 = vsel %vm1527_vm4, %v3791_v22, %v3793_v27  ;;  %v3986_v47 = vsel %vm299_vm3, %v3981_v9, %v3985_v58  ;;  %v7386_v9 = vld [vmem:[%s6355_s26 + $0x40] sm:$0xff]  }
 0x1db   : > { %v5357_v15 = vpack.c.bf16 %v2379_v30, %v2379_v30  ;;  %v2496_v4 = vsel %vm1352_vm6, %v2379_v30, 0.0  ;;  %v2531_v19 = vmul.f32 %v2379_v30, %v2379_v30  ;;  %v2362_v18 = vadd.f32 %v2321_v38, %v2185_v25  ;;  %v5856_v33 = vpop.f32.mrf.mxu1 }
 0x1dc   : > { %v2497_v39 = vadd.f32 %v2496_v4, %v2495_v40  ;;  %v2147_v41 = vpop.f32.mrf.mxu0  ;;  %v3987_v38 = vshrl.u32 %v7334_v28, 16  ;;  %v3993_v20 = vrot.slane %v3991_v12, 1 }
 0x1dd   : > { %5109 = vst.msk [vmem:[%s6808_s8 + $0x6c] sm:$0xf] %vm1333_vm5, %v5357_v15  ;;  %v2557_v45 = vsel %vm1352_vm6, %v2531_v19, 0.0  ;;  %v2380_v42 = vmul.f32 %v2362_v18, %v6953_v7  ;;  %v2186_v57 = vadd.f32 %v2147_v41, %v7167_v8  ;;  %v2332_v31 = vpop.f32.mrf.mxu1 }
 0x1de   : > { %v2558_v48 = vadd.f32 %v2557_v45, %v2556_v5  ;;  %v5815_v26 = vpop.f32.mrf.mxu0  ;;  %v3989_v5 = vor.u32 %v3987_v38, %v3985_v58 }
 0x1df   : > { %v5358_v3 = vpack.c.bf16 %v2380_v42, %v2380_v42  ;;  %v2498_v60 = vsel %vm1352_vm6, %v2380_v42, 0.0  ;;  %v2532_v2 = vmul.f32 %v2380_v42, %v2380_v42  ;;  %v2363_v37 = vadd.f32 %v2324_v63, %v2186_v57  ;;  %v5857_v36 = vpop.f32.mrf.mxu1 }
 0x1e0   : > { %v2499_v55 = vadd.f32 %v2498_v60, %v2497_v39  ;;  %v2152_v8 = vpop.f32.mrf.mxu0  ;;  %6033 = vmatmul.mubr.msk.bf16.gmra.mxu0 %vm376_vm2, %v3794_v53  ;;  %v3795_v63 = vrot.slane %v7334_v28, 1  ;;  %v3999_v26 = vshll.u32 %v7386_v9, 16 }
 0x1e1   : > { %5110 = vst.msk [vmem:[%s6808_s8 + $0x70] sm:$0xf] %vm1333_vm5, %v5358_v3  ;;  %v2559_v22 = vsel %vm1352_vm6, %v2532_v2, 0.0  ;;  %v2381_v40 = vmul.f32 %v2363_v37, %v6966_v62  ;;  %v2187_v50 = vadd.f32 %v2152_v8, %v7171_v35  ;;  %v2337_v49 = vpop.f32.mrf.mxu1  ;;  %6075 = vmatmul.mubr.msk.bf16.gmra.mxu1 %vm376_vm2, %v3986_v47  ;;  %6036 = vmatprep.mubr.msk.bf16.mxu0 %vm6295_vm1, %v6294_v1 }
 0x1e2   : > { %v2560_v30 = vadd.f32 %v2559_v22, %v2558_v48  ;;  %v5818_v25 = vpop.f32.mrf.mxu0  ;;  %6078 = vmatprep.mubr.msk.bf16.mxu1 %vm6295_vm1, %v6294_v1  ;;  %v3796_v42 = vsel %vm1527_vm4, %v3793_v27, %v3795_v63  ;;  %v3994_v48 = vsel %vm299_vm3, %v3989_v5, %v3993_v20 }
 0x1e3   : > { %v5359_v15 = vpack.c.bf16 %v2381_v40, %v2381_v40  ;;  %v2500_v35 = vsel %vm1352_vm6, %v2381_v40, 0.0  ;;  %v2533_v4 = vmul.f32 %v2381_v40, %v2381_v40  ;;  %v2364_v19 = vadd.f32 %v2329_v16, %v2187_v50  ;;  %v5860_v18 = vpop.f32.mrf.mxu1 }
 0x1e4   : > { %v2501_v33 = vadd.f32 %v2500_v35, %v2499_v55  ;;  %v2155_v39 = vpop.f32.mrf.mxu0  ;;  %v3995_v16 = vshrl.u32 %v7360_v46, 16  ;;  %v4001_v50 = vrot.slane %v3999_v26, 1 }
 0x1e5   : > { %5111 = vst.msk [vmem:[%s6808_s8 + $0x74] sm:$0xf] %vm1333_vm5, %v5359_v15  ;;  %v2561_v28 = vsel %vm1352_vm6, %v2533_v4, 0.0  ;;  %v2382_v41 = vmul.f32 %v2364_v19, %v6982_v24  ;;  %v2188_v45 = vadd.f32 %v2155_v39, %v7180_v34  ;;  %v2340_v58 = vpop.f32.mrf.mxu1 }
 0x1e6   : > { %v2562_v57 = vadd.f32 %v2561_v28, %v2560_v30  ;;  %v5819_v53 = vpop.f32.mrf.mxu0  ;;  %v3997_v40 = vor.u32 %v3995_v16, %v3993_v20  ;;  %v7412_v30 = vld [vmem:[%s6355_s26 + $0x48] sm:$0xff]  }
 0x1e7   : > { %v5360_v47 = vpack.c.bf16 %v2382_v41, %v2382_v41  ;;  %v2502_v38 = vsel %vm1352_vm6, %v2382_v41, 0.0  ;;  %v2534_v12 = vmul.f32 %v2382_v41, %v2382_v41  ;;  %v2365_v3 = vadd.f32 %v2332_v31, %v2188_v45  ;;  %v5861_v60 = vpop.f32.mrf.mxu1 }
 0x1e8   : > { %v2503_v2 = vadd.f32 %v2502_v38, %v2501_v33  ;;  %v2160_v34 = vpop.f32.mrf.mxu0  ;;  %6037 = vmatmul.mubr.msk.bf16.gmra.mxu0 %vm376_vm2, %v3796_v42  ;;  %v3797_v31 = vrot.slane %v7360_v46, 1  ;;  %v4002_v45 = vsel %vm299_vm3, %v3997_v40, %v4001_v50  ;;  %v4007_v42 = vshll.u32 %v7412_v30, 16 }
 0x1e9   : > { %5112 = vst.msk [vmem:[%s6808_s8 + $0x78] sm:$0xf] %vm1333_vm5, %v5360_v47  ;;  %v2563_v27 = vsel %vm1352_vm6, %v2534_v12, 0.0  ;;  %v2383_v37 = vmul.f32 %v2365_v3, %v6995_v43  ;;  %v2189_v36 = vadd.f32 %v2160_v34, %v7184_v13  ;;  %v2345_v55 = vpop.f32.mrf.mxu1  ;;  %6079 = vmatmul.mubr.msk.bf16.gmra.mxu1 %vm376_vm2, %v3994_v48  ;;  %6040 = vmatprep.mubr.msk.bf16.mxu0 %vm6295_vm1, %v6294_v1 }
 0x1ea   : > { %v2564_v8 = vadd.f32 %v2563_v27, %v2562_v57  ;;  %v5822_v22 = vpop.f32.mrf.mxu0  ;;  %6082 = vmatprep.mubr.msk.bf16.mxu1 %vm6295_vm1, %v6294_v1  ;;  %v3798_v39 = vsel %vm1527_vm4, %v3795_v63, %v3797_v31  ;;  %v4009_v27 = vrot.slane %v4007_v42, 1 }
 0x1eb   : > { %v5361_v25 = vpack.c.bf16 %v2383_v37, %v2383_v37  ;;  %v2504_v13 = vsel %vm1352_vm6, %v2383_v37, 0.0  ;;  %v2535_v5 = vmul.f32 %v2383_v37, %v2383_v37  ;;  %v2366_v15 = vadd.f32 %v2337_v49, %v2189_v36  ;;  %v5864_v35 = vpop.f32.mrf.mxu1  ;;  %v7438_v37 = vld [vmem:[%s6355_s26 + $0x50] ss:$0 sps:$4 sm:$0x11]  }
 0x1ec   : > { %v2505_v4 = vadd.f32 %v2504_v13, %v2503_v2  ;;  %v2163_v19 = vpop.f32.mrf.mxu0  ;;  %v4003_v49 = vshrl.u32 %v7386_v9, 16 }
 0x1ed   : > { %5113 = vst.msk [vmem:[%s6808_s8 + $0x7c] sm:$0xf] %vm1333_vm5, %v5361_v25  ;;  %v2565_v46 = vsel %vm1352_vm6, %v2535_v5, 0.0  ;;  %v2384_v18 = vmul.f32 %v2366_v15, %v7011_v6  ;;  %v2190_v33 = vadd.f32 %v2163_v19, %v7193_v14  ;;  %v2348_v20 = vpop.f32.mrf.mxu1 }
 0x1ee   : > { %v2566_v28 = vadd.f32 %v2565_v46, %v2564_v8  ;;  %v5823_v41 = vpop.f32.mrf.mxu0  ;;  %v4005_v34 = vor.u32 %v4003_v49, %v4001_v50 }
 0x1ef   : > { %v5362_v57 = vpack.c.bf16 %v2384_v18, %v2384_v18  ;;  %v2506_v53 = vsel %vm1352_vm6, %v2384_v18, 0.0  ;;  %v2536_v48 = vmul.f32 %v2384_v18, %v2384_v18  ;;  %v2367_v16 = vadd.f32 %v2340_v58, %v2190_v33  ;;  %v5865_v26 = vpop.f32.mrf.mxu1 }
 0x1f0   : > { %v2507_v47 = vadd.f32 %v2506_v53, %v2505_v4  ;;  %v2168_v14 = vpop.f32.mrf.mxu0  ;;  %6041 = vmatmul.mubr.msk.bf16.gmra.mxu0 %vm376_vm2, %v3798_v39  ;;  %v3799_v58 = vrot.slane %v7386_v9, 1  ;;  %v4010_v46 = vsel %vm299_vm3, %v4005_v34, %v4009_v27  ;;  %v4015_v18 = vshll.u32 %v7438_v37, 16 }
 0x1f1   : > { %5114 = vst.msk [vmem:[%s6808_s8 + $0x80] sm:$0xf] %vm1333_vm5, %v5362_v57  ;;  %v2567_v63 = vsel %vm1352_vm6, %v2536_v48, 0.0  ;;  %v2385_v38 = vmul.f32 %v2367_v16, %v7024_v29  ;;  %v2191_v12 = vadd.f32 %v2168_v14, %v7197_v56  ;;  %v2918_v3 = vpop.f32.mrf.mxu1  ;;  %6083 = vmatmul.mubr.msk.bf16.gmra.mxu1 %vm376_vm2, %v4002_v45  ;;  %6044 = vmatprep.mubr.msk.bf16.mxu0 %vm6295_vm1, %v6294_v1  ;;  %v4154_v14 = vld [vmem:[%s6355_s26 + $0x10] sm:$0xf] }
 0x1f2   : > { %v2568_v60 = vadd.f32 %v2567_v63, %v2566_v28  ;;  %v5826_v2 = vpop.f32.mrf.mxu0  ;;  %6086 = vmatprep.mubr.msk.bf16.mxu1 %vm6295_vm1, %v6294_v1  ;;  %v3800_v35 = vsel %vm1527_vm4, %v3797_v31, %v3799_v58  ;;  %v4155_v63 = vld [vmem:[%s6355_s26 + $0x14] sm:$0xf] }
 0x1f3   : > { %v5363_v36 = vpack.c.bf16 %v2385_v38, %v2385_v38  ;;  %v2508_v56 = vsel %vm1352_vm6, %v2385_v38, 0.0  ;;  %v2537_v8 = vmul.f32 %v2385_v38, %v2385_v38  ;;  %v2368_v22 = vadd.f32 %v2345_v55, %v2191_v12  ;;  %v5908_v40 = vpop.f32.mrf.mxu1  ;;  %v4451_v2 = vld [vmem:[%s6355_s26 + $0x10] sm:$0xe] }
 0x1f4   : > { %v2509_v25 = vadd.f32 %v2508_v56, %v2507_v47  ;;  %v2171_v13 = vpop.f32.mrf.mxu0  ;;  %v4011_v55 = vshrl.u32 %v7412_v30, 16  ;;  %v4017_v47 = vrot.slane %v4015_v18, 1 }
 0x1f5   : > { %5115 = vst.msk [vmem:[%s6808_s8 + $0x84] sm:$0xf] %vm1333_vm5, %v5363_v36  ;;  %v2569_v9 = vsel %vm1352_vm6, %v2537_v8, 0.0  ;;  %v2386_v5 = vmul.f32 %v2368_v22, %v7040_v52  ;;  %v2192_v15 = vadd.f32 %v2171_v13, %v7210_v0  ;;  %v2921_v50 = vpop.f32.mrf.mxu1  ;;  %v5259_v22 = vcombine.low %v4154_v14, %v4155_v63 }
 0x1f6   : > { %v2570_v4 = vadd.f32 %v2569_v9, %v2568_v60  ;;  %v5827_v19 = vpop.f32.mrf.mxu0  ;;  %v4013_v26 = vor.u32 %v4011_v55, %v4009_v27 }
 0x1f7   : > { %v5364_v33 = vpack.c.bf16 %v2386_v5, %v2386_v5  ;;  %v2510_v39 = vsel %vm1352_vm6, %v2386_v5, 0.0  ;;  %v2538_v28 = vmul.f32 %v2386_v5, %v2386_v5  ;;  %v2369_v41 = vadd.f32 %v2348_v20, %v2192_v15  ;;  %v5909_v45 = vpop.f32.mrf.mxu1  ;;  %v7476_v5 = vld [vmem:[%s6355_s26 + $0x18] sm:$0xff]  }
 0x1f8   : > { %v2511_v49 = vadd.f32 %v2510_v39, %v2509_v25  ;;  %v2792_v0 = vpop.f32.mrf.mxu0  ;;  %6045 = vmatmul.mubr.msk.bf16.gmra.mxu0 %vm376_vm2, %v3800_v35  ;;  %v3801_v20 = vrot.slane %v7412_v30, 1  ;;  %v4018_v9 = vsel %vm299_vm3, %v4013_v26, %v4017_v47  ;;  %v5279_v15 = vcombine.low %v4451_v2, %v4155_v63 }
 0x1f9   : > { %5116 = vst.msk [vmem:[%s6808_s8 + $0x88] sm:$0xf] %vm1333_vm5, %v5364_v33  ;;  %v2571_v31 = vsel %vm1352_vm6, %v2538_v28, 0.0  ;;  %v2387_v42 = vmul.f32 %v2369_v41, %v7054_v17  ;;  %v7456_v57 = vadd.f32 %v2918_v3, %v2792_v0  ;;  %v2926_v53 = vpop.f32.mrf.mxu1  ;;  %6087 = vmatmul.mubr.msk.bf16.gmra.mxu1 %vm376_vm2, %v4010_v46  ;;  %6048 = vmatprep.mubr.msk.bf16.mxu0 %vm6295_vm1, %v6294_v1  ;;  %v4225_v18 = vshll.u32 %v5259_v22, 16 }
 0x1fa   : > { %v2572_v48 = vadd.f32 %v2571_v31, %v2570_v4  ;;  %v5870_v16 = vpop.f32.mrf.mxu0  ;;  %6090 = vmatprep.mubr.msk.bf16.mxu1 %vm6295_vm1, %v6294_v1  ;;  %v3802_v27 = vsel %vm1527_vm4, %v3799_v58, %v3801_v20  ;;  %v4456_v41 = vrot.slane %v5279_v15, 1  ;;  %v4457_v45 = vrot.slane %v7476_v5, 1 }
 0x1fb   : > { %v5365_v38 = vpack.c.bf16 %v2387_v42, %v2387_v42  ;;  %v2512_v12 = vsel %vm1352_vm6, %v2387_v42, 0.0  ;;  %v2539_v3 = vmul.f32 %v2387_v42, %v2387_v42  ;;  %v5912_v60 = vpop.f32.mrf.mxu1  ;;  %v4223_v16 = vshrl.u32 %v5259_v22, 16 }
 0x1fc   : > { %v2513_v34 = vadd.f32 %v2512_v12, %v2511_v49  ;;  %v2795_v36 = vpop.f32.mrf.mxu0  ;;  %v4227_v26 = vrot.slane %v4225_v18, 1  ;;  %v4230_v47 = vshll.u32 %v7476_v5, 16  ;;  %v4458_v12 = vsel %vm1527_vm4, %v4456_v41, %v4457_v45  ;;  %v6279_v18 = vld [vmem:[%s6355_s26 + $0x28] sm:$0xff]  }
 0x1fd   : > { %5117 = vst.msk [vmem:[%s6808_s8 + $0x8c] sm:$0xf] %vm1333_vm5, %v5365_v38  ;;  %v2573_v30 = vsel %vm1352_vm6, %v2539_v3, 0.0  ;;  %v7471_v56 = vadd.f32 %v2921_v50, %v2795_v36  ;;  %v2929_v8 = vpop.f32.mrf.mxu1  ;;  %v3803_v50 = vrot.slane %v7438_v37, 1  ;;  %v6278_v3 = vld [vmem:[%s6355_s26 + $0x20] sm:$0xff]  }
 0x1fe   : > { %v2514_v40 = vrot.slane %v2513_v34, 4  ;;  %v2574_v25 = vadd.f32 %v2573_v30, %v2572_v48  ;;  %v5871_v13 = vpop.f32.mrf.mxu0 }
 0x1ff   : > { %v5913_v35 = vpop.f32.mrf.mxu1  ;;  %v3804_v42 = vsel %vm1527_vm4, %v3801_v20, %v3803_v50 }
 0x200   : > { %v2515_v4 = vadd.f32 %v2514_v40, %v2513_v34  ;;  %v2575_v19 = vrot.slane %v2574_v25, 4  ;;  %v2800_v46 = vpop.f32.mrf.mxu0  ;;  %6049 = vmatmul.mubr.msk.bf16.gmra.mxu0 %vm376_vm2, %v3802_v27  ;;  %v4232_v27 = vrot.slane %v4230_v47, 1  ;;  %v4246_v47 = vshll.u32 %v6279_v18, 16 }
 0x201   : > { %v7480_v55 = vadd.f32 %v2926_v53, %v2800_v46  ;;  %v2934_v58 = vpop.f32.mrf.mxu1  ;;  %6091 = vmatmul.mubr.msk.bf16.gmra.mxu1 %vm376_vm2, %v4018_v9  ;;  %6052 = vmatprep.mubr.msk.bf16.mxu0 %vm6295_vm1, %v6294_v1  ;;  %v4238_v46 = vshll.u32 %v6278_v3, 16 }
 0x202   : > { %v2516_v33 = vrot.slane %v2515_v4, 2  ;;  %v2576_v39 = vadd.f32 %v2575_v19, %v2574_v25  ;;  %v5874_v28 = vpop.f32.mrf.mxu0  ;;  %6134 = vmatprep.mubr.msk.bf16.mxu1 %vm6295_vm1, %v6294_v1  ;;  %v4459_v25 = vrot.slane %v6278_v3, 1  ;;  %v4234_v19 = vshrl.u32 %v7476_v5, 16 }
 0x203   : > { %v5916_v37 = vpop.f32.mrf.mxu1  ;;  %v4240_v5 = vrot.slane %v4238_v46, 1  ;;  %v6281_v46 = vld [vmem:[%s6355_s26 + $0x38] sm:$0xff]  }
 0x204   : > { %v2517_v49 = vadd.f32 %v2516_v33, %v2515_v4  ;;  %v2577_v0 = vrot.slane %v2576_v39, 2  ;;  %v2803_v31 = vpop.f32.mrf.mxu0  ;;  %v4236_v37 = vor.u32 %v4234_v19, %v4232_v27 }
 0x205   : > { %v7489_v53 = vadd.f32 %v2929_v8, %v2803_v31  ;;  %v2937_v48 = vpop.f32.mrf.mxu1  ;;  %v4228_v8 = vor.u32 %v4227_v26, %v4223_v16  ;;  %v4242_v26 = vshrl.u32 %v6278_v3, 16  ;;  %v4248_v3 = vrot.slane %v4246_v47, 1 }
 0x206   : > { %v2518_v14 = vrot.slane %v2517_v49, 1  ;;  %v2578_v63 = vadd.f32 %v2577_v0, %v2576_v39  ;;  %v5875_v38 = vpop.f32.mrf.mxu0  ;;  %v4241_v16 = vsel %vm299_vm3, %v4236_v37, %v4240_v5 }
 0x207   : > { %v5917_v60 = vpop.f32.mrf.mxu1  ;;  %v4233_v4 = vsel %vm299_vm3, %v4228_v8, %v4232_v27  ;;  %v6280_v38 = vld [vmem:[%s6355_s26 + $0x30] sm:$0xff]  }
 0x208   : > { %v2519_v2 = vadd.f32 %v2518_v14, %v2517_v49  ;;  %v2579_v34 = vrot.slane %v2578_v63, 1  ;;  %v2808_v36 = vpop.f32.mrf.mxu0  ;;  %6053 = vmatmul.mubr.msk.bf16.gmra.mxu0 %vm376_vm2, %v3804_v42  ;;  %v4463_v8 = vrot.slane %v6280_v38, 1 }
 0x209   : > { %v7495_v20 = vadd.f32 %v2934_v58, %v2808_v36  ;;  %v2942_v30 = vpop.f32.mrf.mxu1  ;;  %6135 = vmatmul.mubr.msk.bf16.vlgmr.msra.gmra.mxu1 %vm376_vm2, %v4458_v12  ;;  %6096 = vmatprep.mubr.msk.bf16.mxu0 %vm6295_vm1, %v6294_v1  ;;  %v4460_v58 = vsel %vm1527_vm4, %v4457_v45, %v4459_v25  ;;  %v4461_v45 = vrot.slane %v6279_v18, 1  ;;  %v4244_v36 = vor.u32 %v4242_v26, %v4240_v5 }
 0x20a   : > { %5118 = vst.msk [vmem:[%s7105_s19 + $0x2] sm:$0x1] %vm1394_vm7, %v2519_v2  ;;  %v2580_v22 = vadd.f32 %v2579_v34, %v2578_v63  ;;  %v5878_v40 = vpop.f32.mrf.mxu0  ;;  %6138 = vmatprep.mubr.msk.bf16.mxu1 %vm6295_vm1, %v6294_v1  ;;  %v4465_v5 = vrot.slane %v6281_v46, 1  ;;  %v4262_v26 = vshll.u32 %v6281_v46, 16 }
 0x20b   : > { %v5920_v13 = vpop.f32.mrf.mxu1  ;;  %v4462_v63 = vsel %vm1527_vm4, %v4459_v25, %v4461_v45  ;;  %v4464_v19 = vsel %vm1527_vm4, %v4461_v45, %v4463_v8 }
 0x20c   : > { %5119 = vst.msk [vmem:[%s7105_s19 + $0x3] sm:$0x1] %vm1394_vm7, %v2580_v22  ;;  %v2811_v9 = vpop.f32.mrf.mxu0  ;;  %v4249_v13 = vsel %vm299_vm3, %v4244_v36, %v4248_v3 }
 0x20d   : > { %v7506_v15 = vadd.f32 %v2937_v48, %v2811_v9  ;;  %v2945_v35 = vpop.f32.mrf.mxu1  ;;  %v4250_v9 = vshrl.u32 %v6279_v18, 16 }
 0x20e   : > { %v5879_v50 = vpop.f32.mrf.mxu0 }
 0x20f   : > { %v5921_v33 = vpop.f32.mrf.mxu1 }
 0x210   : > { %v2816_v39 = vpop.f32.mrf.mxu0  ;;  %6097 = vmatmul.mubr.msk.bf16.vlgmr.msra.gmra.mxu0 %vm376_vm2, %v4233_v4 }
 0x211   : > { %v7513_v28 = vadd.f32 %v2942_v30, %v2816_v39  ;;  %v2950_v41 = vpop.f32.mrf.mxu1  ;;  %6139 = vmatmul.mubr.msk.bf16.gmra.mxu1 %vm376_vm2, %v4460_v58  ;;  %6100 = vmatprep.mubr.msk.bf16.mxu0 %vm6295_vm1, %v6294_v1 }
 0x212   : > { %v5882_v49 = vpop.f32.mrf.mxu0  ;;  %6142 = vmatprep.mubr.msk.bf16.mxu1 %vm6295_vm1, %v6294_v1 }
 0x213   : > { %v5924_v0 = vpop.f32.mrf.mxu1 }
 0x214   : > { %v2819_v31 = vpop.f32.mrf.mxu0 }
 0x215   : > { %v7520_v42 = vadd.f32 %v2945_v35, %v2819_v31  ;;  %v2953_v48 = vpop.f32.mrf.mxu1  ;;  %v4254_v35 = vshll.u32 %v6280_v38, 16 }
 0x216   : > { %v5883_v14 = vpop.f32.mrf.mxu0 }
 0x217   : > { %v5925_v12 = vpop.f32.mrf.mxu1  ;;  %v4256_v18 = vrot.slane %v4254_v35, 1  ;;  %v4466_v14 = vsel %vm1527_vm4, %v4463_v8, %v4465_v5  ;;  %v4266_v35 = vshrl.u32 %v6281_v46, 16 }
 0x218   : > { %v2824_v60 = vpop.f32.mrf.mxu0  ;;  %6101 = vmatmul.mubr.msk.bf16.gmra.mxu0 %vm376_vm2, %v4241_v16  ;;  %v4258_v16 = vshrl.u32 %v6280_v38, 16  ;;  %v4264_v38 = vrot.slane %v4262_v26, 1 }
 0x219   : > { %v7526_v2 = vadd.f32 %v2950_v41, %v2824_v60  ;;  %v2958_v34 = vpop.f32.mrf.mxu1  ;;  %6143 = vmatmul.mubr.msk.bf16.gmra.mxu1 %vm376_vm2, %v4462_v63  ;;  %6104 = vmatprep.mubr.msk.bf16.mxu0 %vm6295_vm1, %v6294_v1  ;;  %v4252_v41 = vor.u32 %v4250_v9, %v4248_v3  ;;  %v6282_v63 = vld [vmem:[%s6355_s26 + $0x40] sm:$0xff]  }
 0x21a   : > { %v5886_v30 = vpop.f32.mrf.mxu0  ;;  %6146 = vmatprep.mubr.msk.bf16.mxu1 %vm6295_vm1, %v6294_v1  ;;  %v4260_v3 = vor.u32 %v4258_v16, %v4256_v18  ;;  %v4467_v8 = vrot.slane %v6282_v63, 1 }
 0x21b   : > { %v5928_v27 = vpop.f32.mrf.mxu1 }
 0x21c   : > { %v2827_v22 = vpop.f32.mrf.mxu0  ;;  %v4265_v9 = vsel %vm299_vm3, %v4260_v3, %v4264_v38  ;;  %v6284_v3 = vld [vmem:[%s6355_s26 + $0x50] sm:$0xff]  }
 0x21d   : > { %v7533_v40 = vadd.f32 %v2953_v48, %v2827_v22  ;;  %v2961_v25 = vpop.f32.mrf.mxu1  ;;  %v4257_v48 = vsel %vm299_vm3, %v4252_v41, %v4256_v18 }
 0x21e   : > { %v5887_v4 = vpop.f32.mrf.mxu0 }
 0x21f   : > { %v5929_v50 = vpop.f32.mrf.mxu1  ;;  %v4270_v4 = vshll.u32 %v6282_v63, 16 }
 0x220   : > { %v2832_v58 = vpop.f32.mrf.mxu0  ;;  %6105 = vmatmul.mubr.msk.bf16.gmra.mxu0 %vm376_vm2, %v4249_v13  ;;  %v4468_v50 = vsel %vm1527_vm4, %v4465_v5, %v4467_v8 }
 0x221   : > { %v7539_v33 = vadd.f32 %v2958_v34, %v2832_v58  ;;  %v2966_v39 = vpop.f32.mrf.mxu1  ;;  %6147 = vmatmul.mubr.msk.bf16.gmra.mxu1 %vm376_vm2, %v4464_v19  ;;  %6108 = vmatprep.mubr.msk.bf16.mxu0 %vm6295_vm1, %v6294_v1  ;;  %v6283_v58 = vld [vmem:[%s6355_s26 + $0x48] sm:$0xff]   ;;  %v4272_v46 = vrot.slane %v4270_v4, 1 }
 0x222   : > { %v5890_v37 = vpop.f32.mrf.mxu0  ;;  %6150 = vmatprep.mubr.msk.bf16.mxu1 %vm6295_vm1, %v6294_v1  ;;  %v4469_v5 = vrot.slane %v6283_v58, 1 }
 0x223   : > { %v5932_v49 = vpop.f32.mrf.mxu1 }
 0x224   : > { %v2835_v45 = vpop.f32.mrf.mxu0  ;;  %v4268_v49 = vor.u32 %v4266_v35, %v4264_v38 }
 0x225   : > { %v7546_v0 = vadd.f32 %v2961_v25, %v2835_v45  ;;  %v2969_v31 = vpop.f32.mrf.mxu1 }
 0x226   : > { %v5891_v47 = vpop.f32.mrf.mxu0 }
 0x227   : > { %v5933_v12 = vpop.f32.mrf.mxu1  ;;  %v4273_v47 = vsel %vm299_vm3, %v4268_v49, %v4272_v46 }
 0x228   : > { %v2840_v60 = vpop.f32.mrf.mxu0  ;;  %6109 = vmatmul.mubr.msk.bf16.gmra.mxu0 %vm376_vm2, %v4257_v48  ;;  %v4278_v12 = vshll.u32 %v6283_v58, 16 }
 0x229   : > { %v7552_v34 = vadd.f32 %v2966_v39, %v2840_v60  ;;  %v2974_v36 = vpop.f32.mrf.mxu1  ;;  %6151 = vmatmul.mubr.msk.bf16.gmra.mxu1 %vm376_vm2, %v4466_v14  ;;  %6112 = vmatprep.mubr.msk.bf16.mxu0 %vm6295_vm1, %v6294_v1  ;;  %v4274_v14 = vshrl.u32 %v6282_v63, 16 }
 0x22a   : > { %v5894_v30 = vpop.f32.mrf.mxu0  ;;  %6154 = vmatprep.mubr.msk.bf16.mxu1 %vm6295_vm1, %v6294_v1  ;;  %v4280_v63 = vrot.slane %v4278_v12, 1 }
 0x22b   : > { %v5936_v27 = vpop.f32.mrf.mxu1 }
 0x22c   : > { %v2843_v22 = vpop.f32.mrf.mxu0 }
 0x22d   : > { %v7559_v25 = vadd.f32 %v2969_v31, %v2843_v22  ;;  %v2977_v13 = vpop.f32.mrf.mxu1 }
 0x22e   : > { %v5895_v19 = vpop.f32.mrf.mxu0 }
 0x22f   : > { %v5937_v39 = vpop.f32.mrf.mxu1 }
 0x230   : > { %v2848_v41 = vpop.f32.mrf.mxu0  ;;  %6113 = vmatmul.mubr.msk.bf16.gmra.mxu0 %vm376_vm2, %v4265_v9 }
 0x231   : > { %v7565_v18 = vadd.f32 %v2974_v36, %v2848_v41  ;;  %v2982_v37 = vpop.f32.mrf.mxu1  ;;  %6155 = vmatmul.mubr.msk.bf16.gmra.mxu1 %vm376_vm2, %v4468_v50  ;;  %6116 = vmatprep.mubr.msk.bf16.mxu0 %vm6295_vm1, %v6294_v1  ;;  %v4470_v36 = vsel %vm1527_vm4, %v4467_v8, %v4469_v5  ;;  %v4471_v8 = vrot.slane %v6284_v3, 1  ;;  %v4282_v41 = vshrl.u32 %v6283_v58, 16 }
 0x232   : > { %v5898_v45 = vpop.f32.mrf.mxu0  ;;  %6158 = vmatprep.mubr.msk.bf16.mxu1 %vm6295_vm1, %v6294_v1 }
 0x233   : > { %v5940_v31 = vpop.f32.mrf.mxu1  ;;  %v4472_v45 = vsel %vm1527_vm4, %v4469_v5, %v4471_v8 }
 0x234   : > { %v2851_v48 = vpop.f32.mrf.mxu0  ;;  %v6285_v31 = vld [vmem:[%s6355_s26 + $0x58] ss:$0 sps:$4 sm:$0x11]  }
 0x235   : > { %v7572_v16 = vadd.f32 %v2977_v13, %v2851_v48  ;;  %v2985_v26 = vpop.f32.mrf.mxu1  ;;  %v4276_v13 = vor.u32 %v4274_v14, %v4272_v46  ;;  %v4473_v5 = vrot.slane %v6285_v31, 1 }
 0x236   : > { %v5899_v60 = vpop.f32.mrf.mxu0 }
 0x237   : > { %v5941_v38 = vpop.f32.mrf.mxu1  ;;  %v4281_v39 = vsel %vm299_vm3, %v4276_v13, %v4280_v63  ;;  %v4294_v13 = vshll.u32 %v6285_v31, 16 }
 0x238   : > { %v2856_v30 = vpop.f32.mrf.mxu0  ;;  %6117 = vmatmul.mubr.msk.bf16.gmra.mxu0 %vm376_vm2, %v4273_v47 }
 0x239   : > { %v7578_v27 = vadd.f32 %v2982_v37, %v2856_v30  ;;  %v3414_v22 = vpop.f32.mrf.mxu1  ;;  %6159 = vmatmul.mubr.msk.bf16.gmra.mxu1 %vm376_vm2, %v4470_v36  ;;  %6120 = vmatprep.mubr.msk.bf16.mxu0 %vm6295_vm1, %v6294_v1  ;;  %v4286_v37 = vshll.u32 %v6284_v3, 16  ;;  %v4290_v30 = vshrl.u32 %v6284_v3, 16 }
 0x23a   : > { %v5902_v9 = vpop.f32.mrf.mxu0  ;;  %6162 = vmatprep.mubr.msk.bf16.mxu1 %vm6295_vm1, %v6294_v1 }
 0x23b   : > { %v5984_v35 = vpop.f32.mrf.mxu1  ;;  %v4288_v12 = vrot.slane %v4286_v37, 1 }
 0x23c   : > { %v2859_v4 = vpop.f32.mrf.mxu0 }
 0x23d   : > { %v7585_v19 = vadd.f32 %v2985_v26, %v2859_v4  ;;  %v3417_v50 = vpop.f32.mrf.mxu1  ;;  %v4284_v26 = vor.u32 %v4282_v41, %v4280_v63 }
 0x23e   : > { %v5903_v49 = vpop.f32.mrf.mxu0 }
 0x23f   : > { %v5985_v46 = vpop.f32.mrf.mxu1  ;;  %v4289_v4 = vsel %vm299_vm3, %v4284_v26, %v4288_v12 }
 0x240   : > { %v3117_v48 = vpop.f32.mrf.mxu0  ;;  %6121 = vmatmul.mubr.msk.bf16.gmra.mxu0 %vm376_vm2, %v4281_v39  ;;  %v4474_v39 = vsel %vm1527_vm4, %v4471_v8, %v4473_v5  ;;  %v4296_v46 = vrot.slane %v4294_v13, 1 }
 0x241   : > { %v3188_v47 = vadd.f32 %v3117_v48, %v7456_v57  ;;  %v3422_v14 = vpop.f32.mrf.mxu1  ;;  %6163 = vmatmul.mubr.msk.bf16.gmra.mxu1 %vm376_vm2, %v4472_v45  ;;  %6124 = vmatprep.mubr.msk.bf16.mxu0 %vm6295_vm1, %v6294_v1 }
 0x242   : > { %v5946_v58 = vpop.f32.mrf.mxu0  ;;  %6166 = vmatprep.mubr.msk.bf16.mxu1 %vm6295_vm1, %v6294_v1 }
 0x243   : > { %v3485_v60 = vadd.f32 %v3414_v22, %v3188_v47  ;;  %v5988_v36 = vpop.f32.mrf.mxu1  ;;  %v4292_v22 = vor.u32 %v4290_v30, %v4288_v12 }
 0x244   : > { %v3120_v38 = vpop.f32.mrf.mxu0 }
 0x245   : > { %v3503_v57 = vmul.f32 %v3485_v60, %v6790_v51  ;;  %v3189_v9 = vadd.f32 %v3120_v38, %v7471_v56  ;;  %v3425_v35 = vpop.f32.mrf.mxu1  ;;  %v4297_v38 = vsel %vm299_vm3, %v4292_v22, %v4296_v46 }
 0x246   : > { %v5947_v63 = vpop.f32.mrf.mxu0 }
 0x247   : > { %v5366_v41 = vpack.c.bf16 %v3503_v57, %v3503_v57  ;;  %v3486_v37 = vadd.f32 %v3417_v50, %v3189_v9  ;;  %v5989_v49 = vpop.f32.mrf.mxu1  ;;  %v3655_v3 = vmul.f32 %v3503_v57, %v3503_v57  ;;  %v3612_v8 = vsel %vm1352_vm6, %v3503_v57, 0.0 }
 0x248   : > { %v3125_v45 = vpop.f32.mrf.mxu0  ;;  %6125 = vmatmul.mubr.msk.bf16.gmra.mxu0 %vm376_vm2, %v4289_v4 }
 0x249   : > { %5207 = vst.msk [vmem:[%s6808_s8 + $0x90] sm:$0xf] %vm1333_vm5, %v5366_v41  ;;  %v3504_v31 = vmul.f32 %v3486_v37, %v6810_v11  ;;  %v3190_v56 = vadd.f32 %v3125_v45, %v7480_v55  ;;  %v3430_v48 = vpop.f32.mrf.mxu1  ;;  %6167 = vmatmul.mubr.msk.bf16.gmra.mxu1 %vm376_vm2, %v4474_v39  ;;  %6128 = vmatprep.mubr.msk.bf16.mxu0 %vm6295_vm1, %v6294_v1  ;;  %v3673_v55 = vsel %vm1352_vm6, %v3655_v3, 0.0 }
 0x24a   : > { %v5950_v50 = vpop.f32.mrf.mxu0 }
 0x24b   : > { %v5367_v47 = vpack.c.bf16 %v3504_v31, %v3504_v31  ;;  %v3613_v26 = vsel %vm1352_vm6, %v3504_v31, 0.0  ;;  %v3656_v12 = vmul.f32 %v3504_v31, %v3504_v31  ;;  %v3487_v58 = vadd.f32 %v3422_v14, %v3190_v56  ;;  %v5992_v5 = vpop.f32.mrf.mxu1 }
 0x24c   : > { %v3614_v60 = vadd.f32 %v3613_v26, %v3612_v8  ;;  %v3128_v36 = vpop.f32.mrf.mxu0 }
 0x24d   : > { %5208 = vst.msk [vmem:[%s6808_s8 + $0x94] sm:$0xf] %vm1333_vm5, %v5367_v47  ;;  %v3674_v1 = vsel %vm1352_vm6, %v3656_v12, 0.0  ;;  %v3505_v30 = vmul.f32 %v3487_v58, %v6814_v21  ;;  %v3191_v13 = vadd.f32 %v3128_v36, %v7489_v53  ;;  %v3433_v57 = vpop.f32.mrf.mxu1 }
 0x24e   : > { %v3675_v9 = vadd.f32 %v3674_v1, %v3673_v55  ;;  %v5951_v4 = vpop.f32.mrf.mxu0 }
 0x24f   : > { %v5368_v14 = vpack.c.bf16 %v3505_v30, %v3505_v30  ;;  %v3615_v63 = vsel %vm1352_vm6, %v3505_v30, 0.0  ;;  %v3657_v39 = vmul.f32 %v3505_v30, %v3505_v30  ;;  %v3488_v41 = vadd.f32 %v3425_v35, %v3191_v13  ;;  %v5993_v37 = vpop.f32.mrf.mxu1 }
 0x250   : > { %v3616_v49 = vadd.f32 %v3615_v63, %v3614_v60  ;;  %v3133_v45 = vpop.f32.mrf.mxu0  ;;  %6129 = vmatmul.mubr.msk.bf16.gmra.mxu0 %vm376_vm2, %v4297_v38 }
 0x251   : > { %5209 = vst.msk [vmem:[%s6808_s8 + $0x98] sm:$0xf] %vm1333_vm5, %v5368_v14  ;;  %v3676_v22 = vsel %vm1352_vm6, %v3657_v39, 0.0  ;;  %v3506_v53 = vmul.f32 %v3488_v41, %v6843_v61  ;;  %v3192_v46 = vadd.f32 %v3133_v45, %v7495_v20  ;;  %v3438_v3 = vpop.f32.mrf.mxu1 }
 0x252   : > { %v3677_v31 = vadd.f32 %v3676_v22, %v3675_v9  ;;  %v5954_v56 = vpop.f32.mrf.mxu0 }
 0x253   : > { %v5369_v8 = vpack.c.bf16 %v3506_v53, %v3506_v53  ;;  %v3617_v35 = vsel %vm1352_vm6, %v3506_v53, 0.0  ;;  %v3658_v50 = vmul.f32 %v3506_v53, %v3506_v53  ;;  %v3489_v47 = vadd.f32 %v3430_v48, %v3192_v46  ;;  %v5996_v26 = vpop.f32.mrf.mxu1 }
 0x254   : > { %v3618_v12 = vadd.f32 %v3617_v35, %v3616_v49  ;;  %v3136_v58 = vpop.f32.mrf.mxu0 }
 0x255   : > { %5210 = vst.msk [vmem:[%s6808_s8 + $0x9c] sm:$0xf] %vm1333_vm5, %v5369_v8  ;;  %v3678_v5 = vsel %vm1352_vm6, %v3658_v50, 0.0  ;;  %v3507_v60 = vmul.f32 %v3489_v47, %v6860_v23  ;;  %v3193_v20 = vadd.f32 %v3136_v58, %v7506_v15  ;;  %v3441_v36 = vpop.f32.mrf.mxu1 }
 0x256   : > { %v3679_v38 = vadd.f32 %v3678_v5, %v3677_v31  ;;  %v5955_v55 = vpop.f32.mrf.mxu0 }
 0x257   : > { %v5370_v1 = vpack.c.bf16 %v3507_v60, %v3507_v60  ;;  %v3619_v30 = vsel %vm1352_vm6, %v3507_v60, 0.0  ;;  %v3659_v13 = vmul.f32 %v3507_v60, %v3507_v60  ;;  %v3490_v48 = vadd.f32 %v3433_v57, %v3193_v20  ;;  %v5997_v9 = vpop.f32.mrf.mxu1 }
 0x258   : > { %v3620_v4 = vadd.f32 %v3619_v30, %v3618_v12  ;;  %v3141_v14 = vpop.f32.mrf.mxu0 }
 0x259   : > { %5211 = vst.msk [vmem:[%s6808_s8 + $0xa0] sm:$0xf] %vm1333_vm5, %v5370_v1  ;;  %v3680_v63 = vsel %vm1352_vm6, %v3659_v13, 0.0  ;;  %v3508_v39 = vmul.f32 %v3490_v48, %v6877_v44  ;;  %v3194_v15 = vadd.f32 %v3141_v14, %v7513_v28  ;;  %v3446_v41 = vpop.f32.mrf.mxu1 }
 0x25a   : > { %v3681_v37 = vadd.f32 %v3680_v63, %v3679_v38  ;;  %v5958_v49 = vpop.f32.mrf.mxu0 }
 0x25b   : > { %v5371_v45 = vpack.c.bf16 %v3508_v39, %v3508_v39  ;;  %v3621_v22 = vsel %vm1352_vm6, %v3508_v39, 0.0  ;;  %v3660_v53 = vmul.f32 %v3508_v39, %v3508_v39  ;;  %v3491_v57 = vadd.f32 %v3438_v3, %v3194_v15  ;;  %v6000_v46 = vpop.f32.mrf.mxu1 }
 0x25c   : > { %v3622_v31 = vadd.f32 %v3621_v22, %v3620_v4  ;;  %v3144_v56 = vpop.f32.mrf.mxu0 }
 0x25d   : > { %5212 = vst.msk [vmem:[%s6808_s8 + $0xa4] sm:$0xf] %vm1333_vm5, %v5371_v45  ;;  %v3682_v8 = vsel %vm1352_vm6, %v3660_v53, 0.0  ;;  %v3509_v35 = vmul.f32 %v3491_v57, %v6892_v10  ;;  %v3195_v28 = vadd.f32 %v3144_v56, %v7520_v42  ;;  %v3449_v50 = vpop.f32.mrf.mxu1 }
 0x25e   : > { %v3683_v47 = vadd.f32 %v3682_v8, %v3681_v37  ;;  %v5959_v26 = vpop.f32.mrf.mxu0 }
 0x25f   : > { %v5372_v12 = vpack.c.bf16 %v3509_v35, %v3509_v35  ;;  %v3623_v58 = vsel %vm1352_vm6, %v3509_v35, 0.0  ;;  %v3661_v5 = vmul.f32 %v3509_v35, %v3509_v35  ;;  %v3492_v3 = vadd.f32 %v3441_v36, %v3195_v28  ;;  %v6001_v60 = vpop.f32.mrf.mxu1 }
 0x260   : > { %v3624_v20 = vadd.f32 %v3623_v58, %v3622_v31  ;;  %v3149_v38 = vpop.f32.mrf.mxu0 }
 0x261   : > { %5213 = vst.msk [vmem:[%s6808_s8 + $0xa8] sm:$0xf] %vm1333_vm5, %v5372_v12  ;;  %v3684_v55 = vsel %vm1352_vm6, %v3661_v5, 0.0  ;;  %v3510_v1 = vmul.f32 %v3492_v3, %v6908_v32  ;;  %v3196_v42 = vadd.f32 %v3149_v38, %v7526_v2  ;;  %v3454_v30 = vpop.f32.mrf.mxu1 }
 0x262   : > { %v3685_v13 = vadd.f32 %v3684_v55, %v3683_v47  ;;  %v5962_v48 = vpop.f32.mrf.mxu0 }
 0x263   : > { %v5373_v9 = vpack.c.bf16 %v3510_v1, %v3510_v1  ;;  %v3625_v4 = vsel %vm1352_vm6, %v3510_v1, 0.0  ;;  %v3662_v14 = vmul.f32 %v3510_v1, %v3510_v1  ;;  %v3493_v36 = vadd.f32 %v3446_v41, %v3196_v42  ;;  %v6004_v63 = vpop.f32.mrf.mxu1 }
 0x264   : > { %v3626_v39 = vadd.f32 %v3625_v4, %v3624_v20  ;;  %v3152_v15 = vpop.f32.mrf.mxu0 }
 0x265   : > { %5214 = vst.msk [vmem:[%s6808_s8 + $0xac] sm:$0xf] %vm1333_vm5, %v5373_v9  ;;  %v3686_v37 = vsel %vm1352_vm6, %v3662_v14, 0.0  ;;  %v3511_v49 = vmul.f32 %v3493_v36, %v6924_v54  ;;  %v3197_v2 = vadd.f32 %v3152_v15, %v7533_v40  ;;  %v3457_v45 = vpop.f32.mrf.mxu1 }
 0x266   : > { %v3687_v22 = vadd.f32 %v3686_v37, %v3685_v13  ;;  %v5963_v53 = vpop.f32.mrf.mxu0 }
 0x267   : > { %v5374_v57 = vpack.c.bf16 %v3511_v49, %v3511_v49  ;;  %v3627_v46 = vsel %vm1352_vm6, %v3511_v49, 0.0  ;;  %v3663_v31 = vmul.f32 %v3511_v49, %v3511_v49  ;;  %v3494_v41 = vadd.f32 %v3449_v50, %v3197_v2  ;;  %v6005_v56 = vpop.f32.mrf.mxu1 }
 0x268   : > { %v3628_v8 = vadd.f32 %v3627_v46, %v3626_v39  ;;  %v3157_v35 = vpop.f32.mrf.mxu0 }
 0x269   : > { %5215 = vst.msk [vmem:[%s6808_s8 + $0xb0] sm:$0xf] %vm1333_vm5, %v5374_v57  ;;  %v3688_v28 = vsel %vm1352_vm6, %v3663_v31, 0.0  ;;  %v3512_v47 = vmul.f32 %v3494_v41, %v6937_v59  ;;  %v3198_v40 = vadd.f32 %v3157_v35, %v7539_v33  ;;  %v3462_v26 = vpop.f32.mrf.mxu1 }
 0x26a   : > { %v3689_v12 = vadd.f32 %v3688_v28, %v3687_v22  ;;  %v5966_v58 = vpop.f32.mrf.mxu0 }
 0x26b   : > { %v5375_v5 = vpack.c.bf16 %v3512_v47, %v3512_v47  ;;  %v3629_v3 = vsel %vm1352_vm6, %v3512_v47, 0.0  ;;  %v3664_v60 = vmul.f32 %v3512_v47, %v3512_v47  ;;  %v3495_v50 = vadd.f32 %v3454_v30, %v3198_v40  ;;  %v6008_v20 = vpop.f32.mrf.mxu1 }
 0x26c   : > { %v3630_v38 = vadd.f32 %v3629_v3, %v3628_v8  ;;  %v3160_v55 = vpop.f32.mrf.mxu0 }
 0x26d   : > { %5216 = vst.msk [vmem:[%s6808_s8 + $0xb4] sm:$0xf] %vm1333_vm5, %v5375_v5  ;;  %v3690_v1 = vsel %vm1352_vm6, %v3664_v60, 0.0  ;;  %v3513_v42 = vmul.f32 %v3495_v50, %v6953_v7  ;;  %v3199_v33 = vadd.f32 %v3160_v55, %v7546_v0  ;;  %v3465_v13 = vpop.f32.mrf.mxu1 }
 0x26e   : > { %v3691_v48 = vadd.f32 %v3690_v1, %v3689_v12  ;;  %v5967_v9 = vpop.f32.mrf.mxu0 }
 0x26f   : > { %v5376_v4 = vpack.c.bf16 %v3513_v42, %v3513_v42  ;;  %v3631_v14 = vsel %vm1352_vm6, %v3513_v42, 0.0  ;;  %v3665_v36 = vmul.f32 %v3513_v42, %v3513_v42  ;;  %v3496_v30 = vadd.f32 %v3457_v45, %v3199_v33  ;;  %v6009_v63 = vpop.f32.mrf.mxu1 }
 0x270   : > { %v3632_v39 = vadd.f32 %v3631_v14, %v3630_v38  ;;  %v3165_v15 = vpop.f32.mrf.mxu0 }
 0x271   : > { %5217 = vst.msk [vmem:[%s6808_s8 + $0xb8] sm:$0xf] %vm1333_vm5, %v5376_v4  ;;  %v3692_v37 = vsel %vm1352_vm6, %v3665_v36, 0.0  ;;  %v3514_v49 = vmul.f32 %v3496_v30, %v6966_v62  ;;  %v3200_v0 = vadd.f32 %v3165_v15, %v7552_v34  ;;  %v3470_v2 = vpop.f32.mrf.mxu1 }
 0x272   : > { %v3693_v22 = vadd.f32 %v3692_v37, %v3691_v48  ;;  %v5970_v53 = vpop.f32.mrf.mxu0 }
 0x273   : > { %v5377_v57 = vpack.c.bf16 %v3514_v49, %v3514_v49  ;;  %v3633_v46 = vsel %vm1352_vm6, %v3514_v49, 0.0  ;;  %v3666_v31 = vmul.f32 %v3514_v49, %v3514_v49  ;;  %v3497_v45 = vadd.f32 %v3462_v26, %v3200_v0  ;;  %v6012_v41 = vpop.f32.mrf.mxu1 }
 0x274   : > { %v3634_v56 = vadd.f32 %v3633_v46, %v3632_v39  ;;  %v3168_v8 = vpop.f32.mrf.mxu0 }
 0x275   : > { %5218 = vst.msk [vmem:[%s6808_s8 + $0xbc] sm:$0xf] %vm1333_vm5, %v5377_v57  ;;  %v3694_v35 = vsel %vm1352_vm6, %v3666_v31, 0.0  ;;  %v3515_v28 = vmul.f32 %v3497_v45, %v6982_v24  ;;  %v3201_v34 = vadd.f32 %v3168_v8, %v7559_v25  ;;  %v3473_v47 = vpop.f32.mrf.mxu1 }
 0x276   : > { %v3695_v40 = vadd.f32 %v3694_v35, %v3693_v22  ;;  %v5971_v12 = vpop.f32.mrf.mxu0 }
 0x277   : > { %v5378_v58 = vpack.c.bf16 %v3515_v28, %v3515_v28  ;;  %v3635_v5 = vsel %vm1352_vm6, %v3515_v28, 0.0  ;;  %v3667_v3 = vmul.f32 %v3515_v28, %v3515_v28  ;;  %v3498_v26 = vadd.f32 %v3465_v13, %v3201_v34  ;;  %v6013_v60 = vpop.f32.mrf.mxu1 }
 0x278   : > { %v3636_v50 = vadd.f32 %v3635_v5, %v3634_v56  ;;  %v3173_v20 = vpop.f32.mrf.mxu0 }
 0x279   : > { %5219 = vst.msk [vmem:[%s6808_s8 + $0xc0] sm:$0xf] %vm1333_vm5, %v5378_v58  ;;  %v3696_v38 = vsel %vm1352_vm6, %v3667_v3, 0.0  ;;  %v3516_v55 = vmul.f32 %v3498_v26, %v6995_v43  ;;  %v3202_v25 = vadd.f32 %v3173_v20, %v7565_v18  ;;  %v3478_v1 = vpop.f32.mrf.mxu1 }
 0x27a   : > { %v3697_v42 = vadd.f32 %v3696_v38, %v3695_v40  ;;  %v5974_v33 = vpop.f32.mrf.mxu0 }
 0x27b   : > { %v5379_v48 = vpack.c.bf16 %v3516_v55, %v3516_v55  ;;  %v3637_v9 = vsel %vm1352_vm6, %v3516_v55, 0.0  ;;  %v3668_v4 = vmul.f32 %v3516_v55, %v3516_v55  ;;  %v3499_v13 = vadd.f32 %v3470_v2, %v3202_v25  ;;  %v6016_v14 = vpop.f32.mrf.mxu1 }
 0x27c   : > { %v3638_v36 = vadd.f32 %v3637_v9, %v3636_v50  ;;  %v3176_v30 = vpop.f32.mrf.mxu0 }
 0x27d   : > { %5220 = vst.msk [vmem:[%s6808_s8 + $0xc4] sm:$0xf] %vm1333_vm5, %v5379_v48  ;;  %v3698_v63 = vsel %vm1352_vm6, %v3668_v4, 0.0  ;;  %v3517_v39 = vmul.f32 %v3499_v13, %v7011_v6  ;;  %v3203_v18 = vadd.f32 %v3176_v30, %v7572_v16  ;;  %v3481_v15 = vpop.f32.mrf.mxu1 }
 0x27e   : > { %v3699_v37 = vadd.f32 %v3698_v63, %v3697_v42  ;;  %v5975_v49 = vpop.f32.mrf.mxu0 }
 0x27f   : > { %v5380_v0 = vpack.c.bf16 %v3517_v39, %v3517_v39  ;;  %v3639_v22 = vsel %vm1352_vm6, %v3517_v39, 0.0  ;;  %v3669_v53 = vmul.f32 %v3517_v39, %v3517_v39  ;;  %v3500_v2 = vadd.f32 %v3473_v47, %v3203_v18  ;;  %v6017_v57 = vpop.f32.mrf.mxu1 }
 0x280   : > { %v3640_v46 = vadd.f32 %v3639_v22, %v3638_v36  ;;  %v3181_v31 = vpop.f32.mrf.mxu0 }
 0x281   : > { %5221 = vst.msk [vmem:[%s6808_s8 + $0xc8] sm:$0xf] %vm1333_vm5, %v5380_v0  ;;  %v3700_v45 = vsel %vm1352_vm6, %v3669_v53, 0.0  ;;  %v3518_v41 = vmul.f32 %v3500_v2, %v7024_v29  ;;  %v3204_v16 = vadd.f32 %v3181_v31, %v7578_v27  ;;  %v4083_v56 = vpop.f32.mrf.mxu1 }
 0x282   : > { %v3701_v8 = vadd.f32 %v3700_v45, %v3699_v37  ;;  %v5978_v35 = vpop.f32.mrf.mxu0 }
 0x283   : > { %v5381_v28 = vpack.c.bf16 %v3518_v41, %v3518_v41  ;;  %v3641_v34 = vsel %vm1352_vm6, %v3518_v41, 0.0  ;;  %v3670_v40 = vmul.f32 %v3518_v41, %v3518_v41  ;;  %v3501_v47 = vadd.f32 %v3478_v1, %v3204_v16  ;;  %v6060_v12 = vpop.f32.mrf.mxu1 }
 0x284   : > { %v3642_v58 = vadd.f32 %v3641_v34, %v3640_v46  ;;  %v3184_v5 = vpop.f32.mrf.mxu0 }
 0x285   : > { %5222 = vst.msk [vmem:[%s6808_s8 + $0xcc] sm:$0xf] %vm1333_vm5, %v5381_v28  ;;  %v3702_v3 = vsel %vm1352_vm6, %v3670_v40, 0.0  ;;  %v3519_v26 = vmul.f32 %v3501_v47, %v7040_v52  ;;  %v3205_v27 = vadd.f32 %v3184_v5, %v7585_v19  ;;  %v4086_v60 = vpop.f32.mrf.mxu1 }
 0x286   : > { %v3703_v50 = vadd.f32 %v3702_v3, %v3701_v8  ;;  %v5979_v20 = vpop.f32.mrf.mxu0 }
 0x287   : > { %v5382_v38 = vpack.c.bf16 %v3519_v26, %v3519_v26  ;;  %v3643_v55 = vsel %vm1352_vm6, %v3519_v26, 0.0  ;;  %v3671_v25 = vmul.f32 %v3519_v26, %v3519_v26  ;;  %v3502_v1 = vadd.f32 %v3481_v15, %v3205_v27  ;;  %v6061_v42 = vpop.f32.mrf.mxu1 }
 0x288   : > { %v3644_v33 = vadd.f32 %v3643_v55, %v3642_v58  ;;  %v3869_v48 = vpop.f32.mrf.mxu0 }
 0x289   : > { %5223 = vst.msk [vmem:[%s6808_s8 + $0xd0] sm:$0xf] %vm1333_vm5, %v5382_v38  ;;  %v3704_v9 = vsel %vm1352_vm6, %v3671_v25, 0.0  ;;  %v3520_v4 = vmul.f32 %v3502_v1, %v7054_v17  ;;  %v7708_v13 = vadd.f32 %v4083_v56, %v3869_v48  ;;  %v4091_v19 = vpop.f32.mrf.mxu1 }
 0x28a   : > { %v3705_v14 = vadd.f32 %v3704_v9, %v3703_v50  ;;  %v6022_v36 = vpop.f32.mrf.mxu0 }
 0x28b   : > { %v5383_v30 = vpack.c.bf16 %v3520_v4, %v3520_v4  ;;  %v3645_v63 = vsel %vm1352_vm6, %v3520_v4, 0.0  ;;  %v3672_v39 = vmul.f32 %v3520_v4, %v3520_v4  ;;  %v6064_v18 = vpop.f32.mrf.mxu1 }
 0x28c   : > { %v3646_v15 = vadd.f32 %v3645_v63, %v3644_v33  ;;  %v3872_v37 = vpop.f32.mrf.mxu0 }
 0x28d   : > { %5224 = vst.msk [vmem:[%s6808_s8 + $0xd4] sm:$0xf] %vm1333_vm5, %v5383_v30  ;;  %v3706_v49 = vsel %vm1352_vm6, %v3672_v39, 0.0  ;;  %v7714_v0 = vadd.f32 %v4086_v60, %v3872_v37  ;;  %v4094_v22 = vpop.f32.mrf.mxu1 }
 0x28e   : > { %v3647_v53 = vrot.slane %v3646_v15, 4  ;;  %v3707_v2 = vadd.f32 %v3706_v49, %v3705_v14  ;;  %v6023_v57 = vpop.f32.mrf.mxu0 }
 0x28f   : > { %v6065_v46 = vpop.f32.mrf.mxu1 }
 0x290   : > { %v3648_v31 = vadd.f32 %v3647_v53, %v3646_v15  ;;  %v3708_v45 = vrot.slane %v3707_v2, 4  ;;  %v3877_v41 = vpop.f32.mrf.mxu0 }
 0x291   : > { %v7716_v16 = vadd.f32 %v4091_v19, %v3877_v41  ;;  %v4099_v56 = vpop.f32.mrf.mxu1 }
 0x292   : > { %v3649_v8 = vrot.slane %v3648_v31, 2  ;;  %v3709_v35 = vadd.f32 %v3708_v45, %v3707_v2  ;;  %v6026_v28 = vpop.f32.mrf.mxu0 }
 0x293   : > { %v6068_v34 = vpop.f32.mrf.mxu1 }
 0x294   : > { %v3650_v40 = vadd.f32 %v3649_v8, %v3648_v31  ;;  %v3710_v47 = vrot.slane %v3709_v35, 2  ;;  %v3880_v12 = vpop.f32.mrf.mxu0 }
 0x295   : > { %v7718_v58 = vadd.f32 %v4094_v22, %v3880_v12  ;;  %v4102_v5 = vpop.f32.mrf.mxu1 }
 0x296   : > { %v3651_v3 = vrot.slane %v3650_v40, 1  ;;  %v3711_v26 = vadd.f32 %v3710_v47, %v3709_v35  ;;  %v6027_v27 = vpop.f32.mrf.mxu0 }
 0x297   : > { %v6069_v60 = vpop.f32.mrf.mxu1 }
 0x298   : > { %v3652_v50 = vadd.f32 %v3651_v3, %v3650_v40  ;;  %v3712_v20 = vrot.slane %v3711_v26, 1  ;;  %v3885_v38 = vpop.f32.mrf.mxu0 }
 0x299   : > { %v7720_v55 = vadd.f32 %v4099_v56, %v3885_v38  ;;  %v4107_v25 = vpop.f32.mrf.mxu1 }
 0x29a   : > { %5225 = vst.msk [vmem:[%s7105_s19 + $0x4] sm:$0x1] %vm1394_vm7, %v3652_v50  ;;  %v3713_v1 = vadd.f32 %v3712_v20, %v3711_v26  ;;  %v6030_v42 = vpop.f32.mrf.mxu0 }
 0x29b   : > { %v6072_v33 = vpop.f32.mrf.mxu1 }
 0x29c   : > { %5226 = vst.msk [vmem:[%s7105_s19 + $0x5] sm:$0x1] %vm1394_vm7, %v3713_v1  ;;  %v3888_v48 = vpop.f32.mrf.mxu0 }
 0x29d   : > { %v7726_v9 = vadd.f32 %v4102_v5, %v3888_v48  ;;  %v4110_v4 = vpop.f32.mrf.mxu1 }
 0x29e   : > { %v6031_v19 = vpop.f32.mrf.mxu0 }
 0x29f   : > { %v6073_v14 = vpop.f32.mrf.mxu1 }
 0x2a0   : > { %v3893_v36 = vpop.f32.mrf.mxu0 }
 0x2a1   : > { %v7728_v30 = vadd.f32 %v4107_v25, %v3893_v36  ;;  %v4115_v63 = vpop.f32.mrf.mxu1 }
 0x2a2   : > { %v6034_v39 = vpop.f32.mrf.mxu0 }
 0x2a3   : > { %v6076_v18 = vpop.f32.mrf.mxu1 }
 0x2a4   : > { %v3896_v15 = vpop.f32.mrf.mxu0 }
 0x2a5   : > { %v7730_v37 = vadd.f32 %v4110_v4, %v3896_v15  ;;  %v4118_v49 = vpop.f32.mrf.mxu1 }
 0x2a6   : > { %v6035_v22 = vpop.f32.mrf.mxu0 }
 0x2a7   : > { %v6077_v53 = vpop.f32.mrf.mxu1 }
 0x2a8   : > { %v3901_v2 = vpop.f32.mrf.mxu0 }
 0x2a9   : > { %v7732_v57 = vadd.f32 %v4115_v63, %v3901_v2  ;;  %v4123_v46 = vpop.f32.mrf.mxu1 }
 0x2aa   : > { %v6038_v31 = vpop.f32.mrf.mxu0 }
 0x2ab   : > { %v6080_v45 = vpop.f32.mrf.mxu1 }
 0x2ac   : > { %v3904_v41 = vpop.f32.mrf.mxu0 }
 0x2ad   : > { %v7734_v56 = vadd.f32 %v4118_v49, %v3904_v41  ;;  %v4126_v8 = vpop.f32.mrf.mxu1 }
 0x2ae   : > { %v6039_v35 = vpop.f32.mrf.mxu0 }
 0x2af   : > { %v6081_v28 = vpop.f32.mrf.mxu1 }
 0x2b0   : > { %v3909_v34 = vpop.f32.mrf.mxu0 }
 0x2b1   : > { %v7736_v40 = vadd.f32 %v4123_v46, %v3909_v34  ;;  %v4131_v47 = vpop.f32.mrf.mxu1 }
 0x2b2   : > { %v6042_v12 = vpop.f32.mrf.mxu0 }
 0x2b3   : > { %v6084_v5 = vpop.f32.mrf.mxu1 }
 0x2b4   : > { %v3912_v3 = vpop.f32.mrf.mxu0 }
 0x2b5   : > { %v7738_v26 = vadd.f32 %v4126_v8, %v3912_v3  ;;  %v4134_v27 = vpop.f32.mrf.mxu1 }
 0x2b6   : > { %v6043_v60 = vpop.f32.mrf.mxu0 }
 0x2b7   : > { %v6085_v50 = vpop.f32.mrf.mxu1 }
 0x2b8   : > { %v3917_v20 = vpop.f32.mrf.mxu0 }
 0x2b9   : > { %v7740_v38 = vadd.f32 %v4131_v47, %v3917_v20  ;;  %v4139_v25 = vpop.f32.mrf.mxu1 }
 0x2ba   : > { %v6046_v1 = vpop.f32.mrf.mxu0 }
 0x2bb   : > { %v6088_v42 = vpop.f32.mrf.mxu1 }
 0x2bc   : > { %v3920_v33 = vpop.f32.mrf.mxu0 }
 0x2bd   : > { %v7742_v48 = vadd.f32 %v4134_v27, %v3920_v33  ;;  %v4142_v4 = vpop.f32.mrf.mxu1 }
 0x2be   : > { %v6047_v19 = vpop.f32.mrf.mxu0 }
 0x2bf   : > { %v6089_v14 = vpop.f32.mrf.mxu1 }
 0x2c0   : > { %v3925_v36 = vpop.f32.mrf.mxu0 }
 0x2c1   : > { %v7744_v63 = vadd.f32 %v4139_v25, %v3925_v36  ;;  %v4147_v39 = vpop.f32.mrf.mxu1 }
 0x2c2   : > { %v6050_v18 = vpop.f32.mrf.mxu0 }
 0x2c3   : > { %v6092_v15 = vpop.f32.mrf.mxu1 }
 0x2c4   : > { %v3928_v49 = vpop.f32.mrf.mxu0 }
 0x2c5   : > { %v7746_v22 = vadd.f32 %v4142_v4, %v3928_v49  ;;  %v4150_v53 = vpop.f32.mrf.mxu1 }
 0x2c6   : > { %v6051_v2 = vpop.f32.mrf.mxu0 }
 0x2c7   : > { %v6093_v46 = vpop.f32.mrf.mxu1 }
 0x2c8   : > { %v3933_v31 = vpop.f32.mrf.mxu0 }
 0x2c9   : > { %v7748_v45 = vadd.f32 %v4147_v39, %v3933_v31  ;;  %v4539_v41 = vpop.f32.mrf.mxu1 }
 0x2ca   : > { %v6054_v8 = vpop.f32.mrf.mxu0 }
 0x2cb   : > { %v6136_v35 = vpop.f32.mrf.mxu1 }
 0x2cc   : > { %v3936_v28 = vpop.f32.mrf.mxu0 }
 0x2cd   : > { %v7750_v34 = vadd.f32 %v4150_v53, %v3936_v28  ;;  %v4542_v47 = vpop.f32.mrf.mxu1 }
 0x2ce   : > { %v6055_v12 = vpop.f32.mrf.mxu0 }
 0x2cf   : > { %v6137_v5 = vpop.f32.mrf.mxu1 }
 0x2d0   : > { %v4362_v3 = vpop.f32.mrf.mxu0 }
 0x2d1   : > { %v4433_v27 = vadd.f32 %v4362_v3, %v7708_v13  ;;  %v4547_v60 = vpop.f32.mrf.mxu1 }
 0x2d2   : > { %v6098_v50 = vpop.f32.mrf.mxu0 }
 0x2d3   : > { %v4610_v20 = vadd.f32 %v4539_v41, %v4433_v27  ;;  %v6140_v25 = vpop.f32.mrf.mxu1 }
 0x2d4   : > { %v4365_v1 = vpop.f32.mrf.mxu0 }
 0x2d5   : > { %v4628_v42 = vmul.f32 %v4610_v20, %v6790_v51  ;;  %v4434_v33 = vadd.f32 %v4365_v1, %v7714_v0  ;;  %v4550_v4 = vpop.f32.mrf.mxu1 }
 0x2d6   : > { %v6099_v19 = vpop.f32.mrf.mxu0 }
 0x2d7   : > { %v5384_v14 = vpack.c.bf16 %v4628_v42, %v4628_v42  ;;  %v4611_v36 = vadd.f32 %v4542_v47, %v4434_v33  ;;  %v6141_v39 = vpop.f32.mrf.mxu1  ;;  %v4780_v15 = vmul.f32 %v4628_v42, %v4628_v42  ;;  %v4737_v2 = vsel %vm1352_vm6, %v4628_v42, 0.0 }
 0x2d8   : > { %v4370_v18 = vpop.f32.mrf.mxu0 }
 0x2d9   : > { %5307 = vst.msk [vmem:[%s6808_s8 + $0xd8] sm:$0xf] %vm1333_vm5, %v5384_v14  ;;  %v4629_v13 = vmul.f32 %v4611_v36, %v6810_v11  ;;  %v4435_v49 = vadd.f32 %v4370_v18, %v7716_v16  ;;  %v4555_v53 = vpop.f32.mrf.mxu1  ;;  %v4798_v47 = vsel %vm1352_vm6, %v4780_v15, 0.0 }
 0x2da   : > { %v6102_v51 = vpop.f32.mrf.mxu0 }
 0x2db   : > { %v5385_v46 = vpack.c.bf16 %v4629_v13, %v4629_v13  ;;  %v4738_v0 = vsel %vm1352_vm6, %v4629_v13, 0.0  ;;  %v4781_v31 = vmul.f32 %v4629_v13, %v4629_v13  ;;  %v4612_v41 = vadd.f32 %v4547_v60, %v4435_v49  ;;  %v6144_v8 = vpop.f32.mrf.mxu1 }
 0x2dc   : > { %v4739_v35 = vadd.f32 %v4738_v0, %v4737_v2  ;;  %v4373_v28 = vpop.f32.mrf.mxu0 }
 0x2dd   : > { %5308 = vst.msk [vmem:[%s6808_s8 + $0xdc] sm:$0xf] %vm1333_vm5, %v5385_v46  ;;  %v4799_v11 = vsel %vm1352_vm6, %v4781_v31, 0.0  ;;  %v4630_v16 = vmul.f32 %v4612_v41, %v6814_v21  ;;  %v4436_v12 = vadd.f32 %v4373_v28, %v7718_v58  ;;  %v4558_v5 = vpop.f32.mrf.mxu1 }
 0x2de   : > { %v4800_v3 = vadd.f32 %v4799_v11, %v4798_v47  ;;  %v6103_v27 = vpop.f32.mrf.mxu0 }
 0x2df   : > { %v5386_v50 = vpack.c.bf16 %v4630_v16, %v4630_v16  ;;  %v4740_v60 = vsel %vm1352_vm6, %v4630_v16, 0.0  ;;  %v4782_v20 = vmul.f32 %v4630_v16, %v4630_v16  ;;  %v4613_v25 = vadd.f32 %v4550_v4, %v4436_v12  ;;  %v6145_v1 = vpop.f32.mrf.mxu1 }
 0x2e0   : > { %v4741_v42 = vadd.f32 %v4740_v60, %v4739_v35  ;;  %v4378_v33 = vpop.f32.mrf.mxu0 }
 0x2e1   : > { %5309 = vst.msk [vmem:[%s6808_s8 + $0xe0] sm:$0xf] %vm1333_vm5, %v5386_v50  ;;  %v4801_v19 = vsel %vm1352_vm6, %v4782_v20, 0.0  ;;  %v4631_v21 = vmul.f32 %v4613_v25, %v6843_v61  ;;  %v4437_v58 = vadd.f32 %v4378_v33, %v7720_v55  ;;  %v4563_v14 = vpop.f32.mrf.mxu1 }
 0x2e2   : > { %v4802_v36 = vadd.f32 %v4801_v19, %v4800_v3  ;;  %v6106_v39 = vpop.f32.mrf.mxu0 }
 0x2e3   : > { %v5387_v18 = vpack.c.bf16 %v4631_v21, %v4631_v21  ;;  %v4742_v15 = vsel %vm1352_vm6, %v4631_v21, 0.0  ;;  %v4783_v13 = vmul.f32 %v4631_v21, %v4631_v21  ;;  %v4614_v4 = vadd.f32 %v4555_v53, %v4437_v58  ;;  %v6148_v49 = vpop.f32.mrf.mxu1 }
 0x2e4   : > { %v4743_v2 = vadd.f32 %v4742_v15, %v4741_v42  ;;  %v4381_v51 = vpop.f32.mrf.mxu0 }
 0x2e5   : > { %5310 = vst.msk [vmem:[%s6808_s8 + $0xe4] sm:$0xf] %vm1333_vm5, %v5387_v18  ;;  %v4803_v46 = vsel %vm1352_vm6, %v4783_v13, 0.0  ;;  %v4632_v61 = vmul.f32 %v4614_v4, %v6860_v23  ;;  %v4438_v55 = vadd.f32 %v4381_v51, %v7726_v9  ;;  %v4566_v0 = vpop.f32.mrf.mxu1 }
 0x2e6   : > { %v4804_v31 = vadd.f32 %v4803_v46, %v4802_v36  ;;  %v6107_v41 = vpop.f32.mrf.mxu0 }
 0x2e7   : > { %v5388_v8 = vpack.c.bf16 %v4632_v61, %v4632_v61  ;;  %v4744_v35 = vsel %vm1352_vm6, %v4632_v61, 0.0  ;;  %v4784_v28 = vmul.f32 %v4632_v61, %v4632_v61  ;;  %v4615_v53 = vadd.f32 %v4558_v5, %v4438_v55  ;;  %v6149_v47 = vpop.f32.mrf.mxu1 }
 0x2e8   : > { %v4745_v11 = vadd.f32 %v4744_v35, %v4743_v2  ;;  %v4386_v16 = vpop.f32.mrf.mxu0 }
 0x2e9   : > { %5311 = vst.msk [vmem:[%s6808_s8 + $0xe8] sm:$0xf] %vm1333_vm5, %v5388_v8  ;;  %v4805_v12 = vsel %vm1352_vm6, %v4784_v28, 0.0  ;;  %v4633_v23 = vmul.f32 %v4615_v53, %v6877_v44  ;;  %v4439_v9 = vadd.f32 %v4386_v16, %v7728_v30  ;;  %v4571_v3 = vpop.f32.mrf.mxu1 }
 0x2ea   : > { %v4806_v27 = vadd.f32 %v4805_v12, %v4804_v31  ;;  %v6110_v50 = vpop.f32.mrf.mxu0 }
 0x2eb   : > { %v5389_v60 = vpack.c.bf16 %v4633_v23, %v4633_v23  ;;  %v4746_v20 = vsel %vm1352_vm6, %v4633_v23, 0.0  ;;  %v4785_v25 = vmul.f32 %v4633_v23, %v4633_v23  ;;  %v4616_v5 = vadd.f32 %v4563_v14, %v4439_v9  ;;  %v6152_v1 = vpop.f32.mrf.mxu1 }
 0x2ec   : > { %v4747_v42 = vadd.f32 %v4746_v20, %v4745_v11  ;;  %v4389_v33 = vpop.f32.mrf.mxu0 }
 0x2ed   : > { %5312 = vst.msk [vmem:[%s6808_s8 + $0xec] sm:$0xf] %vm1333_vm5, %v5389_v60  ;;  %v4807_v19 = vsel %vm1352_vm6, %v4785_v25, 0.0  ;;  %v4634_v44 = vmul.f32 %v4616_v5, %v6892_v10  ;;  %v4440_v30 = vadd.f32 %v4389_v33, %v7730_v37  ;;  %v4574_v21 = vpop.f32.mrf.mxu1 }
 0x2ee   : > { %v4808_v58 = vadd.f32 %v4807_v19, %v4806_v27  ;;  %v6111_v36 = vpop.f32.mrf.mxu0 }
 0x2ef   : > { %v5390_v39 = vpack.c.bf16 %v4634_v44, %v4634_v44  ;;  %v4748_v18 = vsel %vm1352_vm6, %v4634_v44, 0.0  ;;  %v4786_v15 = vmul.f32 %v4634_v44, %v4634_v44  ;;  %v4617_v14 = vadd.f32 %v4566_v0, %v4440_v30  ;;  %v6153_v13 = vpop.f32.mrf.mxu1 }
 0x2f0   : > { %v4749_v4 = vadd.f32 %v4748_v18, %v4747_v42  ;;  %v4394_v49 = vpop.f32.mrf.mxu0 }
 0x2f1   : > { %5313 = vst.msk [vmem:[%s6808_s8 + $0xf0] sm:$0xf] %vm1333_vm5, %v5390_v39  ;;  %v4809_v2 = vsel %vm1352_vm6, %v4786_v15, 0.0  ;;  %v4635_v10 = vmul.f32 %v4617_v14, %v6908_v32  ;;  %v4441_v37 = vadd.f32 %v4394_v49, %v7732_v57  ;;  %v4579_v51 = vpop.f32.mrf.mxu1 }
 0x2f2   : > { %v4810_v46 = vadd.f32 %v4809_v2, %v4808_v58  ;;  %v6114_v61 = vpop.f32.mrf.mxu0 }
 0x2f3   : > { %v5391_v55 = vpack.c.bf16 %v4635_v10, %v4635_v10  ;;  %v4750_v31 = vsel %vm1352_vm6, %v4635_v10, 0.0  ;;  %v4787_v41 = vmul.f32 %v4635_v10, %v4635_v10  ;;  %v4618_v0 = vadd.f32 %v4571_v3, %v4441_v37  ;;  %v6156_v8 = vpop.f32.mrf.mxu1 }
 0x2f4   : > { %v4751_v35 = vadd.f32 %v4750_v31, %v4749_v4  ;;  %v4397_v28 = vpop.f32.mrf.mxu0 }
 0x2f5   : > { %5314 = vst.msk [vmem:[%s6808_s8 + $0xf4] sm:$0xf] %vm1333_vm5, %v5391_v55  ;;  %v4811_v53 = vsel %vm1352_vm6, %v4787_v41, 0.0  ;;  %v4636_v32 = vmul.f32 %v4618_v0, %v6924_v54  ;;  %v4442_v57 = vadd.f32 %v4397_v28, %v7734_v56  ;;  %v4582_v47 = vpop.f32.mrf.mxu1 }
 0x2f6   : > { %v4812_v11 = vadd.f32 %v4811_v53, %v4810_v46  ;;  %v6115_v16 = vpop.f32.mrf.mxu0 }
 0x2f7   : > { %v5392_v12 = vpack.c.bf16 %v4636_v32, %v4636_v32  ;;  %v4752_v23 = vsel %vm1352_vm6, %v4636_v32, 0.0  ;;  %v4788_v9 = vmul.f32 %v4636_v32, %v4636_v32  ;;  %v4619_v3 = vadd.f32 %v4574_v21, %v4442_v57  ;;  %v6157_v27 = vpop.f32.mrf.mxu1 }
 0x2f8   : > { %v4753_v50 = vadd.f32 %v4752_v23, %v4751_v35  ;;  %v4402_v60 = vpop.f32.mrf.mxu0 }
 0x2f9   : > { %5315 = vst.msk [vmem:[%s6808_s8 + $0xf8] sm:$0xf] %vm1333_vm5, %v5392_v12  ;;  %v4813_v20 = vsel %vm1352_vm6, %v4788_v9, 0.0  ;;  %v4637_v54 = vmul.f32 %v4619_v3, %v6937_v59  ;;  %v4443_v56 = vadd.f32 %v4402_v60, %v7736_v40  ;;  %v4587_v25 = vpop.f32.mrf.mxu1 }
 0x2fa   : > { %v4814_v5 = vadd.f32 %v4813_v20, %v4812_v11  ;;  %v6118_v1 = vpop.f32.mrf.mxu0 }
 0x2fb   : > { %v5393_v42 = vpack.c.bf16 %v4637_v54, %v4637_v54  ;;  %v4754_v33 = vsel %vm1352_vm6, %v4637_v54, 0.0  ;;  %v4789_v19 = vmul.f32 %v4637_v54, %v4637_v54  ;;  %v4620_v44 = vadd.f32 %v4579_v51, %v4443_v56  ;;  %v6160_v30 = vpop.f32.mrf.mxu1 }
 0x2fc   : > { %v4755_v21 = vadd.f32 %v4754_v33, %v4753_v50  ;;  %v4405_v58 = vpop.f32.mrf.mxu0 }
 0x2fd   : > { %5316 = vst.msk [vmem:[%s6808_s8 + $0xfc] sm:$0xf] %vm1333_vm5, %v5393_v42  ;;  %v4815_v36 = vsel %vm1352_vm6, %v4789_v19, 0.0  ;;  %v4638_v59 = vmul.f32 %v4620_v44, %v6953_v7  ;;  %v4444_v40 = vadd.f32 %v4405_v58, %v7738_v26  ;;  %v4590_v39 = vpop.f32.mrf.mxu1 }
 0x2fe   : > { %v4816_v18 = vadd.f32 %v4815_v36, %v4814_v5  ;;  %v6119_v15 = vpop.f32.mrf.mxu0 }
 0x2ff   : > { %v5394_v14 = vpack.c.bf16 %v4638_v59, %v4638_v59  ;;  %v4756_v13 = vsel %vm1352_vm6, %v4638_v59, 0.0  ;;  %v4790_v4 = vmul.f32 %v4638_v59, %v4638_v59  ;;  %v4621_v49 = vadd.f32 %v4582_v47, %v4444_v40  ;;  %v6161_v2 = vpop.f32.mrf.mxu1 }
 0x300   : > { %v4757_v10 = vadd.f32 %v4756_v13, %v4755_v21  ;;  %v4410_v37 = vpop.f32.mrf.mxu0 }
 0x301   : > { %5317 = vst.msk [vmem:[%s6808_s8 + $0x100] sm:$0xf] %vm1333_vm5, %v5394_v14  ;;  %v4817_v51 = vsel %vm1352_vm6, %v4790_v4, 0.0  ;;  %v4639_v7 = vmul.f32 %v4621_v49, %v6966_v62  ;;  %v4445_v26 = vadd.f32 %v4410_v37, %v7740_v38  ;;  %v4595_v46 = vpop.f32.mrf.mxu1 }
 0x302   : > { %v4818_v61 = vadd.f32 %v4817_v51, %v4816_v18  ;;  %v6122_v55 = vpop.f32.mrf.mxu0 }
 0x303   : > { %v5395_v31 = vpack.c.bf16 %v4639_v7, %v4639_v7  ;;  %v4758_v41 = vsel %vm1352_vm6, %v4639_v7, 0.0  ;;  %v4791_v0 = vmul.f32 %v4639_v7, %v4639_v7  ;;  %v4622_v8 = vadd.f32 %v4587_v25, %v4445_v26  ;;  %v6164_v35 = vpop.f32.mrf.mxu1 }
 0x304   : > { %v4759_v28 = vadd.f32 %v4758_v41, %v4757_v10  ;;  %v4413_v53 = vpop.f32.mrf.mxu0 }
 0x305   : > { %5318 = vst.msk [vmem:[%s6808_s8 + $0x104] sm:$0xf] %vm1333_vm5, %v5395_v31  ;;  %v4819_v32 = vsel %vm1352_vm6, %v4791_v0, 0.0  ;;  %v4640_v62 = vmul.f32 %v4622_v8, %v6982_v24  ;;  %v4446_v38 = vadd.f32 %v4413_v53, %v7742_v48  ;;  %v4598_v57 = vpop.f32.mrf.mxu1 }
 0x306   : > { %v4820_v47 = vadd.f32 %v4819_v32, %v4818_v61  ;;  %v6123_v11 = vpop.f32.mrf.mxu0 }
 0x307   : > { %v5396_v16 = vpack.c.bf16 %v4640_v62, %v4640_v62  ;;  %v4760_v12 = vsel %vm1352_vm6, %v4640_v62, 0.0  ;;  %v4792_v23 = vmul.f32 %v4640_v62, %v4640_v62  ;;  %v4623_v9 = vadd.f32 %v4590_v39, %v4446_v38  ;;  %v6165_v3 = vpop.f32.mrf.mxu1 }
 0x308   : > { %v4761_v27 = vadd.f32 %v4760_v12, %v4759_v28  ;;  %v4418_v50 = vpop.f32.mrf.mxu0 }
 0x309   : > { %5319 = vst.msk [vmem:[%s6808_s8 + $0x108] sm:$0xf] %vm1333_vm5, %v5396_v16  ;;  %v4821_v60 = vsel %vm1352_vm6, %v4792_v23, 0.0  ;;  %v4641_v24 = vmul.f32 %v4623_v9, %v6995_v43  ;;  %v4447_v48 = vadd.f32 %v4418_v50, %v7744_v63  ;;  %v4603_v20 = vpop.f32.mrf.mxu1 }
 0x30a   : > { %v4822_v54 = vadd.f32 %v4821_v60, %v4820_v47  ;;  %v6126_v56 = vpop.f32.mrf.mxu0 }
 0x30b   : > { %v5397_v25 = vpack.c.bf16 %v4641_v24, %v4641_v24  ;;  %v4762_v5 = vsel %vm1352_vm6, %v4641_v24, 0.0  ;;  %v4793_v1 = vmul.f32 %v4641_v24, %v4641_v24  ;;  %v4624_v42 = vadd.f32 %v4595_v46, %v4447_v48  ;;  %v6168_v33 = vpop.f32.mrf.mxu1 }
 0x30c   : > { %v4763_v19 = vadd.f32 %v4762_v5, %v4761_v27  ;;  %v4421_v44 = vpop.f32.mrf.mxu0 }
 0x30d   : > { %5320 = vst.msk [vmem:[%s6808_s8 + $0x10c] sm:$0xf] %vm1333_vm5, %v5397_v25  ;;  %v4823_v30 = vsel %vm1352_vm6, %v4793_v1, 0.0  ;;  %v4642_v43 = vmul.f32 %v4624_v42, %v7011_v6  ;;  %v4448_v63 = vadd.f32 %v4421_v44, %v7746_v22  ;;  %v4606_v21 = vpop.f32.mrf.mxu1 }
 0x30e   : > { %v4824_v58 = vadd.f32 %v4823_v30, %v4822_v54  ;;  %v6127_v36 = vpop.f32.mrf.mxu0 }
 0x30f   : > { %v5398_v59 = vpack.c.bf16 %v4642_v43, %v4642_v43  ;;  %v4764_v40 = vsel %vm1352_vm6, %v4642_v43, 0.0  ;;  %v4794_v39 = vmul.f32 %v4642_v43, %v4642_v43  ;;  %v4625_v18 = vadd.f32 %v4598_v57, %v4448_v63  ;;  %v6169_v15 = vpop.f32.mrf.mxu1 }
 0x310   : > { %v4765_v14 = vadd.f32 %v4764_v40, %v4763_v19  ;;  %v4426_v13 = vpop.f32.mrf.mxu0 }
 0x311   : > { %5321 = vst.msk [vmem:[%s6808_s8 + $0x110] sm:$0xf] %vm1333_vm5, %v5398_v59  ;;  %v4825_v4 = vsel %vm1352_vm6, %v4794_v39, 0.0  ;;  %v4643_v6 = vmul.f32 %v4625_v18, %v7024_v29  ;;  %v4449_v22 = vadd.f32 %v4426_v13, %v7748_v45 }
 0x312   : > { %v4826_v49 = vadd.f32 %v4825_v4, %v4824_v58  ;;  %v6130_v2 = vpop.f32.mrf.mxu0 }
 0x313   : > { %v5399_v10 = vpack.c.bf16 %v4643_v6, %v4643_v6  ;;  %v4766_v37 = vsel %vm1352_vm6, %v4643_v6, 0.0  ;;  %v4795_v51 = vmul.f32 %v4643_v6, %v4643_v6  ;;  %v4626_v7 = vadd.f32 %v4603_v20, %v4449_v22 }
 0x314   : > { %v4767_v26 = vadd.f32 %v4766_v37, %v4765_v14  ;;  %v4429_v46 = vpop.f32.mrf.mxu0 }
 0x315   : > { %5322 = vst.msk [vmem:[%s6808_s8 + $0x114] sm:$0xf] %vm1333_vm5, %v5399_v10  ;;  %v4827_v61 = vsel %vm1352_vm6, %v4795_v51, 0.0  ;;  %v4644_v55 = vmul.f32 %v4626_v7, %v7040_v52  ;;  %v4450_v29 = vadd.f32 %v4429_v46, %v7750_v34 }
 0x316   : > { %v4828_v45 = vadd.f32 %v4827_v61, %v4826_v49  ;;  %v6131_v31 = vpop.f32.mrf.mxu0 }
 0x317   : > { %v5400_v41 = vpack.c.bf16 %v4644_v55, %v4644_v55  ;;  %v4768_v0 = vsel %vm1352_vm6, %v4644_v55, 0.0  ;;  %v4796_v8 = vmul.f32 %v4644_v55, %v4644_v55  ;;  %v4627_v35 = vadd.f32 %v4606_v21, %v4450_v29 }
 0x318   : > { %v4769_v28 = vadd.f32 %v4768_v0, %v4767_v26 }
 0x319   : > { %5323 = vst.msk [vmem:[%s6808_s8 + $0x118] sm:$0xf] %vm1333_vm5, %v5400_v41  ;;  %v4829_v53 = vsel %vm1352_vm6, %v4796_v8, 0.0  ;;  %v4645_v32 = vmul.f32 %v4627_v35, %v7054_v17 }
 0x31a   : > { %v4830_v62 = vadd.f32 %v4829_v53, %v4828_v45 }
 0x31b   : > { %v5401_v38 = vpack.c.bf16 %v4645_v32, %v4645_v32  ;;  %v4770_v52 = vsel %vm1352_vm6, %v4645_v32, 0.0  ;;  %v4797_v34 = vmul.f32 %v4645_v32, %v4645_v32 }
 0x31c   : > { %v4771_v57 = vadd.f32 %v4770_v52, %v4769_v28 }
 0x31d   : > { %5324 = vst.msk [vmem:[%s6808_s8 + $0x11c] sm:$0xf] %vm1333_vm5, %v5401_v38  ;;  %v4831_v47 = vsel %vm1352_vm6, %v4797_v34, 0.0 }
 0x31e   : > { %v4772_v11 = vrot.slane %v4771_v57, 4  ;;  %v4832_v16 = vadd.f32 %v4831_v47, %v4830_v62 }
 0x320   : > { %v4773_v12 = vadd.f32 %v4772_v11, %v4771_v57  ;;  %v4833_v23 = vrot.slane %v4832_v16, 4 }
 0x322   : > { %v4774_v9 = vrot.slane %v4773_v12, 2  ;;  %v4834_v3 = vadd.f32 %v4833_v23, %v4832_v16 }
 0x324   : > { %v4775_v27 = vadd.f32 %v4774_v9, %v4773_v12  ;;  %v4835_v17 = vrot.slane %v4834_v3, 2 }
 0x326   : > { %v4776_v50 = vrot.slane %v4775_v27, 1  ;;  %v4836_v60 = vadd.f32 %v4835_v17, %v4834_v3 }
 0x328   : > { %v4777_v24 = vadd.f32 %v4776_v50, %v4775_v27  ;;  %v4837_v48 = vrot.slane %v4836_v60, 1 }
 0x32a   : > { %5325 = vst.msk [vmem:[%s7105_s19 + $0x6] sm:$0x1] %vm1394_vm7, %v4777_v24  ;;  %v4838_v20 = vadd.f32 %v4837_v48, %v4836_v60 }
 0x32c   : > { %5326 = vst.msk [vmem:[%s7105_s19 + $0x7] sm:$0x1] %vm1394_vm7, %v4838_v20 }
 0x32d PF: > { %s15_s15 = sadd.s32 1, %s6292_s15  }
 0x32e   : > { %p12_p4 = scmp.ge.s32.totalorder %s15_s15, 4  }
 0x330   :  { %14 = sbr.rel (!%p12_p4) target bundleno = 1 (0x1), region = 83 }

</bundles_post_ra>
